<compile_context>
chip_gen: v6e
topology: v6e:2x2x1
jax: 0.10.0
libtpu: 0.0.40
codegen_flags: <defaults>
</compile_context>

<pallas_src>
import jax
import jax.numpy as jnp
from jax.experimental import pallas as pl
from jax.experimental.pallas import tpu as pltpu

EPS = 1e-5
KH, KW = 3, 3
LANES = 128
_FOLD_TAPS_MAX_CIN = 128   # fold the 9 taps into the contraction dim when Cin is small


def _round_up(v, m):
    return (v + m - 1) // m * m


def _tpu_config():
    """Generation-aware Cout tile / VMEM budget / row-tile byte budget."""
    kind = ""
    try:
        kind = jax.devices()[0].device_kind.lower()
    except Exception:
        pass
    if "v5 lite" in kind or "v5e" in kind or "v5litepod" in kind:
        # v5e: 128 MiB VMEM, 128-wide MXU.
        return {"tco": 128, "vmem_limit": 100 * 1024 * 1024,
                "block_budget": 4 * 1024 * 1024}
    if "v7" in kind or "7x" in kind:
        # v7x: only 64 MiB VMEM per TensorCore -> smaller budget and tiles.
        return {"tco": 256, "vmem_limit": 40 * 1024 * 1024,
                "block_budget": 2 * 1024 * 1024}
    if "v6" in kind or "trillium" in kind:
        # v6e: 128 MiB VMEM, 256-wide MXU.
        return {"tco": 256, "vmem_limit": 100 * 1024 * 1024,
                "block_budget": 4 * 1024 * 1024}
    # Unknown / older generation: conservative.
    return {"tco": 128, "vmem_limit": 64 * 1024 * 1024,
            "block_budget": 2 * 1024 * 1024}


def _pick_row_tile(H, W, Cin, tco, fold_taps, block_budget):
    """Largest divisor TH of H whose per-step working set fits the budget and
    keeps the flattened (TH*W, TCO) output block sublane-aligned."""
    bytes_per_row = W * (4 * tco                       # f32 acc / output block
                         + 2 * Cin                     # bf16 x tile
                         + (2 * 9 * Cin if fold_taps else 4 * Cin))
    max_rows = max(1, block_budget // bytes_per_row)
    divisors = [d for d in range(1, H + 1) if H % d == 0]
    valid = [d for d in divisors if (d * W) % 8 == 0 or d == H]
    fits = [d for d in valid if d <= max_rows]
    return max(fits) if fits else min(valid)


# --------------------------------------------------------------------------- #
# Pass 1: fused 3x3 conv (+ optional ReLU epilogue, + optional BN statistics)  #
# --------------------------------------------------------------------------- #
def _make_conv3x3_kernel(TH, W, Cin, n_rt, *, apply_relu, with_stats, has_halo,
                         batch_axis, row_axis, co_axis):
    """Refs (in order): x (1,TH,W,Cin) bf16 [, top (1,1,W,Cin), bot (1,1,W,Cin)],
    w (9*Cin,TCO) bf16, conv (1,TH*W,TCO) [, sum (1,TCO) f32, ssq (1,TCO) f32],
    xpad scratch (TH+2,W+2,Cin) bf16."""
    fold_taps = Cin <= _FOLD_TAPS_MAX_CIN

    def kernel(*refs):
        if has_halo:
            x_ref, top_ref, bot_ref, w_ref = refs[:4]
            rest = refs[4:]
        else:
            x_ref, w_ref = refs[:2]
            top_ref = bot_ref = None
            rest = refs[2:]
        if with_stats:
            conv_ref, sum_ref, ssq_ref, xpad_ref = rest
        else:
            conv_ref, xpad_ref = rest

        r = pl.program_id(row_axis)

        def _stage():
            # Only the four border strips are zeroed (never the full scratch);
            # the interior is fully overwritten below.
            zrow = jnp.zeros((1, W + 2, Cin), xpad_ref.dtype)
            zcol = jnp.zeros((TH, 1, Cin), xpad_ref.dtype)
            xpad_ref[0:1, :, :] = zrow                      # top halo row
            xpad_ref[TH + 1:TH + 2, :, :] = zrow            # bottom halo row
            xpad_ref[1:TH + 1, 0:1, :] = zcol               # left 1-px halo
            xpad_ref[1:TH + 1, W + 1:W + 2, :] = zcol       # right 1-px halo
            xpad_ref[1:TH + 1, 1:W + 1, :] = x_ref[0]       # bf16 staging
            if has_halo:
                # Interior row tiles get real neighbour rows in the halo; only
                # true image borders stay zero.
                @pl.when(r > 0)
                def _():
                    xpad_ref[0:1, 1:W + 1, :] = top_ref[0]

                @pl.when(r < n_rt - 1)
                def _():
                    xpad_ref[TH + 1:TH + 2, 1:W + 1, :] = bot_ref[0]

        if with_stats:
            # Row axis is innermost -> x changes every step: always stage.
            _stage()
        else:
            # co is innermost and the x block is co-invariant: Pallas skips the
            # HBM re-fetch and we skip re-staging -> the activation is staged
            # once per (image, row tile) instead of once per Cout tile.
            pl.when(pl.program_id(co_axis) == 0)(_stage)

        # Shifted per-tap views, flattened to (TH*W, Cin) rows (static slices).
        # TODO(synk): for tiny Cin these slices still run at Cin/128 lane
        #             utilization; a roll-based lane-dense gather would remove
        #             the remaining relayout cost.
        taps = [
            xpad_ref[kh:kh + TH, kw:kw + W, :].reshape(TH * W, Cin)
            for kh in range(KH)
            for kw in range(KW)
        ]

        if fold_taps:
            # Small Cin: one (TH*W, 9*Cin) @ (9*Cin, TCO) matmul -> 9x more
            # useful contraction rows per MXU pass than per-tap matmuls.
            patch = jnp.concatenate(taps, axis=-1)
            acc = jnp.dot(patch, w_ref[...], preferred_element_type=jnp.float32)
        else:
            # Large Cin: the per-tap matmuls already fill the MXU K dimension.
            acc = jnp.zeros((TH * W, w_ref.shape[-1]), jnp.float32)
            for t, tap in enumerate(taps):
                acc = acc + jnp.dot(tap, w_ref[t * Cin:(t + 1) * Cin, :],
                                    preferred_element_type=jnp.float32)

        if with_stats:
            # Global (all N,H,W) BN statistics: the (1,TCO) sum/ssq blocks stay
            # VMEM-resident across the inner (batch,row) grid axes.
            @pl.when(jnp.logical_and(pl.program_id(batch_axis) == 0,
                                     pl.program_id(row_axis) == 0))
            def _init_stats():
                sum_ref[...] = jnp.zeros_like(sum_ref)
                ssq_ref[...] = jnp.zeros_like(ssq_ref)

            # TODO(synk): E[x^2]-E[x]^2 in f32 can cancel for very large counts;
            #             a Chan-style per-block combine would be more robust.
            sum_ref[...] += jnp.sum(acc, axis=0, keepdims=True)
            ssq_ref[...] += jnp.sum(acc * acc, axis=0, keepdims=True)

        if apply_relu:
            acc = jnp.maximum(acc, 0.0)

        # Lane-dense store: flattened (TH*W, TCO) block, TCO a multiple of 128.
        conv_ref[...] = acc[None].astype(conv_ref.dtype)

    return kernel


def _conv3x3_pass(x_nchw, weight_oihw, *, apply_relu, with_stats, row_tile=None):
    """Runs pass 1 on NHWC/bf16 data.  Returns padded-Cout outputs + tiling info."""
    N, Cin, H, W = x_nchw.shape
    Cout = weight_oihw.shape[0]

    cfg = _tpu_config()
    tco = 128 if (Cout <= 128 or cfg["tco"] <= 128) else 256
    c_pad = _round_up(Cout, tco)
    n_co = c_pad // tco
    fold_taps = Cin <= _FOLD_TAPS_MAX_CIN

    if row_tile is None:
        TH = _pick_row_tile(H, W, Cin, tco, fold_taps, cfg["block_budget"])
    else:
        TH = int(row_tile)
        assert H % TH == 0 and ((TH * W) % 8 == 0 or TH == H), \
            "row_tile must divide H and keep TH*W a multiple of 8"
    n_rt = H // TH
    has_halo = n_rt > 1

    # NHWC / bf16 activations (f32 accumulation happens in-kernel).
    # TODO(synk): in a full NHWC network this transpose (and the NCHW ones in
    #             the wrappers) disappears; it only adapts the standalone op to
    #             the PyTorch NCHW interface.
    x_nhwc = jnp.transpose(x_nchw, (0, 2, 3, 1)).astype(jnp.bfloat16)

    # OIHW -> (KH*KW*Cin, Cout): taps folded into the contraction dim; Cout
    # padded to the lane tile so every output store is lane-dense.
    w2d = jnp.transpose(weight_oihw, (2, 3, 1, 0)).reshape(KH * KW * Cin, Cout)
    w2d = jnp.pad(w2d, ((0, 0), (0, c_pad - Cout))).astype(jnp.bfloat16)

    conv_dtype = jnp.bfloat16 if with_stats else jnp.float32
    conv_shape = jax.ShapeDtypeStruct((N, H * W, c_pad), conv_dtype)
    stat_shape = jax.ShapeDtypeStruct((1, c_pad), jnp.float32)

    if with_stats:
        # grid (co, n, r): sum/ssq stay resident across (n, r); weights are
        # fetched once per Cout tile.
        grid = (n_co, N, n_rt)
        co_axis, batch_axis, row_axis = 0, 1, 2
        x_idx = lambda co, n, r: (n, r, 0, 0)
        top_idx = lambda co, n, r: (n, jnp.maximum(r * TH - 1, 0), 0, 0)
        bot_idx = lambda co, n, r: (n, jnp.minimum(r * TH + TH, H - 1), 0, 0)
        w_idx = lambda co, n, r: (0, co)
        conv_idx = lambda co, n, r: (n, r, co)
        stat_idx = lambda co, n, r: (0, co)
        dims = ("parallel", "arbitrary", "arbitrary")
    else:
        # grid (n, r, co): the x block is co-invariant -> staged once per
        # (image, row tile); batch/row axes megacore-splittable.
        grid = (N, n_rt, n_co)
        batch_axis, row_axis, co_axis = 0, 1, 2
        x_idx = lambda n, r, co: (n, r, 0, 0)
        top_idx = lambda n, r, co: (n, jnp.maximum(r * TH - 1, 0), 0, 0)
        bot_idx = lambda n, r, co: (n, jnp.minimum(r * TH + TH, H - 1), 0, 0)
        w_idx = lambda n, r, co: (0, co)
        conv_idx = lambda n, r, co: (n, r, co)
        stat_idx = None
        dims = ("parallel", "parallel", "arbitrary")

    in_specs = [pl.BlockSpec((1, TH, W, Cin), x_idx)]
    operands = [x_nhwc]
    if has_halo:
        in_specs += [pl.BlockSpec((1, 1, W, Cin), top_idx),
                     pl.BlockSpec((1, 1, W, Cin), bot_idx)]
        operands += [x_nhwc, x_nhwc]
    in_specs += [pl.BlockSpec((KH * KW * Cin, tco), w_idx)]
    operands += [w2d]

    conv_spec = pl.BlockSpec((1, TH * W, tco), conv_idx)
    if with_stats:
        out_shape = (conv_shape, stat_shape, stat_shape)
        out_specs = (conv_spec,
                     pl.BlockSpec((1, tco), stat_idx),
                     pl.BlockSpec((1, tco), stat_idx))
    else:
        out_shape = conv_shape
        out_specs = conv_spec

    kernel = _make_conv3x3_kernel(
        TH, W, Cin, n_rt, apply_relu=apply_relu, with_stats=with_stats,
        has_halo=has_halo, batch_axis=batch_axis, row_axis=row_axis,
        co_axis=co_axis)

    result = pl.pallas_call(
        kernel,
        out_shape=out_shape,
        grid=grid,
        in_specs=in_specs,
        out_specs=out_specs,
        scratch_shapes=[pltpu.VMEM((TH + 2, W + 2, Cin), jnp.bfloat16)],
        compiler_params=pltpu.CompilerParams(
            dimension_semantics=dims,
            vmem_limit_bytes=cfg["vmem_limit"]),
    )(*operands)

    return result, (c_pad, tco, n_co, TH, n_rt)


# --------------------------------------------------------------------------- #
# Pass 2: BatchNorm normalization (global stats -> per-channel scale/shift)    #
# --------------------------------------------------------------------------- #
def _make_bn_norm_kernel(count):
    inv_count = 1.0 / float(count)

    def kernel(conv_ref, sum_ref, ssq_ref, gamma_ref, beta_ref, out_ref):
        # Per-channel scale/shift hoisted to a single (1, TCO) vector so the
        # full-tile epilogue is one fused multiply-add per element.
        mean = sum_ref[...] * inv_count
        var = jnp.maximum(ssq_ref[...] * inv_count - mean * mean, 0.0)
        inv_std = jax.lax.rsqrt(var + EPS)
        scale = gamma_ref[...] * inv_std
        shift = beta_ref[...] - mean * scale
        out_ref[...] = (conv_ref[...].astype(jnp.float32) * scale[:, None, :]
                        + shift[:, None, :])

    return kernel


# --------------------------------------------------------------------------- #
# Public wrappers (match the PyTorch module building blocks)                   #
# --------------------------------------------------------------------------- #
def conv_relu_2d(x_nchw, weight_oihw, row_tile=None):
    """ConvRelu.forward: conv3x3 (stride 1, pad 1, no bias) -> ReLU."""
    N, _, H, W = x_nchw.shape
    Cout = weight_oihw.shape[0]
    out_flat, _ = _conv3x3_pass(x_nchw, weight_oihw, apply_relu=True,
                                with_stats=False, row_tile=row_tile)
    out = out_flat.reshape(N, H, W, -1)[..., :Cout]
    return jnp.transpose(out, (0, 3, 1, 2))


def conv_bn_2d(x_nchw, weight_oihw, gamma, beta, row_tile=None):
    """conv3x3 (stride 1, pad 1, no bias) -> BatchNorm2d (training-mode stats)."""
    N, _, H, W = x_nchw.shape
    Cout = weight_oihw.shape[0]

    (conv_flat, csum, cssq), (c_pad, tco, n_co, TH, n_rt) = _conv3x3_pass(
        x_nchw, weight_oihw, apply_relu=False, with_stats=True,
        row_tile=row_tile)

    gamma_pad = jnp.pad(gamma.astype(jnp.float32).reshape(1, Cout),
                        ((0, 0), (0, c_pad - Cout)))
    beta_pad = jnp.pad(beta.astype(jnp.float32).reshape(1, Cout),
                       ((0, 0), (0, c_pad - Cout)))

    cfg = _tpu_config()
    count = N * H * W   # biased (training-mode) batch statistics
    y_flat = pl.pallas_call(
        _make_bn_norm_kernel(count),
        out_shape=jax.ShapeDtypeStruct((N, H * W, c_pad), jnp.float32),
        grid=(N, n_rt, n_co),
        in_specs=[
            pl.BlockSpec((1, TH * W, tco), lambda n, r, co: (n, r, co)),
            pl.BlockSpec((1, tco), lambda n, r, co: (0, co)),
            pl.BlockSpec((1, tco), lambda n, r, co: (0, co)),
            pl.BlockSpec((1, tco), lambda n, r, co: (0, co)),
            pl.BlockSpec((1, tco), lambda n, r, co: (0, co)),
        ],
        out_specs=pl.BlockSpec((1, TH * W, tco), lambda n, r, co: (n, r, co)),
        compiler_params=pltpu.CompilerParams(
            dimension_semantics=("parallel", "parallel", "parallel"),
            vmem_limit_bytes=cfg["vmem_limit"]),
    )(conv_flat, csum, cssq, gamma_pad, beta_pad)

    y = y_flat.reshape(N, H, W, c_pad)[..., :Cout]
    return jnp.transpose(y, (0, 3, 1, 2))


# --------------------------------------------------------------------------- #
# Pure-JAX references                                                          #
# --------------------------------------------------------------------------- #
def _reference_conv3x3(x_nchw, weight_oihw):
    # The reference uses the same bf16-rounded operands the kernel feeds the
    # MXU, accumulated in f32 -> apples-to-apples comparison.
    xq = x_nchw.astype(jnp.bfloat16).astype(jnp.float32)
    wq = weight_oihw.astype(jnp.bfloat16).astype(jnp.float32)
    return jax.lax.conv_general_dilated(
        xq, wq, window_strides=(1, 1), padding=((1, 1), (1, 1)),
        dimension_numbers=("NCHW", "OIHW", "NCHW"),
        precision=jax.lax.Precision.HIGHEST)


def reference_conv_relu(x_nchw, weight_oihw):
    return jnp.maximum(_reference_conv3x3(x_nchw, weight_oihw), 0.0)


def reference_conv_bn(x_nchw, weight_oihw, gamma, beta):
    y = _reference_conv3x3(x_nchw, weight_oihw)
    mean = y.mean(axis=(0, 2, 3), keepdims=True)
    var = ((y - mean) ** 2).mean(axis=(0, 2, 3), keepdims=True)   # biased
    return ((y - mean) * jax.lax.rsqrt(var + EPS)
            * gamma.reshape(1, -1, 1, 1) + beta.reshape(1, -1, 1, 1))


if __name__ == "__main__":
    # Small shapes consistent with the module blocks: batch=2, cin=4, cout=8, 16x16.
    N, CIN, COUT, H, W = 2, 4, 8, 16, 16

    key = jax.random.PRNGKey(0)
    k_x, k_w, k_g, k_b, k_x2, k_w2 = jax.random.split(key, 6)

    x = jax.random.normal(k_x, (N, CIN, H, W), dtype=jnp.float32)
    weight = jax.random.normal(k_w, (COUT, CIN, KH, KW), dtype=jnp.float32) / jnp.sqrt(CIN * KH * KW)
    gamma = 1.0 + 0.1 * jax.random.normal(k_g, (COUT,), dtype=jnp.float32)
    beta = 0.1 * jax.random.normal(k_b, (COUT,), dtype=jnp.float32)

    # 1) ConvRelu building block (decoder / dec0 blocks), single row tile.
    out_cr = jax.block_until_ready(conv_relu_2d(x, weight))
    ref_cr = reference_conv_relu(x, weight)
    assert out_cr.shape == (N, COUT, H, W)
    assert jnp.allclose(out_cr, ref_cr, rtol=1e-3, atol=1e-3), "conv+relu mismatch"

    # 2) Same op with forced row tiling (exercises the halo specs and the
    #    co-gated staging path).
    out_cr8 = jax.block_until_ready(conv_relu_2d(x, weight, row_tile=8))
    assert jnp.allclose(out_cr8, ref_cr, rtol=1e-3, atol=1e-3), "row-tiled conv+relu mismatch"

    # 3) conv3x3 + BatchNorm building block (encoder bottleneck pattern).
    #    Tolerance accounts for the bf16 conv intermediate (stats stay f32).
    out_bn = jax.block_until_ready(conv_bn_2d(x, weight, gamma, beta))
    ref_bn = reference_conv_bn(x, weight, gamma, beta)
    assert out_bn.shape == (N, COUT, H, W)
    assert jnp.allclose(out_bn, ref_bn, rtol=2e-2, atol=2e-2), "conv+bn mismatch"

    out_bn8 = jax.block_until_ready(conv_bn_2d(x, weight, gamma, beta, row_tile=8))
    assert jnp.allclose(out_bn8, ref_bn, rtol=2e-2, atol=2e-2), "row-tiled conv+bn mismatch"

    # 4) Large-Cin layer (per-tap MXU path, Cin > fold threshold) with row tiling.
    CIN2 = 192
    x2 = jax.random.normal(k_x2, (N, CIN2, H, W), dtype=jnp.float32)
    weight2 = jax.random.normal(k_w2, (COUT, CIN2, KH, KW), dtype=jnp.float32) / jnp.sqrt(CIN2 * KH * KW)
    out2 = jax.block_until_ready(conv_relu_2d(x2, weight2, row_tile=8))
    ref2 = reference_conv_relu(x2, weight2)
    assert jnp.allclose(out2, ref2, rtol=1e-3, atol=1e-3), "large-Cin conv+relu mismatch"

    print("KERNEL_OK")
</pallas_src>

<mosaic_0001>
module attributes {stable_mosaic.version = 11 : i64} {
  func.func @kernel(%arg0: i32, %arg1: i32, %arg2: i32, %arg3: memref<1x16x16x4xbf16, #tpu.memory_space<vmem>>, %arg4: memref<36x128xbf16, #tpu.memory_space<vmem>>, %arg5: memref<1x256x128xf32, #tpu.memory_space<vmem>>, %arg6: memref<18x18x4xbf16, #tpu.memory_space<vmem>>) attributes {dimension_semantics = [#tpu.dimension_semantics<parallel>, #tpu.dimension_semantics<parallel>, #tpu.dimension_semantics<arbitrary>], iteration_bounds = array<i64: 2, 1, 1>, scalar_prefetch = 0 : i64, scratch_operands = 1 : i64, tpu.core_type = #tpu.core_type<tc>, window_params = [{transform_indices = @transform_0, window_bounds = array<i64: 1, 16, 16, 4>}, {transform_indices = @transform_1, window_bounds = array<i64: 36, 128>}, {transform_indices = @transform_2, window_bounds = array<i64: 1, 256, 128>}]} {
    %c0_i32 = arith.constant 0 : i32
    %0 = arith.cmpi eq, %arg2, %c0_i32 : i32
    %1 = arith.extui %0 : i1 to i32
    %c0_i32_0 = arith.constant 0 : i32
    %2 = arith.cmpi ne, %1, %c0_i32_0 : i32
    scf.if %2 {
      %cst_31 = arith.constant 0.000000e+00 : bf16
      %28 = vector.broadcast %cst_31 : bf16 to vector<1x18x4xbf16>
      %cst_32 = arith.constant 0.000000e+00 : bf16
      %29 = vector.broadcast %cst_32 : bf16 to vector<16x1x4xbf16>
      %c0_33 = arith.constant 0 : index
      %c0_34 = arith.constant 0 : index
      %c0_35 = arith.constant 0 : index
      %30 = vector.load %arg6[%c0_33, %c0_34, %c0_35] : memref<18x18x4xbf16, #tpu.memory_space<vmem>>, vector<1x18x4xbf16>
      tpu.vector_store %arg6[%c0_33, %c0_34, %c0_35], %28 {strides = array<i32>} : memref<18x18x4xbf16, #tpu.memory_space<vmem>>, vector<1x18x4xbf16>,
      %c17 = arith.constant 17 : index
      %c0_36 = arith.constant 0 : index
      %c0_37 = arith.constant 0 : index
      %31 = vector.load %arg6[%c17, %c0_36, %c0_37] : memref<18x18x4xbf16, #tpu.memory_space<vmem>>, vector<1x18x4xbf16>
      tpu.vector_store %arg6[%c17, %c0_36, %c0_37], %28 {strides = array<i32>} : memref<18x18x4xbf16, #tpu.memory_space<vmem>>, vector<1x18x4xbf16>,
      %c1_38 = arith.constant 1 : index
      %c0_39 = arith.constant 0 : index
      %c0_40 = arith.constant 0 : index
      %32 = vector.load %arg6[%c1_38, %c0_39, %c0_40] : memref<18x18x4xbf16, #tpu.memory_space<vmem>>, vector<16x1x4xbf16>
      tpu.vector_store %arg6[%c1_38, %c0_39, %c0_40], %29 {strides = array<i32>} : memref<18x18x4xbf16, #tpu.memory_space<vmem>>, vector<16x1x4xbf16>,
      %c1_41 = arith.constant 1 : index
      %c17_42 = arith.constant 17 : index
      %c0_43 = arith.constant 0 : index
      %33 = vector.load %arg6[%c1_41, %c17_42, %c0_43] : memref<18x18x4xbf16, #tpu.memory_space<vmem>>, vector<16x1x4xbf16>
      tpu.vector_store %arg6[%c1_41, %c17_42, %c0_43], %29 {strides = array<i32>} : memref<18x18x4xbf16, #tpu.memory_space<vmem>>, vector<16x1x4xbf16>,
      %c0_44 = arith.constant 0 : index
      %c0_45 = arith.constant 0 : index
      %c0_46 = arith.constant 0 : index
      %c0_47 = arith.constant 0 : index
      %34 = vector.load %arg3[%c0_44, %c0_45, %c0_46, %c0_47] : memref<1x16x16x4xbf16, #tpu.memory_space<vmem>>, vector<1x16x16x4xbf16>
      %35 = vector.shape_cast %34 : vector<1x16x16x4xbf16> to vector<16x16x4xbf16>
      %c1_48 = arith.constant 1 : index
      %c1_49 = arith.constant 1 : index
      %c0_50 = arith.constant 0 : index
      %36 = vector.load %arg6[%c1_48, %c1_49, %c0_50] : memref<18x18x4xbf16, #tpu.memory_space<vmem>>, vector<16x16x4xbf16>
      tpu.vector_store %arg6[%c1_48, %c1_49, %c0_50], %35 {strides = array<i32>} : memref<18x18x4xbf16, #tpu.memory_space<vmem>>, vector<16x16x4xbf16>,
    } else {
    }
    %c0 = arith.constant 0 : index
    %c0_1 = arith.constant 0 : index
    %c0_2 = arith.constant 0 : index
    %3 = vector.load %arg6[%c0, %c0_1, %c0_2] : memref<18x18x4xbf16, #tpu.memory_space<vmem>>, vector<16x16x4xbf16>
    %4 = vector.shape_cast %3 : vector<16x16x4xbf16> to vector<256x4xbf16>
    %c0_3 = arith.constant 0 : index
    %c1 = arith.constant 1 : index
    %c0_4 = arith.constant 0 : index
    %5 = vector.load %arg6[%c0_3, %c1, %c0_4] : memref<18x18x4xbf16, #tpu.memory_space<vmem>>, vector<16x16x4xbf16>
    %6 = vector.shape_cast %5 : vector<16x16x4xbf16> to vector<256x4xbf16>
    %c0_5 = arith.constant 0 : index
    %c2 = arith.constant 2 : index
    %c0_6 = arith.constant 0 : index
    %7 = vector.load %arg6[%c0_5, %c2, %c0_6] : memref<18x18x4xbf16, #tpu.memory_space<vmem>>, vector<16x16x4xbf16>
    %8 = vector.shape_cast %7 : vector<16x16x4xbf16> to vector<256x4xbf16>
    %c1_7 = arith.constant 1 : index
    %c0_8 = arith.constant 0 : index
    %c0_9 = arith.constant 0 : index
    %9 = vector.load %arg6[%c1_7, %c0_8, %c0_9] : memref<18x18x4xbf16, #tpu.memory_space<vmem>>, vector<16x16x4xbf16>
    %10 = vector.shape_cast %9 : vector<16x16x4xbf16> to vector<256x4xbf16>
    %c1_10 = arith.constant 1 : index
    %c1_11 = arith.constant 1 : index
    %c0_12 = arith.constant 0 : index
    %11 = vector.load %arg6[%c1_10, %c1_11, %c0_12] : memref<18x18x4xbf16, #tpu.memory_space<vmem>>, vector<16x16x4xbf16>
    %12 = vector.shape_cast %11 : vector<16x16x4xbf16> to vector<256x4xbf16>
    %c1_13 = arith.constant 1 : index
    %c2_14 = arith.constant 2 : index
    %c0_15 = arith.constant 0 : index
    %13 = vector.load %arg6[%c1_13, %c2_14, %c0_15] : memref<18x18x4xbf16, #tpu.memory_space<vmem>>, vector<16x16x4xbf16>
    %14 = vector.shape_cast %13 : vector<16x16x4xbf16> to vector<256x4xbf16>
    %c2_16 = arith.constant 2 : index
    %c0_17 = arith.constant 0 : index
    %c0_18 = arith.constant 0 : index
    %15 = vector.load %arg6[%c2_16, %c0_17, %c0_18] : memref<18x18x4xbf16, #tpu.memory_space<vmem>>, vector<16x16x4xbf16>
    %16 = vector.shape_cast %15 : vector<16x16x4xbf16> to vector<256x4xbf16>
    %c2_19 = arith.constant 2 : index
    %c1_20 = arith.constant 1 : index
    %c0_21 = arith.constant 0 : index
    %17 = vector.load %arg6[%c2_19, %c1_20, %c0_21] : memref<18x18x4xbf16, #tpu.memory_space<vmem>>, vector<16x16x4xbf16>
    %18 = vector.shape_cast %17 : vector<16x16x4xbf16> to vector<256x4xbf16>
    %c2_22 = arith.constant 2 : index
    %c2_23 = arith.constant 2 : index
    %c0_24 = arith.constant 0 : index
    %19 = vector.load %arg6[%c2_22, %c2_23, %c0_24] : memref<18x18x4xbf16, #tpu.memory_space<vmem>>, vector<16x16x4xbf16>
    %20 = vector.shape_cast %19 : vector<16x16x4xbf16> to vector<256x4xbf16>
    %21 = tpu.concatenate %4, %6, %8, %10, %12, %14, %16, %18, %20 in 1 : vector<256x4xbf16>, vector<256x4xbf16>, vector<256x4xbf16>, vector<256x4xbf16>, vector<256x4xbf16>, vector<256x4xbf16>, vector<256x4xbf16>, vector<256x4xbf16>, vector<256x4xbf16> -> vector<256x36xbf16>
    %c0_25 = arith.constant 0 : index
    %c0_26 = arith.constant 0 : index
    %22 = vector.load %arg4[%c0_25, %c0_26] : memref<36x128xbf16, #tpu.memory_space<vmem>>, vector<36x128xbf16>
    %cst = arith.constant dense<0.000000e+00> : vector<256x128xf32>
    %23 = tpu.matmul %21, %22, %cst {dimension_numbers = #tpu.dot_dimension_numbers<[1], [0], [0], [1], [0, 0, 1, 1], [], []>} : vector<256x36xbf16>, vector<36x128xbf16>, vector<256x128xf32> -> vector<256x128xf32>
    %cst_27 = arith.constant 0.000000e+00 : f32
    %24 = vector.broadcast %cst_27 : f32 to vector<256x128xf32>
    %25 = arith.maximumf %23, %24 : vector<256x128xf32>
    %26 = vector.shape_cast %25 : vector<256x128xf32> to vector<1x256x128xf32>
    %c0_28 = arith.constant 0 : index
    %c0_29 = arith.constant 0 : index
    %c0_30 = arith.constant 0 : index
    %27 = vector.load %arg5[%c0_28, %c0_29, %c0_30] : memref<1x256x128xf32, #tpu.memory_space<vmem>>, vector<1x256x128xf32>
    tpu.vector_store %arg5[%c0_28, %c0_29, %c0_30], %26 {strides = array<i32>} : memref<1x256x128xf32, #tpu.memory_space<vmem>>, vector<1x256x128xf32>,
    return
  }
  func.func @transform_0(%arg0: i32, %arg1: i32, %arg2: i32) -> (i32, i32, i32, i32) {
    %c0_i32 = arith.constant 0 : i32
    %c0_i32_0 = arith.constant 0 : i32
    %c0_i32_1 = arith.constant 0 : i32
    return %arg0, %arg1, %c0_i32, %c0_i32_0 : i32, i32, i32, i32
  }
  func.func @transform_1(%arg0: i32, %arg1: i32, %arg2: i32) -> (i32, i32) {
    %c0_i32 = arith.constant 0 : i32
    %c0_i32_0 = arith.constant 0 : i32
    return %c0_i32, %arg2 : i32, i32
  }
  func.func @transform_2(%arg0: i32, %arg1: i32, %arg2: i32) -> (i32, i32, i32) {
    %c0_i32 = arith.constant 0 : i32
    return %arg0, %arg1, %arg2 : i32, i32, i32
  }
}

</mosaic_0001>

<bundles_post_ra>
// kernel: tpu_custom_call.1
= control target key start
LH: loop header
LB: loop body
LE: loop exit
PB: predicated region body
PF: predicated region fallthrough
CT: control target
= control target key end

     0   :  { %7 = vsyncpa [#allocation4], 0  ;;  %s6827_s0 = inlined_call_operand.vmem [shape: bf16[2,16,16,4], index: 0, kind: input, shape index: {}]   ;;  %s6828_s1 = inlined_call_operand.vmem [shape: bf16[36,128], index: 1, kind: input, shape index: {}]   ;;  %s6829_s2 = inlined_call_operand.hbm [shape: f32[2,256,128], index: 2, kind: output, shape index: {}]  }
   0x1   :  { %9 = vsyncpa [#allocation4 + $0x1], 0  ;;  %s4562_s9 = smov 0   ;;  %s4564_s10 = smov 0  }
   0x2   :  { %s4566_s11 = smov 0   ;;  %s4568_s12 = smov 0  }
   0x3   :  { %s4570_s13 = smov 0   ;;  %s4572_s14 = smov 0  }
   0x4 LB: > { %s4034_s15 = sadd.s32 4294967295, %s4534_s14   ;;  %s4035_s16 = sadd.s32 4294967294, %s4534_s14   ;;  %s4534_s14 = sphi %s4572_s14, %s15_s14   ;;  %s4530_s13 = sphi %s4570_s13, %s6867_s13   ;;  %s4526_s12 = sphi %s4568_s12, %s6866_s12   ;;  %s4522_s11 = sphi %s4566_s11, %s6865_s11   ;;  %s4518_s10 = sphi %s4564_s10, %s6864_s10   ;;  %s4514_s9 = sphi %s4562_s9, %s6863_s9  }
   0x5   : > { %s34_s17 = sadd.s32 1, %s4530_s13  ;;  %s99_s18 = sadd.s32 1, %s4522_s11 }
   0x6   : > { %p36_p0 = scmp.ge.s32.totalorder %s34_s17, 2  ;;  %p109_p1 = scmp.ne.s32.totalorder %s4522_s11, %s4518_s10 }
   0x7   : > { %p110_p2 = scmp.eq.s32.totalorder %s4034_s15, 1  ;;  %p115_p3 = scmp.ne.s32.totalorder %s4518_s10, %s4514_s9 }
   0x8   : > { %s6869_s17 = smov (%p36_p0, %s34_s17), 0  ;;  %p116_p5 = scmp.eq.s32.totalorder %s4035_s16, 1 }
   0x9   : > { %p4602_p4 = por %p110_p2, %p109_p1  ;;  %s92_s20 = ssub.s32 %s4530_s13, %s6869_s17 }
   0xa   : > { %p4039_p6 = scmp.ge.s32.totalorder %s4534_s14, 1  ;;  %p97_p7 = scmp.eq.s32.totalorder %s92_s20, 0 }
   0xb   : > { %p4609_p8 = por %p116_p5, %p115_p3  ;;  %p155_p9 = scmp.lt.s32.totalorder %s4534_s14, 3 }
   0xc   : > { %s4615_s22 = scalar_select %p97_p7, %s4522_s11, %s99_s18  }
   0xd   : > { %p156_p10 = pnand %p4039_p6, %p155_p9 }
   0xf   : > { %159 = sbr.rel (%p156_p10) target bundleno = 757 (0x2f5), region = 28 }
  0x14   : > { %vm207_vm0 = vcmask 27648   ;;  %vm210_vm1 = vcmask 24576   ;;  %vm218_vm2 = vsmask.f32 256  ;;  %v4536_v0 = vmov 0   ;;  %p187_p11 = scmp.lt.s32.totalorder %s4526_s12, 1 }
  0x15   : > { %208 = vst.msk [vmem:[#allocation2] sm:$0xf] %vm207_vm0, %v4536_v0  ;;  %209 = vst.msk [vmem:[#allocation2 + $0x4] sm:$0xf] %vm207_vm0, %v4536_v0  ;;  %vm268_vm4 = vsmask.f32 7938 }
  0x16   : > { %211 = vst.msk [vmem:[#allocation2 + $0x8] sm:$0x1] %vm210_vm1, %v4536_v0  ;;  %vm4620_vm3 = vmand %vm210_vm1, %vm218_vm2  ;;  %v244_v2 = vld [vmem:[#allocation2 + $0x6c] sm:$0x1]  ;;  %vm1285_vm6 = vcmask 1042432   ;;  %vm1286_vm7 = vcmask 1046532  }
  0x17   : > { %213 = vst.msk [vmem:[#allocation2 + $0xcc] sm:$0xf] %vm207_vm0, %v4536_v0  ;;  %214 = vst.msk [vmem:[#allocation2 + $0xd0] sm:$0xf] %vm207_vm0, %v4536_v0  ;;  %v245_v4 = vsel %vm4620_vm3, 0, %v244_v2  ;;  %s188_s23 = scalar_select %p187_p11, %s4526_s12, 1 }
  0x18   : > { %215 = vst.msk [vmem:[#allocation2 + $0xd4] sm:$0x1] %vm210_vm1, %v4536_v0  ;;  %vm4628_vm5 = vmand %vm210_vm1, %vm268_vm4  ;;  %v220_v5 = vld [vmem:[#allocation2 + $0xc] sm:$0x1]  ;;  %vm834_vm8 = vsmask.f32 3328 }
  0x19   : > { %246 = vst [vmem:[#allocation2 + $0x6c] sm:$0x1] %v245_v4  ;;  %v221_v6 = vsel %vm4620_vm3, 0, %v220_v5  ;;  %v247_v7 = vld [vmem:[#allocation2 + $0x78] sm:$0x1]  ;;  %s4259_s24 = sshll.u32 %s188_s23, 7  ;;  %vm4647_vm9 = vmor %vm1285_vm6, %vm1286_vm7 }
  0x1a   : > { %v223_v8 = vld [vmem:[#allocation2 + $0x18] sm:$0x1]  ;;  %222 = vst [vmem:[#allocation2 + $0xc] sm:$0x1] %v221_v6  ;;  %v248_v9 = vsel %vm4620_vm3, 0, %v247_v7  ;;  %s4654_s27 = scalar_lea.vmem %s6827_s0, %s4259_s24  ;;  %vm4667_vm12 = vmand %vm207_vm0, %vm268_vm4  ;;  %s4537_s28 = smov 8  }
  0x1b   : > { %v224_v10 = vsel %vm4620_vm3, 0, %v223_v8  ;;  %v241_v11 = vld [vmem:[#allocation2 + $0x60] sm:$0x1]  ;;  %v291_v12 = vld [vmem:[#allocation2 + $0x68] sm:$0x1]  ;;  %s4538_s29 = smov 4  }
  0x1c   : > { %249 = vst [vmem:[#allocation2 + $0x78] sm:$0x1] %v248_v9  ;;  %225 = vst [vmem:[#allocation2 + $0x18] sm:$0x1] %v224_v10  ;;  %v242_v13 = vsel %vm4620_vm3, 0, %v241_v11  ;;  %v292_v14 = vsel %vm4628_vm5, 0, %v291_v12 }
  0x1d   : > { %v270_v15 = vld [vmem:[#allocation2 + $0x14] sm:$0x1]  ;;  %vm835_vm10 = vsmask.f32 7440  ;;  %vm350_vm11 = vsmask.f32 4368 }
  0x1e   : > { %243 = vst [vmem:[#allocation2 + $0x60] sm:$0x1] %v242_v13  ;;  %293 = vst [vmem:[#allocation2 + $0x68] sm:$0x1] %v292_v14  ;;  %v271_v17 = vsel %vm4628_vm5, 0, %v270_v15  ;;  %s4539_s30 = smov 12  }
  0x1f   : > { %v787_v18 = vld [vmem:[#allocation2 + $0x4] sm:$0xf]  ;;  %v818_v19 = vld [vmem:[#allocation2 + $0x8] sm:$0x1]  ;;  %v1221_v20 = vld [vmem:[#allocation2] sm:$0xe] }
  0x20   : > { %272 = vst [vmem:[#allocation2 + $0x14] sm:$0x1] %v271_v17  ;;  %v857_v21 = vshll.u32 %v818_v19, 16  ;;  %v4043_v22 = vrot.slane %v1221_v20, 9  ;;  %v1290_v23 = vrot.slane %v787_v18, 5  ;;  %v1293_v24 = vrot.slane %v818_v19, 5  ;;  %vm4674_vm13 = vmor %vm834_vm8, %vm835_vm10 }
  0x21   : > { %v786_v25 = vld [vmem:[#allocation2] sm:$0xf]  ;;  %v847_v28 = vshll.u32 %v787_v18, 16  ;;  %v851_v29 = vshrl.u32 %v787_v18, 16  ;;  %v335_v34 = vld [vmem:[%s4654_s27 + $0x44] sm:$0xf]  ;;  %vm4683_vm14 = vmor %vm218_vm2, %vm350_vm11 }
  0x22   : > { %v838_v26 = vshrl.u32 %v786_v25, 16  ;;  %v841_v27 = vshll.u32 %v786_v25, 16  ;;  %v334_v30 = vld [vmem:[%s4654_s27 + $0x40] sm:$0xf]  ;;  %v1291_v31 = vsel %vm4647_vm9, %v4043_v22, %v1290_v23  ;;  %v1292_v32 = vrot.slane %v1290_v23, 4  ;;  %s4540_s3 = smov 20  }
  0x23   : > { %v859_v33 = vrot.slane %v857_v21, 5  ;;  %v489_v35 = vshrl.u32 %v334_v30, 16  ;;  %v849_v38 = vrot.slane %v847_v28, 5  ;;  %v853_v39 = vrot.slane %v851_v29, 4  ;;  %v318_v44 = vld [vmem:[%s4654_s27] sm:$0xf] }
  0x24   : > { %v840_v36 = vrot.slane %v838_v26, 4  ;;  %v843_v37 = vrot.slane %v841_v27, 5  ;;  %v1294_v40 = vsel %vm4647_vm9, %v1292_v32, %v1293_v24  ;;  %v492_v42 = vshll.u32 %v334_v30, 16  ;;  %v730_v50 = vld [vmem:[#allocation2 + $0x6c] sm:$0xf]  ;;  %s4541_s4 = smov 16  }
  0x25   : > { %v491_v41 = vrot.slane %v489_v35, 7  ;;  %v497_v43 = vshrl.u32 %v335_v34, 16  ;;  %v4123_v46 = vcombine.low %v1291_v31, %v1294_v40  ;;  %v854_v48 = vor.u32 %v853_v39, %v849_v38  ;;  %v319_v51 = vld [vmem:[%s4654_s27 + $0x4] sm:$0xf]  ;;  %v674_v4 = vld [vmem:[#allocation2 + $0xc] sm:$0xf] }
  0x26   : > { %v844_v47 = vor.u32 %v843_v37, %v840_v36  ;;  %v500_v49 = vshll.u32 %v335_v34, 16  ;;  %v353_v56 = vshrl.u32 %v318_v44, 16  ;;  %v356_v60 = vshll.u32 %v318_v44, 16  ;;  %v336_v5 = vld [vmem:[%s4654_s27 + $0x48] sm:$0xf]  ;;  %s4542_s5 = smov 24  }
  0x27   : > { %v494_v53 = vor.u32 %v492_v42, %v491_v41  ;;  %v495_v54 = vrot.slane %v491_v41, 4  ;;  %v4678_v55 = vrot.slane %v497_v43, 7  ;;  %2810 = vrot.lane.b32.xlu0 %v4123_v46, %s4537_s28  ;;  %v855_v58 = vrot.slane %v854_v48, 4  ;;  %v337_v10 = vld [vmem:[%s4654_s27 + $0x4c] sm:$0xf]  ;;  %s4543_s6 = smov 28  }
  0x28   : > { %v845_v57 = vrot.slane %v844_v47, 4  ;;  %v361_v61 = vshrl.u32 %v319_v51, 16  ;;  %v355_v2 = vrot.slane %v353_v56, 7  ;;  %v364_v9 = vshll.u32 %v319_v51, 16  ;;  %v320_v11 = vld [vmem:[%s4654_s27 + $0x8] sm:$0xf] }
  0x29   : > { %v502_v62 = vor.u32 %v500_v49, %v4678_v55  ;;  %v504_v63 = vrot.slane %v4678_v55, 4  ;;  %v731_v0 = vsel %vm4667_vm12, %v494_v53, %v730_v50  ;;  %v860_v7 = vsel %vm4674_vm13, %v855_v58, %v859_v33  ;;  %v321_v17 = vld [vmem:[%s4654_s27 + $0xc] sm:$0xf]  ;;  %v332_v22 = vld [vmem:[%s4654_s27 + $0x38] sm:$0xf]  ;;  %s4544_s7 = smov 32  }
  0x2a   : > { %v850_v6 = vsel %vm4674_vm13, %v845_v57, %v849_v38  ;;  %732 = vst [vmem:[#allocation2 + $0x6c] sm:$0xf] %v731_v0  ;;  %v4696_v8 = vrot.slane %v361_v61, 7  ;;  %v358_v14 = vor.u32 %v356_v60, %v355_v2  ;;  %v359_v15 = vrot.slane %v355_v2, 4  ;;  %v737_v32 = vld [vmem:[#allocation2 + $0x78] sm:$0xf] }
  0x2b   : > { %v4107_v12 = vcombine.low %v850_v6, %v860_v7  ;;  %v503_v13 = vsel %vm4683_vm14, %v495_v54, %v502_v62  ;;  %v506_v20 = vshrl.u32 %v336_v5, 16  ;;  %v509_v21 = vshll.u32 %v336_v5, 16  ;;  %v681_v39 = vld [vmem:[#allocation2 + $0x18] sm:$0xf]  ;;  %v333_v51 = vld [vmem:[%s4654_s27 + $0x3c] sm:$0xf] }
  0x2c   : > { %733 = vst.msk [vmem:[#allocation2 + $0x70] sm:$0xf] %vm207_vm0, %v503_v13  ;;  %v366_v18 = vor.u32 %v364_v9, %v4696_v8  ;;  %v368_v19 = vrot.slane %v4696_v8, 4  ;;  %v675_v23 = vsel %vm4667_vm12, %v358_v14, %v674_v4  ;;  %v514_v24 = vshrl.u32 %v337_v10, 16  ;;  %v723_v60 = vld [vmem:[#allocation2 + $0x60] sm:$0xf] }
  0x2d   : > { %2730 = vrot.lane.b32.xlu0 %v4107_v12, %s4538_s29  ;;  %v517_v25 = vshll.u32 %v337_v10, 16  ;;  %v370_v26 = vshrl.u32 %v320_v11, 16  ;;  %676 = vst [vmem:[#allocation2 + $0xc] sm:$0xf] %v675_v23  ;;  %v508_v28 = vrot.slane %v506_v20, 7  ;;  %v373_v29 = vshll.u32 %v320_v11, 16 }
  0x2e   : > { %v367_v27 = vsel %vm4683_vm14, %v359_v15, %v366_v18  ;;  %v378_v30 = vshrl.u32 %v321_v17, 16  ;;  %v4713_v31 = vrot.slane %v514_v24, 7  ;;  %v381_v34 = vshll.u32 %v321_v17, 16  ;;  %v678_v4 = vld [vmem:[#allocation2 + $0x14] sm:$0x1]  ;;  %s183_s24 = sand.u32 1, %s4518_s10  }
  0x2f   : > { %677 = vst.msk [vmem:[#allocation2 + $0x10] sm:$0xf] %vm207_vm0, %v367_v27  ;;  %v372_v33 = vrot.slane %v370_v26, 7  ;;  %v472_v35 = vshrl.u32 %v332_v22, 16  ;;  %v511_v36 = vor.u32 %v509_v21, %v508_v28  ;;  %v512_v37 = vrot.slane %v508_v28, 4  ;;  %s4040_s25 = sshll.u32 %s183_s24, 8 }
  0x30   : > { %v4715_v38 = vrot.slane %v378_v30, 7  ;;  %v475_v40 = vshll.u32 %v332_v22, 16  ;;  %v519_v42 = vor.u32 %v517_v25, %v4713_v31  ;;  %v521_v43 = vrot.slane %v4713_v31, 4  ;;  %v294_v12 = vld [vmem:[#allocation2 + $0x74] sm:$0x1]  ;;  %s6688_s26 = scalar_lea.vmem [#allocation3], %s4040_s25 }
  0x31   : > { %v1417_v41 = vld [vmem:[#allocation2 + $0x6c] sm:$0xf]  ;;  %v375_v44 = vor.u32 %v373_v29, %v372_v33  ;;  %v376_v46 = vrot.slane %v372_v33, 4  ;;  %v738_v49 = vsel %vm4667_vm12, %v511_v36, %v737_v32  ;;  %v4730_v58 = vrot.slane %v472_v35, 7  ;;  %v727_v32 = vld [vmem:[#allocation2 + $0x68] sm:$0x1] }
  0x32   : > { %v1642_v47 = vshrl.u32 %v1417_v41, 16  ;;  %v1645_v48 = vshll.u32 %v1417_v41, 16  ;;  %v383_v50 = vor.u32 %v381_v34, %v4715_v38  ;;  %v520_v54 = vsel %vm4683_vm14, %v512_v37, %v519_v42  ;;  %739 = vst [vmem:[#allocation2 + $0x78] sm:$0xf] %v738_v49  ;;  %v1230_v25 = vld [vmem:[#allocation2 + $0x6c] sm:$0xe] }
  0x33   : > { %v4723_v53 = vld [vmem:[#allocation2 + $0x70] sm:$0xf]  ;;  %v385_v56 = vrot.slane %v4715_v38, 4  ;;  %v682_v57 = vsel %vm4667_vm12, %v375_v44, %v681_v39  ;;  %740 = vst.msk [vmem:[#allocation2 + $0x7c] sm:$0xf] %vm207_vm0, %v520_v54  ;;  %v477_v9 = vor.u32 %v475_v40, %v4730_v58  ;;  %v478_v10 = vrot.slane %v4730_v58, 4 }
  0x34   : > { %v1651_v61 = vshll.u32 %v4723_v53, 16  ;;  %v1655_v62 = vshrl.u32 %v4723_v53, 16  ;;  %v4147_v0 = vcombine.low %v1417_v41, %v4723_v53  ;;  %v1644_v2 = vrot.slane %v1642_v47, 4  ;;  %683 = vst [vmem:[#allocation2 + $0x18] sm:$0xf] %v682_v57 }
  0x35   : > { %v1647_v5 = vrot.slane %v1645_v48, 5  ;;  %v1401_v6 = vld [vmem:[#allocation2 + $0xc] sm:$0xf]  ;;  %v384_v7 = vsel %vm4683_vm14, %v376_v46, %v383_v50  ;;  %v480_v18 = vshrl.u32 %v333_v51, 16  ;;  %v483_v23 = vshll.u32 %v333_v51, 16 }
  0x36   : > { %v1222_v11 = vld [vmem:[#allocation2 + $0xc] sm:$0xe]  ;;  %v4740_v13 = vrot.slane %v1655_v62, 4  ;;  %2922 = vrot.lane.b32.xlu1 %v4147_v0, %s4539_s30  ;;  %v4743_v14 = vld [vmem:[#allocation2 + $0x10] sm:$0xf]  ;;  %v1450_v15 = vshrl.u32 %v1401_v6, 16  ;;  %v724_v29 = vsel %vm4667_vm12, %v477_v9, %v723_v60  ;;  %v679_v33 = vsel %vm4620_vm3, %v368_v19, %v678_v4 }
  0x37   : > { %v1453_v17 = vshll.u32 %v1401_v6, 16  ;;  %684 = vst.msk [vmem:[#allocation2 + $0x1c] sm:$0xf] %vm207_vm0, %v384_v7  ;;  %v1648_v20 = vor.u32 %v1647_v5, %v1644_v2  ;;  %v1463_v21 = vshrl.u32 %v4743_v14, 16  ;;  %v4139_v22 = vcombine.low %v1401_v6, %v4743_v14  ;;  %v4748_v24 = vld [vmem:[#allocation2 + $0x10] sm:$0xf] }
  0x38   : > { %v4750_v26 = vrot.slane %v1450_v15, 4  ;;  %v482_v28 = vrot.slane %v480_v18, 7  ;;  %725 = vst [vmem:[#allocation2 + $0x60] sm:$0xf] %v724_v29  ;;  %v4044_v34 = vrot.slane %v1222_v11, 9  ;;  %v1297_v35 = vrot.slane %v4748_v24, 5 }
  0x39   : > { %v4752_v27 = vrot.slane %v1453_v17, 5  ;;  %v4756_v30 = vrot.slane %v1648_v20, 4  ;;  %2906 = vrot.lane.b32.xlu0 %v4139_v22, %s4539_s30  ;;  %v4764_v36 = vld [vmem:[#allocation2 + $0x78] sm:$0xf]  ;;  %680 = vst [vmem:[#allocation2 + $0x14] sm:$0x1] %v679_v33 }
  0x3a   : > { %v485_v37 = vor.u32 %v483_v23, %v482_v28  ;;  %v487_v39 = vrot.slane %v482_v28, 4  ;;  %v295_v40 = vsel %vm4628_vm5, 0, %v294_v12  ;;  %v4052_v41 = vrot.slane %v1230_v25, 9  ;;  %v4768_v42 = vld [vmem:[#allocation2 + $0x7c] sm:$0xf] }
  0x3b   : > { %v1666_v44 = vshrl.u32 %v4764_v36, 16  ;;  %v1669_v8 = vshll.u32 %v4764_v36, 16  ;;  %v1403_v46 = vld [vmem:[#allocation2 + $0x18] sm:$0xf]  ;;  %296 = vst [vmem:[#allocation2 + $0x74] sm:$0x1] %v295_v40  ;;  %v4148_v19 = vcombine.low %v4764_v36, %v4768_v42  ;;  %v1298_v49 = vsel %vm4647_vm9, %v4044_v34, %v1297_v35 }
  0x3c   : > { %v1474_v47 = vshrl.u32 %v1403_v46, 16  ;;  %v1477_v48 = vshll.u32 %v1403_v46, 16  ;;  %v4776_v50 = vld [vmem:[#allocation2 + $0x70] sm:$0xf]  ;;  %v1833_v51 = vld [vmem:[#allocation2 + $0xc] sm:$0xe]  ;;  %v486_v60 = vsel %vm4683_vm14, %v478_v10, %v485_v37  ;;  %v728_v62 = vsel %vm4620_vm3, %v487_v39, %v727_v32 }
  0x3d   : > { %v4778_v54 = vrot.slane %v1666_v44, 4  ;;  %v1679_v57 = vshrl.u32 %v4768_v42, 16  ;;  %v1841_v0 = vld [vmem:[#allocation2 + $0x6c] sm:$0xe]  ;;  %2924 = vrot.lane.b32.xlu1 %v4148_v19, %s4539_s30  ;;  %726 = vst.msk [vmem:[#allocation2 + $0x64] sm:$0xf] %vm207_vm0, %v486_v60  ;;  %v1456_v20 = vor.u32 %v4752_v27, %v4750_v26 }
  0x3e   : > { %v4781_v58 = vld [vmem:[#allocation2 + $0x1c] sm:$0xf]  ;;  %v4788_v2 = vrot.slane %v1474_v47, 4  ;;  %v4790_v4 = vrot.slane %v1477_v48, 5  ;;  %729 = vst [vmem:[#allocation2 + $0x68] sm:$0x1] %v728_v62 }
  0x3f   : > { %v1487_v5 = vshrl.u32 %v4781_v58, 16  ;;  %v4140_v6 = vcombine.low %v1403_v46, %v4781_v58  ;;  %v1299_v7 = vrot.slane %v1297_v35, 4  ;;  %v1353_v9 = vrot.slane %v4776_v50, 5  ;;  %v1229_v12 = vld [vmem:[#allocation2 + $0x60] sm:$0xe] }
  0x40   : > { %v4059_v10 = vrot.slane %v1833_v51, 9  ;;  %v1899_v11 = vrot.slane %v4743_v14, 5  ;;  %v4067_v15 = vrot.slane %v1841_v0, 9  ;;  %v1955_v17 = vrot.slane %v4723_v53, 5  ;;  %v802_v18 = vld [vmem:[#allocation2 + $0x60] sm:$0xf] }
  0x41   : > { %2908 = vrot.lane.b32.xlu0 %v4140_v6, %s4539_s30  ;;  %v1480_v22 = vor.u32 %v4790_v4, %v4788_v2  ;;  %v4051_v23 = vrot.slane %v1229_v12, 9  ;;  %v4803_v25 = vld [vmem:[#allocation2 + $0x14] sm:$0x1]  ;;  %v4807_v28 = vsel %vm4647_vm9, %v4052_v41, %v1353_v9  ;;  %v4809_v29 = vrot.slane %v1353_v9, 4  ;;  %v4878_v4 = vld [vmem:[#allocation2 + $0x1c] sm:$0xf] }
  0x42   : > { %v1433_v32 = vld [vmem:[#allocation2 + $0x14] sm:$0x1]  ;;  %v1900_v33 = vsel %vm4647_vm9, %v4059_v10, %v1899_v11  ;;  %v1300_v34 = vrot.slane %v4803_v25, 5  ;;  %v1901_v26 = vrot.slane %v1899_v11, 4  ;;  %v4816_v37 = vsel %vm4647_vm9, %v4067_v15, %v1955_v17  ;;  %v1842_v38 = vld [vmem:[#allocation2 + $0x78] sm:$0xe] }
  0x43   : > { %v734_v35 = vld [vmem:[#allocation2 + $0x74] sm:$0x1]  ;;  %v1902_v27 = vrot.slane %v1433_v32, 5  ;;  %v1957_v40 = vrot.slane %v1955_v17, 4  ;;  %v1030_v41 = vshrl.u32 %v802_v18, 16  ;;  %v1033_v44 = vshll.u32 %v802_v18, 16 }
  0x44   : > { %v735_v39 = vsel %vm4620_vm3, %v504_v63, %v734_v35  ;;  %v1301_v46 = vsel %vm4647_vm9, %v1299_v7, %v1300_v34  ;;  %v1457_v47 = vrot.slane %v1456_v20, 4  ;;  %v1459_v48 = vshll.u32 %v4743_v14, 16  ;;  %v803_v51 = vld [vmem:[#allocation2 + $0x64] sm:$0xf]  ;;  %v788_v18 = vld [vmem:[#allocation2 + $0xc] sm:$0xf] }
  0x45   : > { %736 = vst [vmem:[#allocation2 + $0x74] sm:$0x1] %v735_v39  ;;  %v1903_v19 = vsel %vm4647_vm9, %v1901_v26, %v1902_v27  ;;  %v826_v60 = vld [vmem:[#allocation2 + $0x68] sm:$0x1]  ;;  %v4124_v62 = vcombine.low %v1298_v49, %v1301_v46  ;;  %v1032_v0 = vrot.slane %v1030_v41, 4  ;;  %v1035_v6 = vrot.slane %v1033_v44, 5 }
  0x46   : > { %v4171_v55 = vcombine.low %v1900_v33, %v1903_v19  ;;  %v1346_v63 = vrot.slane %v803_v51, 5  ;;  %v1349_v9 = vrot.slane %v826_v60, 5  ;;  %v1039_v10 = vshll.u32 %v803_v51, 16 }
  0x47   : > { %v1043_v11 = vshrl.u32 %v803_v51, 16  ;;  %2812 = vrot.lane.b32.xlu0 %v4124_v62, %s4537_s28  ;;  %v1036_v7 = vor.u32 %v1035_v6, %v1032_v0  ;;  %v1049_v12 = vshll.u32 %v826_v60, 16  ;;  %v1461_v15 = vrot.slane %v1459_v48, 5 }
  0x48   : > { %v1465_v17 = vrot.slane %v1463_v21, 4  ;;  %v1347_v20 = vsel %vm4647_vm9, %v4051_v23, %v1346_v63  ;;  %v1348_v49 = vrot.slane %v1346_v63, 4  ;;  %v1041_v33 = vrot.slane %v1039_v10, 5 }
  0x49   : > { %v1045_v34 = vrot.slane %v1043_v11, 4  ;;  %v1037_v35 = vrot.slane %v1036_v7, 4  ;;  %v1051_v26 = vrot.slane %v1049_v12, 5  ;;  %v1462_v27 = vsel %vm4674_vm13, %v1457_v47, %v1461_v15 }
  0x4a   : > { %v1466_v39 = vor.u32 %v1465_v17, %v1461_v15  ;;  %v1350_v41 = vsel %vm4647_vm9, %v1348_v49, %v1349_v9  ;;  %v1469_v46 = vshll.u32 %v1433_v32, 16  ;;  %v862_v14 = vshrl.u32 %v788_v18, 16  ;;  %v273_v15 = vld [vmem:[#allocation2 + $0x20] sm:$0x1]  ;;  %v804_v49 = vld [vmem:[#allocation2 + $0x6c] sm:$0xf] }
  0x4b   : > { %v1046_v44 = vor.u32 %v1045_v34, %v1041_v33  ;;  %v4131_v21 = vcombine.low %v1347_v20, %v1350_v41  ;;  %3066 = vrot.lane.b32.xlu0 %v4171_v55, %s4540_s3  ;;  %v1042_v48 = vsel %vm4674_vm13, %v1037_v35, %v1041_v33  ;;  %v865_v47 = vshll.u32 %v788_v18, 16 }
  0x4c   : > { %v4836_v19 = vld [vmem:[#allocation2 + $0x74] sm:$0x1]  ;;  %v1467_v51 = vrot.slane %v1466_v39, 4  ;;  %v1471_v32 = vrot.slane %v1469_v46, 5  ;;  %v864_v6 = vrot.slane %v862_v14, 4  ;;  %v871_v9 = vshll.u32 %v4748_v24, 16 }
  0x4d   : > { %v4839_v23 = vld [vmem:[#allocation2 + $0x74] sm:$0x1]  ;;  %v1356_v60 = vrot.slane %v4836_v19, 5  ;;  %v1047_v0 = vrot.slane %v1046_v44, 4  ;;  %2826 = vrot.lane.b32.xlu1 %v4131_v21, %s4537_s28  ;;  %v867_v63 = vrot.slane %v865_v47, 5  ;;  %v875_v55 = vshrl.u32 %v4748_v24, 16 }
  0x4e   : > { %v1958_v62 = vrot.slane %v4839_v23, 5  ;;  %v1472_v12 = vsel %vm4674_vm13, %v1467_v51, %v1471_v32  ;;  %v873_v34 = vrot.slane %v871_v9, 5  ;;  %v881_v35 = vshll.u32 %v4803_v25, 16  ;;  %v4872_v44 = vld [vmem:[#allocation2 + $0x18] sm:$0xf] }
  0x4f   : > { %v1357_v10 = vsel %vm4647_vm9, %v4809_v29, %v1356_v60  ;;  %v1052_v7 = vsel %vm4674_vm13, %v1047_v0, %v1051_v26  ;;  %v4155_v24 = vcombine.low %v1462_v27, %v1472_v12  ;;  %v868_v33 = vor.u32 %v867_v63, %v864_v6  ;;  %v4883_v47 = vld [vmem:[#allocation2 + $0x18] sm:$0xe] }
  0x50   : > { %v1959_v11 = vsel %vm4647_vm9, %v1957_v40, %v1958_v62  ;;  %v4132_v17 = vcombine.low %v4807_v28, %v1357_v10  ;;  %v4115_v20 = vcombine.low %v1042_v48, %v1052_v7  ;;  %v877_v29 = vrot.slane %v875_v55, 4 }
  0x51   : > { %v4179_v18 = vcombine.low %v4816_v37, %v1959_v11  ;;  %v274_v40 = vsel %vm4628_vm5, 0, %v273_v15  ;;  %v4867_v28 = vrot.slane %v1480_v22, 4  ;;  %v1483_v37 = vshll.u32 %v4781_v58, 16  ;;  %v297_v15 = vld [vmem:[#allocation2 + $0x80] sm:$0x1] }
  0x52   : > { %2828 = vrot.lane.b32.xlu1 %v4132_v17, %s4537_s28  ;;  %2746 = vrot.lane.b32.xlu0 %v4115_v20, %s4538_s29  ;;  %v1489_v26 = vrot.slane %v1487_v5, 4  ;;  %v869_v27 = vrot.slane %v868_v33, 4  ;;  %v878_v39 = vor.u32 %v877_v29, %v873_v34  ;;  %v883_v25 = vrot.slane %v881_v35, 5  ;;  %275 = vst [vmem:[#allocation2 + $0x20] sm:$0x1] %v274_v40 }
  0x53   : > { %v1054_v41 = vshrl.u32 %v804_v49, 16  ;;  %v4874_v46 = vrot.slane %v1483_v37, 5  ;;  %v1057_v14 = vshll.u32 %v804_v49, 16  ;;  %v1063_v21 = vshll.u32 %v4776_v50, 16  ;;  %v226_v33 = vld [vmem:[#allocation2 + $0x24] sm:$0x1] }
  0x54   : > { %v1067_v2 = vshrl.u32 %v4776_v50, 16  ;;  %v874_v22 = vsel %vm4674_vm13, %v869_v27, %v873_v34  ;;  %v879_v5 = vrot.slane %v878_v39, 4  ;;  %v1073_v51 = vshll.u32 %v4836_v19, 16  ;;  %v322_v29 = vld [vmem:[%s4654_s27 + $0x10] sm:$0xf] }
  0x55   : > { %v1056_v48 = vrot.slane %v1054_v41, 4  ;;  %v1671_v60 = vrot.slane %v1669_v8, 5  ;;  %v1490_v50 = vor.u32 %v1489_v26, %v4874_v46  ;;  %v1059_v62 = vrot.slane %v1057_v14, 5  ;;  %v323_v35 = vld [vmem:[%s4654_s27 + $0x14] sm:$0xf] }
  0x56   : > { %3082 = vrot.lane.b32.xlu1 %v4179_v18, %s4540_s3  ;;  %2986 = vrot.lane.b32.xlu0 %v4155_v24, %s4541_s4  ;;  %v1065_v0 = vrot.slane %v1063_v21, 5  ;;  %v884_v32 = vsel %vm4674_vm13, %v879_v5, %v883_v25  ;;  %v1486_v19 = vsel %vm4674_vm13, %v4867_v28, %v4874_v46  ;;  %v1069_v6 = vrot.slane %v1067_v2, 4 }
  0x57   : > { %v4187_v36 = vcombine.low %v4872_v44, %v4878_v4  ;;  %v4108_v8 = vcombine.low %v874_v22, %v884_v32  ;;  %v1060_v63 = vor.u32 %v1059_v62, %v1056_v48  ;;  %v1075_v9 = vrot.slane %v1073_v51, 5 }
  0x58   : > { %v4060_v55 = vrot.slane %v4883_v47, 9  ;;  %v1070_v10 = vor.u32 %v1069_v6, %v1065_v0  ;;  %v1653_v11 = vrot.slane %v1651_v61, 5  ;;  %v1661_v7 = vshll.u32 %v4839_v23, 16 }
  0x59   : > { %v2059_v12 = vshrl.u32 %v4872_v44, 16  ;;  %v685_v17 = vld [vmem:[#allocation2 + $0x20] sm:$0x1]  ;;  %v4904_v18 = vrot.slane %v1490_v50, 4  ;;  %v1061_v20 = vrot.slane %v1060_v63, 4  ;;  %v1906_v24 = vrot.slane %v4781_v58, 5 }
  0x5a   : > { %2732 = vrot.lane.b32.xlu1 %v4108_v8, %s4538_s29  ;;  %v2062_v49 = vshll.u32 %v4872_v44, 16  ;;  %v686_v53 = vsel %vm4620_vm3, %v385_v56, %v685_v17  ;;  %v1071_v61 = vrot.slane %v1070_v10, 4  ;;  %v1654_v23 = vsel %vm4674_vm13, %v4756_v30, %v1653_v11 }
  0x5b   : > { %v1658_v34 = vor.u32 %v4740_v13, %v1653_v11  ;;  %687 = vst [vmem:[#allocation2 + $0x20] sm:$0x1] %v686_v53  ;;  %v1066_v58 = vsel %vm4674_vm13, %v1061_v20, %v1065_v0  ;;  %v1663_v40 = vrot.slane %v1661_v7, 5  ;;  %v2061_v37 = vrot.slane %v2059_v12, 4  ;;  %v4958_v20 = vld [vmem:[#allocation2 + $0x78] sm:$0xf] }
  0x5c   : > { %v2064_v26 = vrot.slane %v2062_v49, 5  ;;  %v1076_v56 = vsel %vm4674_vm13, %v1071_v61, %v1075_v9  ;;  %v2072_v39 = vshrl.u32 %v4878_v4, 16  ;;  %v298_v30 = vsel %vm4628_vm5, 0, %v297_v15 }
  0x5d   : > { %v1659_v27 = vrot.slane %v1658_v34, 4  ;;  %v4116_v13 = vcombine.low %v1066_v58, %v1076_v56  ;;  %299 = vst [vmem:[#allocation2 + $0x80] sm:$0x1] %v298_v30  ;;  %v1672_v25 = vor.u32 %v1671_v60, %v4778_v54  ;;  %v1675_v41 = vshll.u32 %v4768_v42, 16  ;;  %v4973_v58 = vld [vmem:[#allocation2 + $0x7c] sm:$0xf] }
  0x5e   : > { %v1681_v14 = vrot.slane %v1679_v57, 4  ;;  %v227_v2 = vsel %vm4620_vm3, 0, %v226_v33  ;;  %v387_v22 = vshrl.u32 %v322_v29, 16  ;;  %v390_v5 = vshll.u32 %v322_v29, 16 }
  0x5f   : > { %v1664_v21 = vsel %vm4674_vm13, %v1659_v27, %v1663_v40  ;;  %2748 = vrot.lane.b32.xlu1 %v4116_v13, %s4538_s29  ;;  %v4934_v51 = vrot.slane %v1672_v25, 4  ;;  %v4936_v47 = vrot.slane %v1675_v41, 5  ;;  %228 = vst [vmem:[#allocation2 + $0x24] sm:$0x1] %v227_v2  ;;  %v395_v54 = vshrl.u32 %v323_v35, 16 }
  0x60   : > { %v4163_v48 = vcombine.low %v1654_v23, %v1664_v21  ;;  %v389_v60 = vrot.slane %v387_v22, 7  ;;  %v398_v50 = vshll.u32 %v323_v35, 16  ;;  %v4068_v57 = vrot.slane %v1842_v38, 9  ;;  %v276_v40 = vld [vmem:[#allocation2 + $0x2c] sm:$0x1] }
  0x61   : > { %v1962_v62 = vrot.slane %v4768_v42, 5  ;;  %v4941_v0 = vsel %vm4647_vm9, %v4060_v55, %v1906_v24  ;;  %v1908_v32 = vrot.slane %v1906_v24, 4  ;;  %v1682_v6 = vor.u32 %v1681_v14, %v4936_v47  ;;  %v250_v13 = vld [vmem:[#allocation2 + $0x84] sm:$0x1]  ;;  %v338_v25 = vld [vmem:[%s4654_s27 + $0x50] sm:$0xf] }
  0x62   : > { %v4944_v8 = vrot.slane %v395_v54, 7  ;;  %v1434_v63 = vld [vmem:[#allocation2 + $0x20] sm:$0x1]  ;;  %v1678_v9 = vsel %vm4674_vm13, %v4934_v51, %v4936_v47  ;;  %v392_v10 = vor.u32 %v390_v5, %v389_v60  ;;  %v393_v11 = vrot.slane %v389_v60, 4  ;;  %v339_v2 = vld [vmem:[%s4654_s27 + $0x54] sm:$0xf] }
  0x63   : > { %v2065_v7 = vor.u32 %v2064_v26, %v2061_v37  ;;  %v1493_v12 = vshll.u32 %v1434_v63, 16  ;;  %v1909_v42 = vrot.slane %v1434_v63, 5  ;;  %3002 = vrot.lane.b32.xlu1 %v4163_v48, %s4541_s4  ;;  %v4954_v15 = vsel %vm4647_vm9, %v4068_v57, %v1962_v62  ;;  %v4956_v17 = vld [vmem:[#allocation2 + $0x20] sm:$0x1]  ;;  %v2442_v22 = vld [vmem:[#allocation2 + $0x18] sm:$0xe] }
  0x64   : > { %v400_v55 = vor.u32 %v398_v50, %v4944_v8  ;;  %v741_v24 = vld [vmem:[#allocation2 + $0x80] sm:$0x1]  ;;  %v4960_v49 = vrot.slane %v1682_v6, 4  ;;  %v4962_v33 = vrot.slane %v1962_v62, 4  ;;  %v2068_v53 = vshll.u32 %v4878_v4, 16 }
  0x65   : > { %v2074_v61 = vrot.slane %v2072_v39, 4  ;;  %v1495_v23 = vrot.slane %v1493_v12, 5  ;;  %v1910_v34 = vsel %vm4647_vm9, %v1908_v32, %v1909_v42  ;;  %v742_v29 = vsel %vm4620_vm3, %v521_v43, %v741_v24 }
  0x66   : > { %v401_v35 = vsel %vm4683_vm14, %v393_v11, %v400_v55  ;;  %743 = vst [vmem:[#allocation2 + $0x80] sm:$0x1] %v742_v29  ;;  %v688_v37 = vld [vmem:[#allocation2 + $0x24] sm:$0xf]  ;;  %v2066_v26 = vrot.slane %v2065_v7, 4  ;;  %v2070_v38 = vrot.slane %v2068_v53, 5  ;;  %v4172_v14 = vcombine.low %v4941_v0, %v1910_v34 }
  0x67   : > { %691 = vst.msk [vmem:[#allocation2 + $0x28] sm:$0xf] %vm207_vm0, %v401_v35  ;;  %v2078_v56 = vshll.u32 %v4956_v17, 16  ;;  %v2251_v31 = vshrl.u32 %v4958_v20, 16  ;;  %v1496_v43 = vsel %vm4674_vm13, %v4904_v18, %v1495_v23  ;;  %v402_v27 = vrot.slane %v4944_v8, 4 }
  0x68   : > { %v689_v39 = vsel %vm4667_vm12, %v392_v10, %v688_v37  ;;  %v2254_v30 = vshll.u32 %v4958_v20, 16  ;;  %v4156_v41 = vcombine.low %v1486_v19, %v1496_v43  ;;  %v2075_v21 = vor.u32 %v2074_v61, %v2070_v38  ;;  %v5060_v8 = vld [vmem:[#allocation2 + $0x20] sm:$0x1] }
  0x69   : > { %690 = vst [vmem:[#allocation2 + $0x24] sm:$0xf] %v689_v39  ;;  %v2080_v18 = vrot.slane %v2078_v56, 5  ;;  %v4993_v5 = vrot.slane %v2251_v31, 4  ;;  %v2264_v54 = vshrl.u32 %v4973_v58, 16  ;;  %v277_v60 = vsel %vm4628_vm5, 0, %v276_v40 }
  0x6a   : > { %v2256_v48 = vrot.slane %v2254_v30, 5  ;;  %2988 = vrot.lane.b32.xlu0 %v4156_v41, %s4541_s4  ;;  %v2071_v28 = vsel %vm4674_vm13, %v2066_v26, %v2070_v38  ;;  %v2076_v46 = vrot.slane %v2075_v21, 4  ;;  %278 = vst [vmem:[#allocation2 + $0x2c] sm:$0x1] %v277_v60  ;;  %v251_v19 = vsel %vm4620_vm3, 0, %v250_v13 }
  0x6b   : > { %v523_v50 = vshrl.u32 %v338_v25, 16  ;;  %252 = vst [vmem:[#allocation2 + $0x84] sm:$0x1] %v251_v19  ;;  %v526_v57 = vshll.u32 %v338_v25, 16  ;;  %v531_v62 = vshrl.u32 %v339_v2, 16  ;;  %v534_v0 = vshll.u32 %v339_v2, 16 }
  0x6c   : > { %v4075_v32 = vrot.slane %v2442_v22, 9  ;;  %v2081_v6 = vsel %vm4674_vm13, %v2076_v46, %v2080_v18  ;;  %v4195_v63 = vcombine.low %v4958_v20, %v4973_v58  ;;  %v2508_v11 = vrot.slane %v4878_v4, 5 }
  0x6d   : > { %v525_v10 = vrot.slane %v523_v50, 7  ;;  %v1442_v7 = vld [vmem:[#allocation2 + $0x80] sm:$0x1]  ;;  %v5010_v42 = vcombine.low %v2071_v28, %v2081_v6  ;;  %v5012_v55 = vrot.slane %v531_v62, 7  ;;  %v2511_v24 = vrot.slane %v4956_v17, 5 }
  0x6e   : > { %v5008_v12 = vld [vmem:[#allocation2 + $0x28] sm:$0xf]  ;;  %v2257_v53 = vor.u32 %v2256_v48, %v4993_v5  ;;  %3068 = vrot.lane.b32.xlu0 %v4172_v14, %s4540_s3  ;;  %v1685_v61 = vshll.u32 %v1442_v7, 16  ;;  %v1965_v34 = vrot.slane %v1442_v7, 5  ;;  %v5022_v38 = vsel %vm4647_vm9, %v4075_v32, %v2508_v11  ;;  %v5040_v5 = vld [vmem:[#allocation2 + $0x80] sm:$0x1] }
  0x6f   : > { %v2096_v23 = vshrl.u32 %v5008_v12, 16  ;;  %v2092_v29 = vshll.u32 %v5008_v12, 16  ;;  %v528_v40 = vor.u32 %v526_v57, %v525_v10  ;;  %v529_v37 = vrot.slane %v525_v10, 4  ;;  %v5054_v48 = vld [vmem:[#allocation2 + $0x1c] sm:$0xf] }
  0x70   : > { %v2012_v35 = vld [vmem:[#allocation2 + $0x24] sm:$0xf]  ;;  %v536_v26 = vor.u32 %v534_v0, %v5012_v55  ;;  %v1687_v17 = vrot.slane %v1685_v61, 5  ;;  %v2510_v43 = vrot.slane %v2508_v11, 4  ;;  %v1966_v2 = vsel %vm4647_vm9, %v4962_v33, %v1965_v34  ;;  %v790_v33 = vld [vmem:[#allocation2 + $0x18] sm:$0xf] }
  0x71   : > { %v2083_v56 = vshrl.u32 %v2012_v35, 16  ;;  %v2086_v31 = vshll.u32 %v2012_v35, 16  ;;  %v4188_v39 = vcombine.low %v2012_v35, %v5008_v12  ;;  %v692_v30 = vld [vmem:[#allocation2 + $0x2c] sm:$0x1]  ;;  %v5025_v13 = vrot.slane %v2092_v29, 5 }
  0x72   : > { %v2098_v25 = vrot.slane %v2096_v23, 4  ;;  %v537_v41 = vsel %vm4683_vm14, %v529_v37, %v536_v26  ;;  %3162 = vrot.lane.b32.xlu0 %v4187_v36, %s4542_s5  ;;  %v1688_v14 = vsel %vm4674_vm13, %v4960_v49, %v1687_v17  ;;  %v744_v22 = vld [vmem:[#allocation2 + $0x84] sm:$0xf]  ;;  %v693_v4 = vsel %vm4620_vm3, %v402_v27, %v692_v30  ;;  %v300_v11 = vld [vmem:[#allocation2 + $0x8c] sm:$0x1] }
  0x73   : > { %v2085_v21 = vrot.slane %v2083_v56, 4  ;;  %v2088_v18 = vrot.slane %v2086_v31, 5  ;;  %747 = vst.msk [vmem:[#allocation2 + $0x88] sm:$0xf] %vm207_vm0, %v537_v41  ;;  %v4164_v44 = vcombine.low %v1678_v9, %v1688_v14  ;;  %v745_v49 = vsel %vm4667_vm12, %v528_v40, %v744_v22  ;;  %694 = vst [vmem:[#allocation2 + $0x2c] sm:$0x1] %v693_v4 }
  0x74   : > { %v2099_v36 = vor.u32 %v2098_v25, %v5025_v13  ;;  %v538_v28 = vrot.slane %v5012_v55, 4  ;;  %746 = vst [vmem:[#allocation2 + $0x84] sm:$0xf] %v745_v49  ;;  %v5057_v51 = vrot.slane %v2257_v53, 4  ;;  %v2260_v47 = vshll.u32 %v4973_v58, 16 }
  0x75   : > { %v2089_v60 = vor.u32 %v2088_v18, %v2085_v21  ;;  %3004 = vrot.lane.b32.xlu1 %v4164_v44, %s4541_s4  ;;  %v4180_v9 = vcombine.low %v4954_v15, %v1966_v2  ;;  %v5066_v27 = vsel %vm4647_vm9, %v2510_v43, %v2511_v24  ;;  %v2266_v46 = vrot.slane %v2264_v54, 4  ;;  %v2443_v61 = vld [vmem:[#allocation2 + $0x24] sm:$0xe] }
  0x76   : > { %v2270_v19 = vshll.u32 %v5040_v5, 16  ;;  %3164 = vrot.lane.b32.xlu0 %v4188_v39, %s4542_s5  ;;  %v2100_v50 = vrot.slane %v2099_v36, 4  ;;  %v2262_v57 = vrot.slane %v2260_v47, 5  ;;  %v886_v62 = vshrl.u32 %v790_v33, 16  ;;  %v2450_v47 = vld [vmem:[#allocation2 + $0x78] sm:$0xe] }
  0x77   : > { %v889_v0 = vshll.u32 %v790_v33, 16  ;;  %v2090_v32 = vrot.slane %v2089_v60, 4  ;;  %v895_v6 = vshll.u32 %v5054_v48, 16  ;;  %v899_v15 = vshrl.u32 %v5054_v48, 16 }
  0x78   : > { %v905_v10 = vshll.u32 %v5060_v8, 16  ;;  %v2263_v54 = vsel %vm4674_vm13, %v5057_v51, %v2262_v57  ;;  %v2267_v7 = vor.u32 %v2266_v46, %v2262_v57  ;;  %v2272_v24 = vrot.slane %v2270_v19, 5 }
  0x79   : > { %v888_v53 = vrot.slane %v886_v62, 4  ;;  %3084 = vrot.lane.b32.xlu1 %v4180_v9, %s4540_s3  ;;  %v891_v34 = vrot.slane %v889_v0, 5  ;;  %v897_v29 = vrot.slane %v895_v6, 5  ;;  %v901_v35 = vrot.slane %v899_v15, 4  ;;  %v792_v9 = vld [vmem:[#allocation2 + $0x24] sm:$0xf] }
  0x7a   : > { %v5079_v23 = vld [vmem:[#allocation2 + $0x88] sm:$0xf]  ;;  %v907_v40 = vrot.slane %v905_v10, 5  ;;  %3242 = vrot.lane.b32.xlu0 %v5010_v42, %s4543_s6  ;;  %v2268_v26 = vrot.slane %v2267_v7, 4  ;;  %v301_v17 = vsel %vm4628_vm5, 0, %v300_v11  ;;  %v4076_v25 = vrot.slane %v2443_v61, 9 }
  0x7b   : > { %v2288_v37 = vshrl.u32 %v5079_v23, 16  ;;  %v2284_v56 = vshll.u32 %v5079_v23, 16  ;;  %v2043_v31 = vld [vmem:[#allocation2 + $0x2c] sm:$0x1]  ;;  %v2028_v43 = vld [vmem:[#allocation2 + $0x84] sm:$0xf]  ;;  %v892_v39 = vor.u32 %v891_v34, %v888_v53  ;;  %v902_v30 = vor.u32 %v901_v35, %v897_v29 }
  0x7c   : > { %302 = vst [vmem:[#allocation2 + $0x8c] sm:$0x1] %v301_v17  ;;  %v2515_v41 = vrot.slane %v5008_v12, 5  ;;  %v2102_v14 = vshll.u32 %v2043_v31, 16  ;;  %v2275_v21 = vshrl.u32 %v2028_v43, 16  ;;  %v2278_v18 = vshll.u32 %v2028_v43, 16 }
  0x7d   : > { %v4196_v42 = vcombine.low %v2028_v43, %v5079_v23  ;;  %3178 = vrot.lane.b32.xlu1 %v4195_v63, %s4542_s5  ;;  %v2273_v2 = vsel %vm4674_vm13, %v2268_v26, %v2272_v24  ;;  %v893_v22 = vrot.slane %v892_v39, 4  ;;  %v903_v44 = vrot.slane %v902_v30, 4  ;;  %v5126_v53 = vld [vmem:[#allocation2 + $0x2c] sm:$0x1]  ;;  %v806_v34 = vld [vmem:[#allocation2 + $0x78] sm:$0xf] }
  0x7e   : > { %v5095_v4 = vrot.slane %v2284_v56, 5  ;;  %v2095_v12 = vsel %vm4674_vm13, %v2090_v32, %v5025_v13  ;;  %v2104_v36 = vrot.slane %v2102_v14, 5  ;;  %v2277_v49 = vrot.slane %v2275_v21, 4  ;;  %v5114_v32 = vld [vmem:[#allocation2 + $0x28] sm:$0xf] }
  0x7f   : > { %v2280_v33 = vrot.slane %v2278_v18, 5  ;;  %v4219_v60 = vcombine.low %v5022_v38, %v5066_v27  ;;  %v898_v20 = vsel %vm4674_vm13, %v893_v22, %v897_v29  ;;  %v908_v63 = vsel %vm4674_vm13, %v903_v44, %v907_v40  ;;  %v5139_v17 = vld [vmem:[#allocation2 + $0x7c] sm:$0xf]  ;;  %v5146_v43 = vld [vmem:[#allocation2 + $0x80] sm:$0x1] }
  0x80   : > { %v2290_v51 = vrot.slane %v2288_v37, 4  ;;  %v2105_v46 = vsel %vm4674_vm13, %v2100_v50, %v2104_v36  ;;  %v4211_v19 = vcombine.low %v2263_v54, %v2273_v2  ;;  %v2517_v57 = vrot.slane %v2515_v41, 4  ;;  %v1223_v21 = vld [vmem:[#allocation2 + $0x18] sm:$0xe] }
  0x81   : > { %v2281_v13 = vor.u32 %v2280_v33, %v2277_v49  ;;  %v4204_v62 = vcombine.low %v2095_v12, %v2105_v46  ;;  %3180 = vrot.lane.b32.xlu1 %v4196_v42, %s4542_s5  ;;  %v5112_v27 = vsel %vm4647_vm9, %v4076_v25, %v2515_v41  ;;  %v2518_v0 = vrot.slane %v2043_v31, 5 }
  0x82   : > { %v2291_v38 = vor.u32 %v2290_v51, %v5095_v4  ;;  %v4109_v6 = vcombine.low %v898_v20, %v908_v63  ;;  %v4083_v50 = vrot.slane %v2450_v47, 9  ;;  %v910_v11 = vshrl.u32 %v792_v9, 16 }
  0x83   : > { %v748_v15 = vld [vmem:[#allocation2 + $0x8c] sm:$0x1]  ;;  %v5116_v10 = vrot.slane %v2281_v13, 4  ;;  %3244 = vrot.lane.b32.xlu0 %v4204_v62, %s4543_s6  ;;  %v2519_v7 = vsel %vm4647_vm9, %v2517_v57, %v2518_v0  ;;  %v2564_v24 = vrot.slane %v4973_v58, 5  ;;  %v913_v61 = vshll.u32 %v792_v9, 16 }
  0x84   : > { %v749_v54 = vsel %vm4620_vm3, %v538_v28, %v748_v15  ;;  %v5132_v35 = vrot.slane %v2291_v38, 4  ;;  %v4220_v55 = vcombine.low %v5112_v27, %v2519_v7  ;;  %v2567_v28 = vrot.slane %v5040_v5, 5  ;;  %v2451_v13 = vld [vmem:[#allocation2 + $0x84] sm:$0xe] }
  0x85   : > { %750 = vst [vmem:[#allocation2 + $0x8c] sm:$0x1] %v749_v54  ;;  %v2287_v29 = vsel %vm4674_vm13, %v5116_v10, %v5095_v4  ;;  %3258 = vrot.lane.b32.xlu1 %v4211_v19, %s4543_s6  ;;  %v912_v40 = vrot.slane %v910_v11, 4  ;;  %v915_v58 = vrot.slane %v913_v61, 5  ;;  %v919_v37 = vshll.u32 %v5114_v32, 16 }
  0x86   : > { %v923_v26 = vshrl.u32 %v5114_v32, 16  ;;  %v5143_v56 = vsel %vm4647_vm9, %v4083_v50, %v2564_v24  ;;  %v929_v31 = vshll.u32 %v5126_v53, 16  ;;  %v1078_v39 = vshrl.u32 %v806_v34, 16  ;;  %v1224_v0 = vld [vmem:[#allocation2 + $0x24] sm:$0xe] }
  0x87   : > { %v1081_v5 = vshll.u32 %v806_v34, 16  ;;  %3322 = vrot.lane.b32.xlu0 %v4219_v60, %s4544_s7  ;;  %v2566_v30 = vrot.slane %v2564_v24, 4  ;;  %v916_v25 = vor.u32 %v915_v58, %v912_v40  ;;  %v921_v41 = vrot.slane %v919_v37, 5  ;;  %v808_v58 = vld [vmem:[#allocation2 + $0x84] sm:$0xf] }
  0x88   : > { %v925_v14 = vrot.slane %v923_v26, 4  ;;  %v931_v18 = vrot.slane %v929_v31, 5  ;;  %v1080_v42 = vrot.slane %v1078_v39, 4  ;;  %v1087_v22 = vshll.u32 %v5139_v17, 16 }
  0x89   : > { %v1083_v2 = vrot.slane %v1081_v5, 5  ;;  %v917_v44 = vrot.slane %v916_v25, 4  ;;  %v1091_v36 = vshrl.u32 %v5139_v17, 16  ;;  %v1097_v49 = vshll.u32 %v5146_v43, 16 }
  0x8a   : > { %v926_v12 = vor.u32 %v925_v14, %v921_v41  ;;  %v1089_v20 = vrot.slane %v1087_v22, 5  ;;  %v4045_v63 = vrot.slane %v1223_v21, 9  ;;  %v1304_v60 = vrot.slane %v5054_v48, 5  ;;  %v5190_v21 = vld [vmem:[#allocation2 + $0x24] sm:$0xf] }
  0x8b   : > { %v1084_v33 = vor.u32 %v1083_v2, %v1080_v42  ;;  %2734 = vrot.lane.b32.xlu0 %v4109_v6, %s4538_s29  ;;  %v2568_v47 = vsel %vm4647_vm9, %v2566_v30, %v2567_v28  ;;  %v922_v9 = vsel %vm4674_vm13, %v917_v44, %v921_v41  ;;  %v1093_v19 = vrot.slane %v1091_v36, 4 }
  0x8c   : > { %v2051_v51 = vld [vmem:[#allocation2 + $0x8c] sm:$0x1]  ;;  %v927_v46 = vrot.slane %v926_v12, 4  ;;  %v1099_v38 = vrot.slane %v1097_v49, 5  ;;  %v1306_v27 = vrot.slane %v1304_v60, 4  ;;  %v1305_v6 = vsel %vm4647_vm9, %v4045_v63, %v1304_v60 }
  0x8d   : > { %v2294_v57 = vshll.u32 %v2051_v51, 16  ;;  %v1085_v62 = vrot.slane %v1084_v33, 4  ;;  %v1094_v15 = vor.u32 %v1093_v19, %v1089_v20  ;;  %v1307_v50 = vrot.slane %v5060_v8, 5  ;;  %v1231_v49 = vld [vmem:[#allocation2 + $0x78] sm:$0xe] }
  0x8e   : > { %v932_v48 = vsel %vm4674_vm13, %v927_v46, %v931_v18  ;;  %v4084_v7 = vrot.slane %v2451_v13, 9  ;;  %v2571_v24 = vrot.slane %v5079_v23, 5  ;;  %v2574_v28 = vrot.slane %v2051_v51, 5  ;;  %v5173_v23 = vld [vmem:[#allocation2 + $0x88] sm:$0xf] }
  0x8f   : > { %v2296_v11 = vrot.slane %v2294_v57, 5  ;;  %v4110_v54 = vcombine.low %v922_v9, %v932_v48  ;;  %3324 = vrot.lane.b32.xlu0 %v4220_v55, %s4544_s7  ;;  %v1095_v61 = vrot.slane %v1094_v15, 4  ;;  %v1308_v34 = vsel %vm4647_vm9, %v1306_v27, %v1307_v50  ;;  %v229_v60 = vld [vmem:[#allocation2 + $0x30] sm:$0x1]  ;;  %v324_v51 = vld [vmem:[%s4654_s27 + $0x18] sm:$0xf] }
  0x90   : > { %v4046_v40 = vrot.slane %v1224_v0, 9  ;;  %v4227_v8 = vcombine.low %v5143_v56, %v2568_v47  ;;  %v1090_v26 = vsel %vm4674_vm13, %v1085_v62, %v1089_v20  ;;  %v2573_v31 = vrot.slane %v2571_v24, 4  ;;  %v325_v13 = vld [vmem:[%s4654_s27 + $0x1c] sm:$0xf] }
  0x91   : > { %v2297_v37 = vsel %vm4674_vm13, %v5132_v35, %v2296_v11  ;;  %v4125_v39 = vcombine.low %v1305_v6, %v1308_v34  ;;  %v1311_v5 = vrot.slane %v5114_v32, 5  ;;  %v1314_v30 = vrot.slane %v5126_v53, 5  ;;  %v5182_v35 = vld [vmem:[#allocation2 + $0x8c] sm:$0x1] }
  0x92   : > { %v4212_v55 = vcombine.low %v2287_v29, %v2297_v37  ;;  %v1100_v56 = vsel %vm4674_vm13, %v1095_v61, %v1099_v38  ;;  %v5188_v25 = vsel %vm4647_vm9, %v4084_v7, %v2571_v24  ;;  %v1102_v41 = vshrl.u32 %v808_v58, 16  ;;  %v5210_v38 = vld [vmem:[#allocation2 + $0x28] sm:$0xf]  ;;  %v1232_v61 = vld [vmem:[#allocation2 + $0x84] sm:$0xe] }
  0x93   : > { %v1105_v14 = vshll.u32 %v808_v58, 16  ;;  %2736 = vrot.lane.b32.xlu0 %v4110_v54, %s4538_s29  ;;  %v2575_v4 = vsel %vm4647_vm9, %v2573_v31, %v2574_v28  ;;  %v1312_v32 = vsel %vm4647_vm9, %v4046_v40, %v1311_v5  ;;  %v1313_v10 = vrot.slane %v1311_v5, 4 }
  0x94   : > { %3260 = vrot.lane.b32.xlu1 %v4212_v55, %s4543_s6  ;;  %v1111_v53 = vshll.u32 %v5173_v23, 16  ;;  %v1104_v29 = vrot.slane %v1102_v41, 4  ;;  %v1115_v42 = vshrl.u32 %v5173_v23, 16  ;;  %v1121_v2 = vshll.u32 %v5182_v35, 16 }
  0x95   : > { %v1107_v18 = vrot.slane %v1105_v14, 5  ;;  %v1315_v22 = vsel %vm4647_vm9, %v1313_v10, %v1314_v30  ;;  %v1498_v12 = vshrl.u32 %v5190_v21, 16  ;;  %v1501_v36 = vshll.u32 %v5190_v21, 16  ;;  %v5235_v14 = vld [vmem:[#allocation2 + $0x84] sm:$0xf] }
  0x96   : > { %v1113_v44 = vrot.slane %v1111_v53, 5  ;;  %v4117_v33 = vcombine.low %v1090_v26, %v1100_v56  ;;  %v1117_v63 = vrot.slane %v1115_v42, 4  ;;  %v4228_v47 = vcombine.low %v5188_v25, %v2575_v4  ;;  %v5228_v26 = vld [vmem:[#allocation2 + $0x2c] sm:$0x1]  ;;  %v279_v53 = vld [vmem:[#allocation2 + $0x38] sm:$0x1] }
  0x97   : > { %v1108_v20 = vor.u32 %v1107_v18, %v1104_v29  ;;  %2814 = vrot.lane.b32.xlu0 %v4125_v39, %s4537_s28  ;;  %v4126_v9 = vcombine.low %v1312_v32, %v1315_v22  ;;  %v1123_v46 = vrot.slane %v1121_v2, 5  ;;  %v1500_v19 = vrot.slane %v1498_v12, 4  ;;  %v253_v29 = vld [vmem:[#allocation2 + $0x90] sm:$0x1]  ;;  %v340_v18 = vld [vmem:[%s4654_s27 + $0x58] sm:$0xf] }
  0x98   : > { %3338 = vrot.lane.b32.xlu1 %v4227_v8, %s4544_s7  ;;  %v1118_v62 = vor.u32 %v1117_v63, %v1113_v44  ;;  %v4053_v27 = vrot.slane %v1231_v49, 9  ;;  %v1360_v0 = vrot.slane %v5139_v17, 5  ;;  %v1503_v48 = vrot.slane %v1501_v36, 5  ;;  %v5247_v12 = vld [vmem:[#allocation2 + $0x88] sm:$0xf] }
  0x99   : > { %v1109_v57 = vrot.slane %v1108_v20, 4  ;;  %v1363_v15 = vrot.slane %v5146_v43, 5  ;;  %v230_v6 = vsel %vm4620_vm3, 0, %v229_v60  ;;  %v404_v50 = vshrl.u32 %v324_v51, 16  ;;  %v341_v60 = vld [vmem:[%s4654_s27 + $0x5c] sm:$0xf] }
  0x9a   : > { %v1119_v54 = vrot.slane %v1118_v62, 4  ;;  %v1362_v7 = vrot.slane %v1360_v0, 4  ;;  %231 = vst [vmem:[#allocation2 + $0x30] sm:$0x1] %v230_v6  ;;  %v407_v24 = vshll.u32 %v324_v51, 16  ;;  %v1511_v17 = vshrl.u32 %v5210_v38, 16 }
  0x9b   : > { %v1114_v11 = vsel %vm4674_vm13, %v1109_v57, %v1113_v44  ;;  %2816 = vrot.lane.b32.xlu0 %v4126_v9, %s4537_s28  ;;  %v4141_v43 = vcombine.low %v5190_v21, %v5210_v38  ;;  %v406_v34 = vrot.slane %v404_v50, 7  ;;  %v412_v28 = vshrl.u32 %v325_v13, 16  ;;  %v1835_v6 = vld [vmem:[#allocation2 + $0x24] sm:$0xe] }
  0x9c   : > { %2750 = vrot.lane.b32.xlu1 %v4117_v33, %s4538_s29  ;;  %v1124_v40 = vsel %vm4674_vm13, %v1119_v54, %v1123_v46  ;;  %v1361_v58 = vsel %vm4647_vm9, %v4053_v27, %v1360_v0  ;;  %v415_v37 = vshll.u32 %v325_v13, 16  ;;  %v1367_v8 = vrot.slane %v5173_v23, 5 }
  0x9d   : > { %v4118_v31 = vcombine.low %v1114_v11, %v1124_v40  ;;  %v1364_v55 = vsel %vm4647_vm9, %v1362_v7, %v1363_v15  ;;  %v4054_v39 = vrot.slane %v1232_v61, 9  ;;  %v1370_v5 = vrot.slane %v5182_v35, 5 }
  0x9e   : > { %v409_v30 = vor.u32 %v407_v24, %v406_v34  ;;  %v410_v56 = vrot.slane %v406_v34, 4  ;;  %v5233_v25 = vrot.slane %v412_v28, 7  ;;  %v1369_v41 = vrot.slane %v1367_v8, 4 }
  0x9f   : > { %2910 = vrot.lane.b32.xlu0 %v4141_v43, %s4539_s30  ;;  %v1504_v23 = vor.u32 %v1503_v48, %v1500_v19  ;;  %v1507_v21 = vshll.u32 %v5210_v38, 16  ;;  %v1513_v4 = vrot.slane %v1511_v17, 4  ;;  %v1517_v32 = vshll.u32 %v5228_v26, 16  ;;  %v5272_v43 = vld [vmem:[#allocation2 + $0x8c] sm:$0x1] }
  0xa0   : > { %3340 = vrot.lane.b32.xlu1 %v4228_v47, %s4544_s7  ;;  %v4133_v35 = vcombine.low %v1361_v58, %v1364_v55  ;;  %v417_v10 = vor.u32 %v415_v37, %v5233_v25  ;;  %v1368_v2 = vsel %vm4647_vm9, %v4054_v39, %v1367_v8  ;;  %v1371_v22 = vsel %vm4647_vm9, %v1369_v41, %v1370_v5 }
  0xa1   : > { %v695_v42 = vld [vmem:[#allocation2 + $0x30] sm:$0xf]  ;;  %v1509_v44 = vrot.slane %v1507_v21, 5  ;;  %v1690_v36 = vshrl.u32 %v5235_v14, 16  ;;  %v419_v33 = vrot.slane %v5233_v25, 4  ;;  %v1693_v63 = vshll.u32 %v5235_v14, 16 }
  0xa2   : > { %v418_v49 = vsel %vm4683_vm14, %v410_v56, %v417_v10  ;;  %v696_v20 = vsel %vm4667_vm12, %v409_v30, %v695_v42  ;;  %v1505_v51 = vrot.slane %v1504_v23, 4  ;;  %v1519_v9 = vrot.slane %v1517_v32, 5  ;;  %v303_v32 = vld [vmem:[#allocation2 + $0x98] sm:$0x1] }
  0xa3   : > { %697 = vst [vmem:[#allocation2 + $0x30] sm:$0xf] %v696_v20  ;;  %698 = vst.msk [vmem:[#allocation2 + $0x34] sm:$0xf] %vm207_vm0, %v418_v49  ;;  %v1514_v47 = vor.u32 %v1513_v4, %v1509_v44  ;;  %v280_v46 = vsel %vm4628_vm5, 0, %v279_v53  ;;  %v4134_v19 = vcombine.low %v1368_v2, %v1371_v22  ;;  %v1703_v13 = vshrl.u32 %v5247_v12, 16  ;;  %v5291_v2 = vpop.permute.xlu0 %2810 }
  0xa4   : > { %2752 = vrot.lane.b32.xlu1 %v4118_v31, %s4538_s29  ;;  %281 = vst [vmem:[#allocation2 + $0x38] sm:$0x1] %v280_v46  ;;  %v254_v57 = vsel %vm4620_vm3, 0, %v253_v29  ;;  %v540_v62 = vshrl.u32 %v340_v18, 16  ;;  %v543_v0 = vshll.u32 %v340_v18, 16  ;;  %v548_v48 = vshrl.u32 %v341_v60, 16 }
  0xa5   : > { %v1515_v27 = vrot.slane %v1514_v47, 4  ;;  %255 = vst [vmem:[#allocation2 + $0x90] sm:$0x1] %v254_v57  ;;  %v551_v15 = vshll.u32 %v341_v60, 16  ;;  %v1692_v50 = vrot.slane %v1690_v36, 4  ;;  %v1695_v11 = vrot.slane %v1693_v63, 5 }
  0xa6   : > { %v542_v54 = vrot.slane %v540_v62, 7  ;;  %v1913_v7 = vrot.slane %v5210_v38, 5  ;;  %v1510_v24 = vsel %vm4674_vm13, %v1505_v51, %v1509_v44  ;;  %v5270_v17 = vrot.slane %v548_v48, 7 }
  0xa7   : > { %v1520_v61 = vsel %vm4674_vm13, %v1515_v27, %v1519_v9  ;;  %v1699_v34 = vshll.u32 %v5247_v12, 16  ;;  %v4149_v28 = vcombine.low %v5235_v14, %v5247_v12  ;;  %v4061_v58 = vrot.slane %v1835_v6, 9  ;;  %v5312_v6 = vpop.permute.xlu0 %2730 }
  0xa8   : > { %2830 = vrot.lane.b32.xlu1 %v4133_v35, %s4537_s28  ;;  %v546_v40 = vrot.slane %v542_v54, 4  ;;  %v1916_v38 = vrot.slane %v5228_v26, 5  ;;  %v545_v37 = vor.u32 %v543_v0, %v542_v54  ;;  %v553_v8 = vor.u32 %v551_v15, %v5270_v17 }
  0xa9   : > { %v1915_v31 = vrot.slane %v1913_v7, 4  ;;  %v1705_v55 = vrot.slane %v1703_v13, 4  ;;  %v4157_v30 = vcombine.low %v1510_v24, %v1520_v61  ;;  %v1696_v56 = vor.u32 %v1695_v11, %v1692_v50  ;;  %v1843_v24 = vld [vmem:[#allocation2 + $0x84] sm:$0xe] }
  0xaa   : > { %v1407_v39 = vld [vmem:[#allocation2 + $0x30] sm:$0xf]  ;;  %v1408_v5 = vld [vmem:[#allocation2 + $0x34] sm:$0xf]  ;;  %v5279_v25 = vrot.slane %v1699_v34, 5  ;;  %v1709_v41 = vshll.u32 %v5272_v43, 16  ;;  %v554_v53 = vsel %vm4683_vm14, %v546_v40, %v553_v8  ;;  %v5289_v18 = vsel %vm4647_vm9, %v4061_v58, %v1913_v7 }
  0xab   : > { %v1522_v23 = vshrl.u32 %v1407_v39, 16  ;;  %v1525_v21 = vshll.u32 %v1407_v39, 16  ;;  %v1535_v14 = vshrl.u32 %v1408_v5, 16  ;;  %v4142_v4 = vcombine.low %v1407_v39, %v1408_v5  ;;  %v699_v26 = vld [vmem:[#allocation2 + $0x38] sm:$0x1] }
  0xac   : > { %2832 = vrot.lane.b32.xlu1 %v4134_v19, %s4537_s28  ;;  %v700_v35 = vsel %vm4620_vm3, %v419_v33, %v699_v26  ;;  %v1531_v10 = vshll.u32 %v1408_v5, 16  ;;  %v751_v29 = vld [vmem:[#allocation2 + $0x90] sm:$0xf]  ;;  %754 = vst.msk [vmem:[#allocation2 + $0x94] sm:$0xf] %vm207_vm0, %v554_v53  ;;  %v5301_v63 = vsel %vm4647_vm9, %v1915_v31, %v1916_v38  ;;  %v1697_v60 = vrot.slane %v1696_v56, 4 }
  0xad   : > { %v1836_v42 = vld [vmem:[#allocation2 + $0x30] sm:$0xe]  ;;  %v1524_v22 = vrot.slane %v1522_v23, 4  ;;  %v1527_v44 = vrot.slane %v1525_v21, 5  ;;  %2912 = vrot.lane.b32.xlu0 %v4142_v4, %s4539_s30  ;;  %701 = vst [vmem:[#allocation2 + $0x38] sm:$0x1] %v700_v35  ;;  %v752_v49 = vsel %vm4667_vm12, %v545_v37, %v751_v29  ;;  %v1706_v51 = vor.u32 %v1705_v55, %v5279_v25 }
  0xae   : > { %v1537_v36 = vrot.slane %v1535_v14, 4  ;;  %v5297_v33 = vld [vmem:[#allocation2 + $0x30] sm:$0xf]  ;;  %v1533_v20 = vrot.slane %v1531_v10, 5  ;;  %753 = vst [vmem:[#allocation2 + $0x90] sm:$0xf] %v752_v49  ;;  %v4173_v15 = vcombine.low %v5289_v18, %v5301_v63  ;;  %v1702_v11 = vsel %vm4674_vm13, %v1697_v60, %v5279_v25 }
  0xaf   : > { %v1528_v47 = vor.u32 %v1527_v44, %v1524_v22  ;;  %v1711_v9 = vrot.slane %v1709_v41, 5  ;;  %v4062_v46 = vrot.slane %v1836_v42, 9  ;;  %v1920_v19 = vrot.slane %v1408_v5, 5  ;;  %v232_v39 = vld [vmem:[#allocation2 + $0x3c] sm:$0x1]  ;;  %v5347_v22 = vpop.permute.xlu0 %2906 }
  0xb0   : > { %2926 = vrot.lane.b32.xlu1 %v4149_v28, %s4539_s30  ;;  %v1538_v13 = vor.u32 %v1537_v36, %v1533_v20  ;;  %v1707_v57 = vrot.slane %v1706_v51, 4  ;;  %v304_v62 = vsel %vm4628_vm5, 0, %v303_v32  ;;  %v2107_v27 = vshrl.u32 %v5297_v33, 16  ;;  %v326_v41 = vld [vmem:[%s4654_s27 + $0x20] sm:$0xf]  ;;  %v5340_v32 = vpop.permute.xlu1 %2922 }
  0xb1   : > { %2990 = vrot.lane.b32.xlu0 %v4157_v30, %s4541_s4  ;;  %305 = vst [vmem:[#allocation2 + $0x98] sm:$0x1] %v304_v62  ;;  %v1529_v0 = vrot.slane %v1528_v47, 4  ;;  %v555_v48 = vrot.slane %v5270_v17, 4  ;;  %v1922_v54 = vrot.slane %v1920_v19, 4  ;;  %v2110_v7 = vshll.u32 %v5297_v33, 16 }
  0xb2   : > { %v1539_v50 = vrot.slane %v1538_v13, 4  ;;  %v1712_v17 = vsel %vm4674_vm13, %v1707_v57, %v1711_v9  ;;  %v5324_v28 = vsel %vm4647_vm9, %v4062_v46, %v1920_v19  ;;  %v5326_v40 = vrot.slane %v2107_v27, 4  ;;  %v327_v23 = vld [vmem:[%s4654_s27 + $0x24] sm:$0xf]  ;;  %v5338_v26 = vld [vmem:[#allocation2 + $0x34] sm:$0xf] }
  0xb3   : > { %v5318_v34 = vld [vmem:[#allocation2 + $0x94] sm:$0xf]  ;;  %v1969_v58 = vrot.slane %v5247_v12, 5  ;;  %v1534_v5 = vsel %vm4674_vm13, %v1529_v0, %v1533_v20  ;;  %v4165_v14 = vcombine.low %v1702_v11, %v1712_v17  ;;  %v4069_v42 = vrot.slane %v1843_v24, 9 }
  0xb4   : > { %v1436_v61 = vld [vmem:[#allocation2 + $0x38] sm:$0x1]  ;;  %v1727_v8 = vshrl.u32 %v5318_v34, 16  ;;  %v1723_v55 = vshll.u32 %v5318_v34, 16  ;;  %v1972_v20 = vrot.slane %v5272_v43, 5  ;;  %v233_v47 = vsel %vm4620_vm3, 0, %v232_v39  ;;  %v5372_v17 = vpop.permute.xlu1 %2924 }
  0xb5   : > { %v1541_v38 = vshll.u32 %v1436_v61, 16  ;;  %v1423_v37 = vld [vmem:[#allocation2 + $0x90] sm:$0xf]  ;;  %v1923_v31 = vrot.slane %v1436_v61, 5  ;;  %v1971_v49 = vrot.slane %v1969_v58, 4  ;;  %v421_v9 = vshrl.u32 %v326_v41, 16 }
  0xb6   : > { %v1714_v30 = vshrl.u32 %v1423_v37, 16  ;;  %v1717_v56 = vshll.u32 %v1423_v37, 16  ;;  %v4150_v25 = vcombine.low %v1423_v37, %v5318_v34  ;;  %v5336_v12 = vrot.slane %v1723_v55, 5  ;;  %234 = vst [vmem:[#allocation2 + $0x3c] sm:$0x1] %v233_v47  ;;  %6844 = vst [vmem:[#allocation6_spill] sm:$0xff] %v5372_v17 }
  0xb7   : > { %v1543_v21 = vrot.slane %v1541_v38, 5  ;;  %v1729_v4 = vrot.slane %v1727_v8, 4  ;;  %v5345_v53 = vsel %vm4647_vm9, %v1922_v54, %v1923_v31  ;;  %v2120_v19 = vshrl.u32 %v5338_v26, 16  ;;  %v5370_v61 = vld [vmem:[#allocation2 + $0x38] sm:$0x1]  ;;  %v5382_v31 = vpop.permute.xlu0 %2908 }
  0xb8   : > { %v1716_v35 = vrot.slane %v1714_v30, 4  ;;  %v1719_v10 = vrot.slane %v1717_v56, 5  ;;  %2928 = vrot.lane.b32.xlu1 %v4150_v25, %s4539_s30  ;;  %v755_v29 = vld [vmem:[#allocation2 + $0x98] sm:$0x1]  ;;  %v424_v13 = vshll.u32 %v326_v41, 16  ;;  %v429_v57 = vshrl.u32 %v327_v23, 16 }
  0xb9   : > { %v1544_v44 = vsel %vm4674_vm13, %v1539_v50, %v1543_v21  ;;  %v756_v36 = vsel %vm4620_vm3, %v555_v48, %v755_v29  ;;  %v1730_v46 = vor.u32 %v1729_v4, %v5336_v12  ;;  %v2112_v62 = vrot.slane %v2110_v7, 5  ;;  %v1844_v48 = vld [vmem:[#allocation2 + $0x90] sm:$0xe]  ;;  %v282_v41 = vld [vmem:[#allocation2 + $0x44] sm:$0x1] }
  0xba   : > { %v4158_v60 = vcombine.low %v1534_v5, %v1544_v44  ;;  %757 = vst [vmem:[#allocation2 + $0x98] sm:$0x1] %v756_v36  ;;  %v1720_v51 = vor.u32 %v1719_v10, %v1716_v35  ;;  %v4189_v43 = vcombine.low %v5297_v33, %v5338_v26  ;;  %v423_v27 = vrot.slane %v421_v9, 7  ;;  %v5380_v8 = vld [vmem:[#allocation2 + $0x90] sm:$0xf] }
  0xbb   : > { %v432_v0 = vshll.u32 %v327_v23, 16  ;;  %v4174_v50 = vcombine.low %v5324_v28, %v5345_v53  ;;  %v5366_v54 = vsel %vm4647_vm9, %v4069_v42, %v1969_v58  ;;  %v5368_v24 = vrot.slane %v429_v57, 7  ;;  %v256_v23 = vld [vmem:[#allocation2 + $0x9c] sm:$0x1] }
  0xbc   : > { %2992 = vrot.lane.b32.xlu0 %v4158_v60, %s4541_s4  ;;  %3006 = vrot.lane.b32.xlu1 %v4165_v14, %s4541_s4  ;;  %v1721_v11 = vrot.slane %v1720_v51, 4  ;;  %v5376_v7 = vsel %vm4647_vm9, %v1971_v49, %v1972_v20  ;;  %v427_v38 = vrot.slane %v423_v27, 4  ;;  %v1976_v37 = vrot.slane %v5318_v34, 5  ;;  %v343_v49 = vld [vmem:[%s4654_s27 + $0x64] sm:$0xf] }
  0xbd   : > { %v2116_v28 = vshll.u32 %v5338_v26, 16  ;;  %v1731_v58 = vrot.slane %v1730_v46, 4  ;;  %v426_v55 = vor.u32 %v424_v13, %v423_v27  ;;  %v434_v39 = vor.u32 %v432_v0, %v5368_v24  ;;  %v702_v35 = vld [vmem:[#allocation2 + $0x3c] sm:$0xf]  ;;  %v5416_v46 = vpop.permute.xlu0 %2812  ;;  %v5418_v13 = vld [vmem:[#allocation2 + $0x94] sm:$0xf] }
  0xbe   : > { %v4070_v5 = vrot.slane %v1844_v48, 9  ;;  %v2113_v30 = vor.u32 %v2112_v62, %v5326_v40  ;;  %v2122_v56 = vrot.slane %v2120_v19, 4  ;;  %v2126_v25 = vshll.u32 %v5370_v61, 16 }
  0xbf   : > { %v5390_v34 = vrot.slane %v2116_v28, 5  ;;  %v1726_v14 = vsel %vm4674_vm13, %v1721_v11, %v5336_v12  ;;  %v4181_v4 = vcombine.low %v5366_v54, %v5376_v7  ;;  %v435_v18 = vsel %vm4683_vm14, %v427_v38, %v434_v39  ;;  %v5413_v20 = vpop.permute.xlu1 %2826  ;;  %v5430_v38 = vld [vmem:[#allocation2 + $0x30] sm:$0xe]  ;;  %v5479_v7 = vld [vmem:[#allocation2 + $0x4] sm:$0xf] }
  0xc0   : > { %3070 = vrot.lane.b32.xlu0 %v4173_v15, %s4540_s3  ;;  %v2299_v63 = vshrl.u32 %v5380_v8, 16  ;;  %v342_v15 = vld [vmem:[%s4654_s27 + $0x60] sm:$0xf]  ;;  %705 = vst.msk [vmem:[#allocation2 + $0x40] sm:$0xf] %vm207_vm0, %v435_v18  ;;  %v1978_v10 = vrot.slane %v1976_v37, 4  ;;  %v703_v12 = vsel %vm4667_vm12, %v426_v55, %v702_v35  ;;  %v5409_v44 = vsel %vm4647_vm9, %v4070_v5, %v1976_v37 }
  0xc1   : > { %v1444_v21 = vld [vmem:[#allocation2 + $0x98] sm:$0x1]  ;;  %v2123_v29 = vor.u32 %v2122_v56, %v5390_v34  ;;  %v436_v42 = vrot.slane %v5368_v24, 4  ;;  %v2302_v36 = vshll.u32 %v5380_v8, 16  ;;  %704 = vst [vmem:[#allocation2 + $0x3c] sm:$0xf] %v703_v12 }
  0xc2   : > { %v1733_v40 = vshll.u32 %v1444_v21, 16  ;;  %v1979_v53 = vrot.slane %v1444_v21, 5  ;;  %v2114_v51 = vrot.slane %v2113_v30, 4  ;;  %v2128_v47 = vrot.slane %v2126_v25, 5  ;;  %v794_v24 = vld [vmem:[#allocation2 + $0x30] sm:$0xf] }
  0xc3   : > { %v2301_v9 = vrot.slane %v2299_v63, 4  ;;  %v2124_v19 = vrot.slane %v2123_v29, 4  ;;  %v283_v57 = vsel %vm4628_vm5, 0, %v282_v41  ;;  %v257_v62 = vsel %vm4620_vm3, 0, %v256_v23  ;;  %v5456_v63 = vpop.permute.xlu0 %3066 }
  0xc4   : > { %3072 = vrot.lane.b32.xlu0 %v4174_v50, %s4540_s3  ;;  %v1735_v60 = vrot.slane %v1733_v40, 5  ;;  %v557_v27 = vshrl.u32 %v342_v15, 16  ;;  %v5428_v48 = vsel %vm4647_vm9, %v1978_v10, %v1979_v53  ;;  %284 = vst [vmem:[#allocation2 + $0x44] sm:$0x1] %v283_v57  ;;  %258 = vst [vmem:[#allocation2 + $0x9c] sm:$0x1] %v257_v62 }
  0xc5   : > { %v560_v50 = vshll.u32 %v342_v15, 16  ;;  %v565_v11 = vshrl.u32 %v343_v49, 16  ;;  %v2304_v28 = vrot.slane %v2302_v36, 5  ;;  %v568_v39 = vshll.u32 %v343_v49, 16  ;;  %v5463_v49 = vld [vmem:[#allocation2 + $0x98] sm:$0x1] }
  0xc6   : > { %v1736_v0 = vsel %vm4674_vm13, %v1731_v58, %v1735_v60  ;;  %v559_v55 = vrot.slane %v557_v27, 7  ;;  %v2119_v58 = vsel %vm4674_vm13, %v2114_v51, %v5390_v34  ;;  %v2312_v5 = vshrl.u32 %v5418_v13, 16  ;;  %v5451_v34 = vpop.permute.xlu1 %2828 }
  0xc7   : > { %v4166_v37 = vcombine.low %v1726_v14, %v1736_v0  ;;  %v5440_v30 = vrot.slane %v565_v11, 7  ;;  %v2522_v56 = vrot.slane %v5338_v26, 5  ;;  %v5444_v25 = vld [vmem:[#allocation2 + $0x40] sm:$0xf]  ;;  %v4182_v41 = vcombine.low %v5409_v44, %v5428_v48 }
  0xc8   : > { %3166 = vrot.lane.b32.xlu0 %v4189_v43, %s4542_s5  ;;  %v2129_v33 = vsel %vm4674_vm13, %v2124_v19, %v2128_v47  ;;  %v563_v43 = vrot.slane %v559_v55, 4  ;;  %v4077_v23 = vrot.slane %v5430_v38, 9  ;;  %v2144_v21 = vshrl.u32 %v5444_v25, 16  ;;  %v2016_v15 = vld [vmem:[#allocation2 + $0x3c] sm:$0xf] }
  0xc9   : > { %3008 = vrot.lane.b32.xlu1 %v4166_v37, %s4541_s4  ;;  %v2140_v14 = vshll.u32 %v5444_v25, 16  ;;  %v562_v26 = vor.u32 %v560_v50, %v559_v55  ;;  %v570_v18 = vor.u32 %v568_v39, %v5440_v30  ;;  %v2524_v40 = vrot.slane %v2522_v56, 4  ;;  %v5491_v55 = vld [vmem:[#allocation2 + $0x34] sm:$0xf]  ;;  %v5493_v39 = vpop.permute.xlu0 %2746 }
  0xca   : > { %v2525_v35 = vrot.slane %v5370_v61, 5  ;;  %v2305_v10 = vor.u32 %v2304_v28, %v2301_v9  ;;  %v2308_v53 = vshll.u32 %v5418_v13, 16  ;;  %v2131_v29 = vshrl.u32 %v2016_v15, 16  ;;  %v5485_v11 = vpop.permute.xlu1 %3082 }
  0xcb   : > { %v2134_v12 = vshll.u32 %v2016_v15, 16  ;;  %v4190_v44 = vcombine.low %v2016_v15, %v5444_v25  ;;  %v5461_v36 = vrot.slane %v2140_v14, 5  ;;  %v4205_v60 = vcombine.low %v2119_v58, %v2129_v33  ;;  %v706_v51 = vld [vmem:[#allocation2 + $0x44] sm:$0x1]  ;;  %v758_v9 = vld [vmem:[#allocation2 + $0x9c] sm:$0xf] }
  0xcc   : > { %v2146_v47 = vrot.slane %v2144_v21, 4  ;;  %v571_v61 = vsel %vm4683_vm14, %v563_v43, %v570_v18  ;;  %v2306_v19 = vrot.slane %v2305_v10, 4  ;;  %v2133_v57 = vrot.slane %v2131_v29, 4  ;;  %6845 = vst [vmem:[#allocation7_spill] sm:$0xff] %v5485_v11  ;;  %v5505_v43 = vld [vmem:[#allocation2 + $0x38] sm:$0x1] }
  0xcd   : > { %3086 = vrot.lane.b32.xlu1 %v4181_v4, %s4540_s3  ;;  %v2136_v62 = vrot.slane %v2134_v12, 5  ;;  %3168 = vrot.lane.b32.xlu0 %v4190_v44, %s4542_s5  ;;  %v707_v27 = vsel %vm4620_vm3, %v436_v42, %v706_v51  ;;  %v759_v54 = vsel %vm4667_vm12, %v562_v26, %v758_v9  ;;  %761 = vst.msk [vmem:[#allocation2 + $0xa0] sm:$0xf] %vm207_vm0, %v571_v61  ;;  %v5481_v4 = vld [vmem:[#allocation2] sm:$0xf]  ;;  %v2310_v48 = vrot.slane %v2308_v53, 5 }
  0xce   : > { %708 = vst [vmem:[#allocation2 + $0x44] sm:$0x1] %v707_v27  ;;  %760 = vst [vmem:[#allocation2 + $0x9c] sm:$0xf] %v759_v54  ;;  %v2314_v50 = vrot.slane %v2312_v5, 4  ;;  %v4197_v42 = vcombine.low %v5380_v8, %v5418_v13  ;;  %v2147_v37 = vor.u32 %v2146_v47, %v5461_v36  ;;  %v2318_v28 = vshll.u32 %v5463_v49, 16  ;;  %v5520_v9 = vpop.permute.xlu1 %2732 }
  0xcf   : > { %v2137_v38 = vor.u32 %v2136_v62, %v2133_v57  ;;  %v572_v58 = vrot.slane %v5440_v30, 4  ;;  %v5499_v5 = vsel %vm4647_vm9, %v4077_v23, %v2522_v56  ;;  %v5503_v8 = vsel %vm4647_vm9, %v2524_v40, %v2525_v35  ;;  %v306_v21 = vld [vmem:[#allocation2 + $0xa4] sm:$0x1]  ;;  %v2445_v12 = vld [vmem:[#allocation2 + $0x3c] sm:$0xe] }
  0xd0   : > { %v2315_v33 = vor.u32 %v2314_v50, %v2310_v48  ;;  %v2320_v26 = vrot.slane %v2318_v28, 5  ;;  %v934_v18 = vshrl.u32 %v794_v24, 16  ;;  %v937_v10 = vshll.u32 %v794_v24, 16  ;;  %v5526_v50 = vpop.permute.xlu0 %2986 }
  0xd1   : > { %3088 = vrot.lane.b32.xlu1 %v4182_v41, %s4540_s3  ;;  %3246 = vrot.lane.b32.xlu0 %v4205_v60, %s4543_s6  ;;  %v2138_v14 = vrot.slane %v2137_v38, 4  ;;  %v2311_v41 = vsel %vm4674_vm13, %v2306_v19, %v2310_v48  ;;  %v943_v56 = vshll.u32 %v5491_v55, 16  ;;  %v947_v23 = vshrl.u32 %v5491_v55, 16 }
  0xd2   : > { %v2316_v15 = vrot.slane %v2315_v33, 4  ;;  %v2148_v40 = vrot.slane %v2147_v37, 4  ;;  %v936_v35 = vrot.slane %v934_v18, 4  ;;  %v953_v53 = vshll.u32 %v5505_v43, 16 }
  0xd3   : > { %v307_v29 = vsel %vm4628_vm5, 0, %v306_v21  ;;  %v939_v51 = vrot.slane %v937_v10, 5  ;;  %v945_v47 = vrot.slane %v943_v56, 5  ;;  %v949_v61 = vrot.slane %v947_v23, 4 }
  0xd4   : > { %v5516_v44 = vld [vmem:[#allocation2 + $0xa0] sm:$0xf]  ;;  %v2321_v60 = vsel %vm4674_vm13, %v2316_v15, %v2320_v26  ;;  %308 = vst [vmem:[#allocation2 + $0xa4] sm:$0x1] %v307_v29  ;;  %v2143_v57 = vsel %vm4674_vm13, %v2138_v14, %v5461_v36  ;;  %v955_v48 = vrot.slane %v953_v53, 5  ;;  %v4078_v14 = vrot.slane %v2445_v12, 9  ;;  %v5542_v12 = vpop.permute.xlu1 %2748 }
  0xd5   : > { %3182 = vrot.lane.b32.xlu1 %v4197_v42, %s4542_s5  ;;  %v2045_v19 = vld [vmem:[#allocation2 + $0x44] sm:$0x1]  ;;  %v2032_v62 = vld [vmem:[#allocation2 + $0x9c] sm:$0xf]  ;;  %v2336_v27 = vshrl.u32 %v5516_v44, 16  ;;  %v4213_v54 = vcombine.low %v2311_v41, %v2321_v60  ;;  %v940_v28 = vor.u32 %v939_v51, %v936_v35  ;;  %v950_v33 = vor.u32 %v949_v61, %v945_v47 }
  0xd6   : > { %v2150_v24 = vshll.u32 %v2045_v19, 16  ;;  %v2323_v42 = vshrl.u32 %v2032_v62, 16  ;;  %v2326_v38 = vshll.u32 %v2032_v62, 16  ;;  %v4198_v37 = vcombine.low %v2032_v62, %v5516_v44  ;;  %v2452_v53 = vld [vmem:[#allocation2 + $0x90] sm:$0xe] }
  0xd7   : > { %v2332_v21 = vshll.u32 %v5516_v44, 16  ;;  %v2338_v26 = vrot.slane %v2336_v27, 4  ;;  %v941_v41 = vrot.slane %v940_v28, 4  ;;  %v951_v10 = vrot.slane %v950_v33, 4  ;;  %v5536_v51 = vld [vmem:[#allocation2 + $0x60] sm:$0xf] }
  0xd8   : > { %v2152_v18 = vrot.slane %v2150_v24, 5  ;;  %v2325_v15 = vrot.slane %v2323_v42, 4  ;;  %v2328_v36 = vrot.slane %v2326_v38, 5  ;;  %v2529_v23 = vrot.slane %v5444_v25, 5  ;;  %v5538_v61 = vld [vmem:[#allocation2 + $0x64] sm:$0xf] }
  0xd9   : > { %3184 = vrot.lane.b32.xlu1 %v4198_v37, %s4542_s5  ;;  %v5531_v56 = vrot.slane %v2332_v21, 5  ;;  %v2532_v60 = vrot.slane %v2045_v19, 5  ;;  %v946_v24 = vsel %vm4674_vm13, %v941_v41, %v945_v47  ;;  %v956_v25 = vsel %vm4674_vm13, %v951_v10, %v955_v48  ;;  %v796_v19 = vld [vmem:[#allocation2 + $0x3c] sm:$0xf]  ;;  %v5549_v38 = vld [vmem:[#allocation2 + $0x40] sm:$0xf] }
  0xda   : > { %v2153_v35 = vsel %vm4674_vm13, %v2148_v40, %v2152_v18  ;;  %v2329_v29 = vor.u32 %v2328_v36, %v2325_v15  ;;  %v4221_v28 = vcombine.low %v5499_v5, %v5503_v8  ;;  %v4085_v48 = vrot.slane %v2452_v53, 9  ;;  %v810_v8 = vld [vmem:[#allocation2 + $0x90] sm:$0xf]  ;;  %v5570_v30 = vld [vmem:[#allocation2 + $0x44] sm:$0x1] }
  0xdb   : > { %v4206_v27 = vcombine.low %v2143_v57, %v2153_v35  ;;  %v762_v42 = vld [vmem:[#allocation2 + $0xa4] sm:$0x1]  ;;  %v2339_v40 = vor.u32 %v2338_v26, %v5531_v56  ;;  %v4111_v33 = vcombine.low %v946_v24, %v956_v25  ;;  %v5565_v21 = vsel %vm4647_vm9, %v4078_v14, %v2529_v23  ;;  %v5581_v10 = vld [vmem:[#allocation2 + $0x94] sm:$0xf]  ;;  %v5589_v24 = vpop.permute.xlu1 %3002  ;;  %v5593_v25 = vld [vmem:[#allocation2 + $0x98] sm:$0x1] }
  0xdc   : > { %v5551_v37 = vpop.permute.xlu0 %2988  ;;  %v763_v47 = vsel %vm4620_vm3, %v572_v58, %v762_v42  ;;  %v5560_v57 = vrot.slane %v2329_v29, 4  ;;  %v2531_v26 = vrot.slane %v2529_v23, 4  ;;  %v2578_v5 = vrot.slane %v5418_v13, 5 }
  0xdd   : > { %3262 = vrot.lane.b32.xlu1 %v4213_v54, %s4543_s6  ;;  %3248 = vrot.lane.b32.xlu0 %v4206_v27, %s4543_s6  ;;  %764 = vst [vmem:[#allocation2 + $0xa4] sm:$0x1] %v763_v47  ;;  %v5568_v54 = vrot.slane %v2339_v40, 4  ;;  %v958_v58 = vshrl.u32 %v796_v19, 16  ;;  %v961_v18 = vshll.u32 %v796_v19, 16  ;;  %v967_v15 = vshll.u32 %v5549_v38, 16 }
  0xde   : > { %vm3354_vm15 = vcmask 31744   ;;  %v2335_v36 = vsel %vm4674_vm13, %v5560_v57, %v5531_v56  ;;  %v2533_v14 = vsel %vm4647_vm9, %v2531_v26, %v2532_v60  ;;  %v2581_v13 = vrot.slane %v5463_v49, 5 }
  0xdf   : > { %v971_v41 = vshrl.u32 %v5549_v38, 16  ;;  %v5587_v53 = vsel %vm4647_vm9, %v4085_v48, %v2578_v5  ;;  %v960_v35 = vrot.slane %v958_v58, 4  ;;  %v963_v29 = vrot.slane %v961_v18, 5  ;;  %v1225_v48 = vld [vmem:[#allocation2 + $0x30] sm:$0xe] }
  0xe0   : > { %v5583_v23 = vpop.permute.xlu0 %3068  ;;  %v969_v27 = vrot.slane %v967_v15, 5  ;;  %v2580_v56 = vrot.slane %v2578_v5, 4  ;;  %v977_v49 = vshll.u32 %v5570_v30, 16  ;;  %v1126_v42 = vshrl.u32 %v810_v8, 16 }
  0xe1   : > { %3326 = vrot.lane.b32.xlu0 %v4221_v28, %s4544_s7  ;;  %v973_v60 = vrot.slane %v971_v41, 4  ;;  %v4222_v40 = vcombine.low %v5565_v21, %v2533_v14  ;;  %v964_v19 = vor.u32 %v963_v29, %v960_v35  ;;  %v1129_v47 = vshll.u32 %v810_v8, 16 }
  0xe2   : > { %v1135_v57 = vshll.u32 %v5581_v10, 16  ;;  %v979_v58 = vrot.slane %v977_v49, 5  ;;  %v1128_v18 = vrot.slane %v1126_v42, 4  ;;  %v1139_v15 = vshrl.u32 %v5581_v10, 16 }
  0xe3   : > { %v974_v26 = vor.u32 %v973_v60, %v969_v27  ;;  %v965_v41 = vrot.slane %v964_v19, 4  ;;  %v1131_v62 = vrot.slane %v1129_v47, 5  ;;  %v1145_v21 = vshll.u32 %v5593_v25, 16 }
  0xe4   : > { %v5598_v28 = vpop.permute.xlu0 %3162  ;;  %v5600_v5 = vld [vmem:[#allocation2 + $0xa4] sm:$0x1]  ;;  %v5602_v0 = vrot.slane %v1135_v57, 5  ;;  %v1141_v35 = vrot.slane %v1139_v15, 4  ;;  %v4047_v29 = vrot.slane %v1225_v48, 9  ;;  %v2582_v60 = vsel %vm4647_vm9, %v2580_v56, %v2581_v13 }
  0xe5   : > { %6846 = vst [vmem:[#allocation8_spill] sm:$0xff] %v5598_v28  ;;  %2738 = vrot.lane.b32.xlu0 %v4111_v33, %s4538_s29  ;;  %v2342_v8 = vshll.u32 %v5600_v5, 16  ;;  %v975_v14 = vrot.slane %v974_v26, 4  ;;  %v970_v49 = vsel %vm4674_vm13, %v965_v41, %v969_v27  ;;  %v1132_v42 = vor.u32 %v1131_v62, %v1128_v18  ;;  %v2453_v56 = vld [vmem:[#allocation2 + $0x9c] sm:$0xe] }
  0xe6   : > { %v1318_v19 = vrot.slane %v5491_v55, 5  ;;  %v1142_v11 = vor.u32 %v1141_v35, %v5602_v0  ;;  %v1321_v26 = vrot.slane %v5505_v43, 5  ;;  %v1147_v28 = vrot.slane %v1145_v21, 5  ;;  %v1226_v43 = vld [vmem:[#allocation2 + $0x3c] sm:$0xe] }
  0xe7   : > { %v5612_v47 = vpop.permute.xlu1 %3004  ;;  %v2344_v57 = vrot.slane %v2342_v8, 5  ;;  %v980_v33 = vsel %vm4674_vm13, %v975_v14, %v979_v58  ;;  %v1133_v15 = vrot.slane %v1132_v42, 4  ;;  %v2585_v58 = vrot.slane %v5516_v44, 5  ;;  %v4430_v14 = vld [vmem:[#allocation2 + $0x10] sm:$0xf] }
  0xe8   : > { %v4112_v48 = vcombine.low %v970_v49, %v980_v33  ;;  %v1320_v13 = vrot.slane %v1318_v19, 4  ;;  %v5618_v17 = vpop.permute.xlu0 %3164  ;;  %v1143_v62 = vrot.slane %v1142_v11, 4  ;;  %v1319_v27 = vsel %vm4647_vm9, %v4047_v29, %v1318_v19  ;;  %v5645_v19 = vld [vmem:[#allocation2 + $0xa4] sm:$0x1] }
  0xe9   : > { %v2345_v55 = vsel %vm4674_vm13, %v5568_v54, %v2344_v57  ;;  %3328 = vrot.lane.b32.xlu0 %v4222_v40, %s4544_s7  ;;  %v6847_v18 = vcombine.low %v5481_v4, %v5479_v7  ;;  %v812_v54 = vld [vmem:[#allocation2 + $0x9c] sm:$0xf]  ;;  %v4431_v40 = vld [vmem:[#allocation2 + $0xc] sm:$0xf]  ;;  %v4229_v35 = vcombine.low %v5587_v53, %v2582_v60  ;;  %v1138_v44 = vsel %vm4674_vm13, %v1133_v15, %v5602_v0  ;;  %v5639_v7 = vld [vmem:[#allocation2 + $0xa0] sm:$0xf] }
  0xea   : > { %v4214_v21 = vcombine.low %v2335_v36, %v2345_v55  ;;  %v1322_v8 = vsel %vm4647_vm9, %v1320_v13, %v1321_v26  ;;  %v4092_v11 = vcombine.low %v4431_v40, %v4430_v14  ;;  %v4086_v29 = vrot.slane %v2453_v56, 9  ;;  %v1409_v55 = vld [vmem:[#allocation2 + $0x3c] sm:$0xf]  ;;  %v1233_v14 = vld [vmem:[#allocation2 + $0x90] sm:$0xe] }
  0xeb   : > { %v3357_v41 = vsel %vm3354_vm15, %v6847_v18, %v5312_v6  ;;  %v2588_v49 = vrot.slane %v5600_v5, 5  ;;  %v1148_v6 = vsel %vm4674_vm13, %v1143_v62, %v1147_v28  ;;  %v4127_v4 = vcombine.low %v1319_v27, %v1322_v8  ;;  %v5647_v53 = vpop.permute.xlu1 %3084 }
  0xec   : > { %3264 = vrot.lane.b32.xlu1 %v4214_v21, %s4543_s6  ;;  %v4048_v36 = vrot.slane %v1226_v43, 9  ;;  %v1325_v42 = vrot.slane %v5549_v38, 5  ;;  %v2587_v0 = vrot.slane %v2585_v58, 4  ;;  %v1328_v5 = vrot.slane %v5570_v30, 5  ;;  %v5654_v15 = vpop.permute.xlu0 %3242 }
  0xed   : > { %2740 = vrot.lane.b32.xlu0 %v4112_v48, %s4538_s29  ;;  %v1150_v60 = vshrl.u32 %v812_v54, 16  ;;  %v1153_v57 = vshll.u32 %v812_v54, 16  ;;  %vm3403_vm1 = vcmask 64512   ;;  %v1159_v26 = vshll.u32 %v5639_v7, 16 }
  0xee   : > { %v1326_v33 = vsel %vm4647_vm9, %v4048_v36, %v1325_v42  ;;  %v1327_v28 = vrot.slane %v1325_v42, 4  ;;  %v1163_v56 = vshrl.u32 %v5639_v7, 16  ;;  %v1169_v48 = vshll.u32 %v5645_v19, 16 }
  0xef   : > { %v1152_v38 = vrot.slane %v1150_v60, 4  ;;  %v1155_v13 = vrot.slane %v1153_v57, 5  ;;  %v4119_v30 = vcombine.low %v1138_v44, %v1148_v6  ;;  %v2586_v62 = vsel %vm4647_vm9, %v4086_v29, %v2585_v58  ;;  %v4432_v44 = vld [vmem:[#allocation2 + $0x70] sm:$0xf]  ;;  %v4433_v29 = vld [vmem:[#allocation2 + $0x6c] sm:$0xf]  ;;  %v5670_v36 = vpop.permute.xlu1 %3178 }
  0xf0   : > { %3342 = vrot.lane.b32.xlu1 %v4229_v35, %s4544_s7  ;;  %v1329_v27 = vsel %vm4647_vm9, %v1327_v28, %v1328_v5  ;;  %v1161_v43 = vrot.slane %v1159_v26, 5  ;;  %v2589_v18 = vsel %vm4647_vm9, %v2587_v0, %v2588_v49  ;;  %v1165_v54 = vrot.slane %v1163_v56, 4  ;;  %v5668_v35 = vld [vmem:[#allocation2 + $0x40] sm:$0xf]  ;;  %v235_v57 = vld [vmem:[#allocation2 + $0x48] sm:$0x1] }
  0xf1   : > { %2818 = vrot.lane.b32.xlu0 %v4127_v4, %s4537_s28  ;;  %v4128_v21 = vcombine.low %v1326_v33, %v1329_v27  ;;  %v1156_v8 = vor.u32 %v1155_v13, %v1152_v38  ;;  %vm3436_vm2 = vcmask 97280   ;;  %v3360_v40 = vsel %vm3354_vm15, %v4092_v11, %v5520_v9  ;;  %v328_v33 = vld [vmem:[%s4654_s27 + $0x28] sm:$0xf] }
  0xf2   : > { %v1546_v58 = vshrl.u32 %v1409_v55, 16  ;;  %v4100_v6 = vcombine.low %v4433_v29, %v4432_v44  ;;  %v1166_v42 = vor.u32 %v1165_v54, %v1161_v43  ;;  %v1171_v49 = vrot.slane %v1169_v48, 5 }
  0xf3   : > { %v1157_v4 = vrot.slane %v1156_v8, 4  ;;  %v1549_v0 = vshll.u32 %v1409_v55, 16  ;;  %v3405_v5 = vsel %vm3403_vm1, %v3357_v41, %v5291_v2  ;;  %v4230_v9 = vcombine.low %v2586_v62, %v2589_v18  ;;  %v329_v41 = vld [vmem:[%s4654_s27 + $0x2c] sm:$0xf]  ;;  %v1234_v62 = vld [vmem:[#allocation2 + $0x9c] sm:$0xe]  ;;  %v5695_v54 = vpop.permute.xlu1 %3180 }
  0xf4   : > { %2754 = vrot.lane.b32.xlu1 %v4119_v30, %s4538_s29  ;;  %v4055_v11 = vrot.slane %v1233_v14, 9  ;;  %v1374_v60 = vrot.slane %v5581_v10, 5  ;;  %v1167_v38 = vrot.slane %v1166_v42, 4  ;;  %v4143_v13 = vcombine.low %v1409_v55, %v5668_v35 }
  0xf5   : > { %v5677_v28 = vpop.permute.xlu0 %3244  ;;  %2820 = vrot.lane.b32.xlu0 %v4128_v21, %s4537_s28  ;;  %v1162_v26 = vsel %vm4674_vm13, %v1157_v4, %v1161_v43  ;;  %v1377_v2 = vrot.slane %v5593_v25, 5  ;;  %v3407_v56 = vsel %vm3403_vm1, %v3360_v40, %v5416_v46  ;;  %v1548_v48 = vrot.slane %v1546_v58, 4 }
  0xf6   : > { %v1559_v10 = vshrl.u32 %v5668_v35, 16  ;;  %v1376_v30 = vrot.slane %v1374_v60, 4  ;;  %v1172_v27 = vsel %vm4674_vm13, %v1167_v38, %v1171_v49  ;;  %v1551_v18 = vrot.slane %v1549_v0, 5 }
  0xf7   : > { %v236_v43 = vsel %vm4620_vm3, 0, %v235_v57  ;;  %v438_v21 = vshrl.u32 %v328_v33, 16  ;;  %v4120_v25 = vcombine.low %v1162_v26, %v1172_v27  ;;  %v1375_v55 = vsel %vm4647_vm9, %v4055_v11, %v1374_v60  ;;  %v259_v27 = vld [vmem:[#allocation2 + $0xa8] sm:$0x1] }
  0xf8   : > { %3344 = vrot.lane.b32.xlu1 %v4230_v9, %s4544_s7  ;;  %237 = vst [vmem:[#allocation2 + $0x48] sm:$0x1] %v236_v43  ;;  %v441_v46 = vshll.u32 %v328_v33, 16  ;;  %v446_v8 = vshrl.u32 %v329_v41, 16  ;;  %v1378_v14 = vsel %vm4647_vm9, %v1376_v30, %v1377_v2  ;;  %v449_v58 = vshll.u32 %v329_v41, 16  ;;  %v5729_v30 = vpop.permute.xlu1 %3258 }
  0xf9   : > { %2914 = vrot.lane.b32.xlu0 %v4143_v13, %s4539_s30  ;;  %v440_v40 = vrot.slane %v438_v21, 7  ;;  %v4056_v44 = vrot.slane %v1234_v62, 9  ;;  %v5700_v29 = vpop.permute.xlu0 %3322  ;;  %v6848_v4 = vcombine.low %v5536_v51, %v5538_v61  ;;  %v1381_v0 = vrot.slane %v5639_v7, 5  ;;  %v5715_v33 = vld [vmem:[#allocation2 + $0x44] sm:$0x1] }
  0xfa   : > { %v5707_v49 = vrot.slane %v446_v8, 7  ;;  %v1384_v9 = vrot.slane %v5645_v19, 5  ;;  %vm3469_vm4 = vcmask 130048   ;;  %v3440_v11 = vsel %vm3436_vm2, %v3407_v56, %v5382_v31  ;;  %v1425_v41 = vld [vmem:[#allocation2 + $0x9c] sm:$0xf] }
  0xfb   : > { %v3381_v42 = vsel %vm3354_vm15, %v6848_v4, %v5493_v39  ;;  %v3384_v60 = vsel %vm3354_vm15, %v4100_v6, %v5542_v12  ;;  %v444_v57 = vrot.slane %v440_v40, 4  ;;  %v4135_v51 = vcombine.low %v1375_v55, %v1378_v14  ;;  %v285_v56 = vld [vmem:[#allocation2 + $0x50] sm:$0x1]  ;;  %v344_v21 = vld [vmem:[%s4654_s27 + $0x68] sm:$0xf] }
  0xfc   : > { %2756 = vrot.lane.b32.xlu1 %v4120_v25, %s4538_s29  ;;  %v443_v39 = vor.u32 %v441_v46, %v440_v40  ;;  %v451_v61 = vor.u32 %v449_v58, %v5707_v49  ;;  %v1383_v26 = vrot.slane %v1381_v0, 4  ;;  %v1382_v7 = vsel %vm4647_vm9, %v4056_v44, %v1381_v0  ;;  %v345_v14 = vld [vmem:[%s4654_s27 + $0x6c] sm:$0xf] }
  0xfd   : > { %v1552_v19 = vor.u32 %v1551_v18, %v1548_v48  ;;  %v1555_v38 = vshll.u32 %v5668_v35, 16  ;;  %v1561_v31 = vrot.slane %v1559_v10, 4  ;;  %v3438_v12 = vsel %vm3436_vm2, %v3405_v5, %v5347_v22  ;;  %v5740_v18 = vpop.permute.xlu0 %2734 }
  0xfe   : > { %v452_v6 = vsel %vm4683_vm14, %v444_v57, %v451_v61  ;;  %v1385_v13 = vsel %vm4647_vm9, %v1383_v26, %v1384_v9  ;;  %v1565_v2 = vshll.u32 %v5715_v33, 16  ;;  %v3421_v48 = vsel %vm3403_vm1, %v3381_v42, %v5413_v20  ;;  %v1837_v57 = vld [vmem:[#allocation2 + $0x3c] sm:$0xe] }
  0xff   : > { %v5735_v10 = vsel %vm3469_vm4, %v3438_v12, %v5526_v50  ;;  %v3473_v22 = vsel %vm3469_vm4, %v3440_v11, %v5551_v37  ;;  %v709_v5 = vld [vmem:[#allocation2 + $0x48] sm:$0xf]  ;;  %712 = vst.msk [vmem:[#allocation2 + $0x4c] sm:$0xf] %vm207_vm0, %v452_v6  ;;  %v1557_v62 = vrot.slane %v1555_v38, 5  ;;  %v5745_v20 = vsel %vm3403_vm1, %v3384_v60, %v5451_v34 }
 0x100   : > { %2834 = vrot.lane.b32.xlu1 %v4135_v51, %s4537_s28  ;;  %v710_v50 = vsel %vm4667_vm12, %v443_v39, %v709_v5  ;;  %v4136_v43 = vcombine.low %v1382_v7, %v1385_v13  ;;  %vm3502_vm6 = vcmask 162816   ;;  %v5749_v37 = vld [vmem:[#allocation2 + $0xa0] sm:$0xf]  ;;  %v1553_v25 = vrot.slane %v1552_v19, 4 }
 0x101   : > { %711 = vst [vmem:[#allocation2 + $0x48] sm:$0xf] %v710_v50  ;;  %v1562_v55 = vor.u32 %v1561_v31, %v1557_v62  ;;  %v1567_v46 = vrot.slane %v1565_v2, 5  ;;  %v1738_v8 = vshrl.u32 %v1425_v41, 16  ;;  %v453_v40 = vrot.slane %v5707_v49, 4  ;;  %v5776_v7 = vpop.permute.xlu0 %3324 }
 0x102   : > { %v5756_v34 = vsel %vm3502_vm6, %v3473_v22, %v5583_v23  ;;  %v3454_v58 = vsel %vm3436_vm2, %v3421_v48, %v5340_v32  ;;  %v286_v44 = vsel %vm4628_vm5, 0, %v285_v56  ;;  %v1741_v42 = vshll.u32 %v1425_v41, 16 }
 0x103   : > { %v1563_v4 = vrot.slane %v1562_v55, 4  ;;  %v4151_v0 = vcombine.low %v1425_v41, %v5749_v37  ;;  %287 = vst [vmem:[#allocation2 + $0x50] sm:$0x1] %v286_v44  ;;  %v260_v9 = vsel %vm4620_vm3, 0, %v259_v27  ;;  %v574_v49 = vshrl.u32 %v344_v21, 16 }
 0x104   : > { %2836 = vrot.lane.b32.xlu1 %v4136_v43, %s4537_s28  ;;  %261 = vst [vmem:[#allocation2 + $0xa8] sm:$0x1] %v260_v9  ;;  %v577_v23 = vshll.u32 %v344_v21, 16  ;;  %v582_v11 = vshrl.u32 %v345_v14, 16  ;;  %v585_v60 = vshll.u32 %v345_v14, 16  ;;  %v5770_v51 = vsel %vm3469_vm4, %v3454_v58, %v5589_v24 }
 0x105   : > { %v1558_v39 = vsel %vm4674_vm13, %v1553_v25, %v1557_v62  ;;  %v1568_v61 = vsel %vm4674_vm13, %v1563_v4, %v1567_v46  ;;  %v1740_v26 = vrot.slane %v1738_v8, 4  ;;  %v1751_v38 = vshrl.u32 %v5749_v37, 16  ;;  %v5790_v21 = vld [vmem:[#allocation2 + $0xa4] sm:$0x1]  ;;  %v5802_v9 = vpop.permute.xlu0 %2736 }
 0x106   : > { %v5766_v32 = vpop.permute.xlu1 %3260  ;;  %v5778_v19 = vld [vmem:[#allocation2 + $0x4c] sm:$0xf]  ;;  %v576_v31 = vrot.slane %v574_v49, 7  ;;  %v5781_v12 = vrot.slane %v582_v11, 7  ;;  %v1927_v6 = vrot.slane %v5668_v35, 5  ;;  %v1743_v13 = vrot.slane %v1741_v42, 5 }
 0x107   : > { %v1583_v24 = vshrl.u32 %v5778_v19, 16  ;;  %v1579_v2 = vshll.u32 %v5778_v19, 16  ;;  %v4063_v41 = vrot.slane %v1837_v57, 9  ;;  %v4159_v48 = vcombine.low %v1558_v39, %v1568_v61 }
 0x108   : > { %v1411_v56 = vld [vmem:[#allocation2 + $0x48] sm:$0xf]  ;;  %2930 = vrot.lane.b32.xlu1 %v4151_v0, %s4539_s30  ;;  %v579_v22 = vor.u32 %v577_v23, %v576_v31  ;;  %v580_v5 = vrot.slane %v576_v31, 4  ;;  %v587_v62 = vor.u32 %v585_v60, %v5781_v12  ;;  %v1930_v35 = vrot.slane %v5715_v33, 5  ;;  %v6849_v60 = vld [vmem:[#allocation6_spill] sm:$0xff] }
 0x109   : > { %v1570_v27 = vshrl.u32 %v1411_v56, 16  ;;  %v1573_v50 = vshll.u32 %v1411_v56, 16  ;;  %v4144_v43 = vcombine.low %v1411_v56, %v5778_v19  ;;  %v5794_v46 = vrot.slane %v1579_v2, 5 }
 0x10a   : > { %v5792_v25 = vpop.permute.xlu1 %3338  ;;  %v713_v55 = vld [vmem:[#allocation2 + $0x50] sm:$0x1]  ;;  %v1585_v8 = vrot.slane %v1583_v24, 4  ;;  %v588_v14 = vsel %vm4683_vm14, %v580_v5, %v587_v62  ;;  %v1929_v58 = vrot.slane %v1927_v6, 4  ;;  %v1744_v0 = vor.u32 %v1743_v13, %v1740_v26 }
 0x10b   : > { %v1572_v44 = vrot.slane %v1570_v27, 4  ;;  %v1575_v4 = vrot.slane %v1573_v50, 5  ;;  %2916 = vrot.lane.b32.xlu0 %v4144_v43, %s4539_s30  ;;  %v714_v42 = vsel %vm4620_vm3, %v453_v40, %v713_v55  ;;  %v765_v33 = vld [vmem:[#allocation2 + $0xa8] sm:$0xf]  ;;  %768 = vst.msk [vmem:[#allocation2 + $0xac] sm:$0xf] %vm207_vm0, %v588_v14  ;;  %v3504_v49 = vsel %vm3502_vm6, %v5735_v10, %v5456_v63  ;;  %v5848_v43 = vpop.permute.xlu0 %2814 }
 0x10c   : > { %vm3535_vm7 = vcmask 195584   ;;  %715 = vst [vmem:[#allocation2 + $0x50] sm:$0x1] %v714_v42  ;;  %v766_v23 = vsel %vm4667_vm12, %v579_v22, %v765_v33  ;;  %v1747_v11 = vshll.u32 %v5749_v37, 16  ;;  %v3456_v40 = vsel %vm3436_vm2, %v5745_v20, %v6849_v60  ;;  %v309_v24 = vld [vmem:[#allocation2 + $0xb0] sm:$0x1] }
 0x10d   : > { %v1576_v57 = vor.u32 %v1575_v4, %v1572_v44  ;;  %767 = vst [vmem:[#allocation2 + $0xa8] sm:$0xf] %v766_v23  ;;  %v1753_v39 = vrot.slane %v1751_v38, 4  ;;  %v1757_v61 = vshll.u32 %v5790_v21, 16  ;;  %v1586_v26 = vor.u32 %v1585_v8, %v5794_v46  ;;  %v6850_v20 = vld [vmem:[#allocation8_spill] sm:$0xff] }
 0x10e   : > { %v5817_v63 = vsel %vm4647_vm9, %v4063_v41, %v1927_v6  ;;  %v5821_v10 = vsel %vm4647_vm9, %v1929_v58, %v1930_v35  ;;  %v1749_v31 = vrot.slane %v1747_v11, 5  ;;  %v3537_v13 = vsel %vm3535_vm7, %v3504_v49, %v6850_v20  ;;  %v5834_v41 = vld [vmem:[%s6828_s1 + $0x10] ss:$0 sps:$4 sm:$0x33]   ;;  %v5836_v56 = vpop.permute.xlu1 %2750  ;;  %v6851_v58 = vld [vmem:[#allocation7_spill] sm:$0xff] }
 0x10f   : > { %2994 = vrot.lane.b32.xlu0 %v4159_v48, %s4541_s4  ;;  %v3489_v38 = vsel %vm3469_vm4, %v3456_v40, %v5612_v47  ;;  %v3539_v2 = vsel %vm3535_vm7, %v5756_v34, %v5618_v17  ;;  %v1745_v6 = vrot.slane %v1744_v0, 4  ;;  %v1577_v22 = vrot.slane %v1576_v57, 4  ;;  %v1838_v34 = vld [vmem:[#allocation2 + $0x48] sm:$0xe] }
 0x110   : > { %v5840_v48 = vsel %vm3502_vm6, %v3489_v38, %v5647_v53  ;;  %v1754_v5 = vor.u32 %v1753_v39, %v1749_v31  ;;  %v1759_v62 = vrot.slane %v1757_v61, 5  ;;  %v589_v47 = vrot.slane %v5781_v12, 4  ;;  %v5861_v4 = vld [vmem:[#allocation2 + $0x48] sm:$0xf] }
 0x111   : > { %v4175_v17 = vcombine.low %v5817_v63, %v5821_v10  ;;  %v1934_v27 = vrot.slane %v5778_v19, 5  ;;  %v310_v50 = vsel %vm4628_vm5, 0, %v309_v24  ;;  %v1587_v35 = vrot.slane %v1586_v26, 4 }
 0x112   : > { %v5850_v55 = vld [vmem:[#allocation2 + $0xac] sm:$0xf]  ;;  %v1755_v53 = vrot.slane %v1754_v5, 4  ;;  %vm3568_vm8 = vcmask 228352   ;;  %311 = vst [vmem:[#allocation2 + $0xb0] sm:$0x1] %v310_v50  ;;  %v1750_v14 = vsel %vm4674_vm13, %v1745_v6, %v1749_v31  ;;  %v3520_v19 = vsel %vm3502_vm6, %v5770_v51, %v6851_v58  ;;  %v5871_v57 = vpop.permute.xlu1 %3340  ;;  %v5879_v5 = vpop.permute.xlu0 %2816 }
 0x113   : > { %vm3687_vm10 = vcmask 1041408   ;;  %v1438_v8 = vld [vmem:[#allocation2 + $0x50] sm:$0x1]  ;;  %v1775_v12 = vshrl.u32 %v5850_v55, 16  ;;  %v1771_v44 = vshll.u32 %v5850_v55, 16  ;;  %v1582_v42 = vsel %vm4674_vm13, %v1577_v22, %v5794_v46 }
 0x114   : > { %4324 = vmatprep.subr.msk.bf16.mxu0 %vm3687_vm10, %v5834_v41  ;;  %4325 = vmatprep.subr.msk.bf16.mxu1 %vm3687_vm10, %v5834_v41  ;;  %v1589_v33 = vshll.u32 %v1438_v8, 16  ;;  %v1427_v0 = vld [vmem:[#allocation2 + $0xa8] sm:$0xf]  ;;  %v1760_v49 = vsel %vm4674_vm13, %v1755_v53, %v1759_v62  ;;  %v4064_v51 = vrot.slane %v1838_v34, 9  ;;  %v1936_v40 = vrot.slane %v1934_v27, 4 }
 0x115   : > { %v1762_v23 = vshrl.u32 %v1427_v0, 16  ;;  %v1765_v11 = vshll.u32 %v1427_v0, 16  ;;  %v4152_v60 = vcombine.low %v1427_v0, %v5850_v55  ;;  %v4167_v61 = vcombine.low %v1750_v14, %v1760_v49  ;;  %v5877_v6 = vld [vmem:[#allocation2 + $0x4c] sm:$0xf]  ;;  %v238_v22 = vld [vmem:[#allocation2 + $0x54] sm:$0x1] }
 0x116   : > { %v1591_v39 = vrot.slane %v1589_v33, 5  ;;  %v1937_v26 = vrot.slane %v1438_v8, 5  ;;  %v2155_v46 = vshrl.u32 %v5861_v4, 16  ;;  %v5875_v20 = vrot.slane %v1771_v44, 5  ;;  %v1845_v8 = vld [vmem:[#allocation2 + $0x9c] sm:$0xe]  ;;  %v5914_v49 = vpop.permute.xlu1 %2752 }
 0x117   : > { %v1764_v31 = vrot.slane %v1762_v23, 4  ;;  %v1767_v24 = vrot.slane %v1765_v11, 5  ;;  %2932 = vrot.lane.b32.xlu1 %v4152_v60, %s4539_s30  ;;  %v1777_v38 = vrot.slane %v1775_v12, 4  ;;  %v3570_v34 = vsel %vm3568_vm8, %v3537_v13, %v5654_v15  ;;  %v330_v12 = vld [vmem:[%s4654_s27 + $0x30] sm:$0xf] }
 0x118   : > { %v1592_v62 = vsel %vm4674_vm13, %v1587_v35, %v1591_v39  ;;  %v5887_v50 = vsel %vm3535_vm7, %v3520_v19, %v5670_v36  ;;  %v5891_v53 = vsel %vm3568_vm8, %v3539_v2, %v5677_v28  ;;  %v331_v14 = vld [vmem:[%s4654_s27 + $0x34] sm:$0xf]  ;;  %v1935_v44 = vsel %vm4647_vm9, %v4064_v51, %v1934_v27  ;;  %v4413_v36 = vld [vmem:[%s6828_s1 + $0x8] sm:$0xff]   ;;  %v4415_v39 = vld [vmem:[%s6828_s1] sm:$0xff]  }
 0x119   : > { %v4160_v58 = vcombine.low %v1582_v42, %v1592_v62  ;;  %v769_v33 = vld [vmem:[#allocation2 + $0xb0] sm:$0x1]  ;;  %v2158_v35 = vshll.u32 %v5861_v4, 16  ;;  %v1983_v15 = vrot.slane %v5749_v37, 5  ;;  %v1938_v28 = vsel %vm4647_vm9, %v1936_v40, %v1937_v26 }
 0x11a   : > { %v770_v13 = vsel %vm4620_vm3, %v589_v47, %v769_v33  ;;  %v2168_v2 = vshrl.u32 %v5877_v6, 16  ;;  %v3689_v27 = vsel %vm3687_vm10, %v5834_v41, 0  ;;  %v1768_v37 = vor.u32 %v1767_v24, %v1764_v31  ;;  %v1846_v24 = vld [vmem:[#allocation2 + $0xa8] sm:$0xe] }
 0x11b   : > { %2996 = vrot.lane.b32.xlu0 %v4160_v58, %s4541_s4  ;;  %3010 = vrot.lane.b32.xlu1 %v4167_v61, %s4541_s4  ;;  %771 = vst [vmem:[#allocation2 + $0xb0] sm:$0x1] %v770_v13  ;;  %v1778_v19 = vor.u32 %v1777_v38, %v5875_v20  ;;  %v5912_v42 = vrot.slane %v2155_v46, 4  ;;  %v4071_v0 = vrot.slane %v1845_v8, 9  ;;  %v1986_v47 = vrot.slane %v5790_v21, 5  ;;  %v5922_v61 = vpop.permute.xlu0 %2910 }
 0x11c   : > { %4281 = vmatpush3.bf16.msra.mxu0 %v3689_v27  ;;  %v239_v51 = vsel %vm4620_vm3, 0, %v238_v22  ;;  %v455_v41 = vshrl.u32 %v330_v12, 16  ;;  %v463_v23 = vshrl.u32 %v331_v14, 16  ;;  %4321 = vmatpush3.bf16.msra.mxu1 %v3689_v27  ;;  %v1985_v11 = vrot.slane %v1983_v15, 4 }
 0x11d   : > { %4282 = vmatprep.subr.bf16.mxu0 %v4413_v36  ;;  %240 = vst [vmem:[#allocation2 + $0x54] sm:$0x1] %v239_v51  ;;  %v458_v60 = vshll.u32 %v330_v12, 16  ;;  %v466_v40 = vshll.u32 %v331_v14, 16  ;;  %vm3601_vm11 = vcmask 261120   ;;  %4319 = vmatprep.subr.bf16.mxu1 %v4413_v36  ;;  %v2160_v21 = vrot.slane %v2158_v35, 5 }
 0x11e   : > { %v457_v26 = vrot.slane %v455_v41, 7  ;;  %v5924_v46 = vrot.slane %v463_v23, 7  ;;  %v3603_v31 = vsel %vm3601_vm11, %v3570_v34, %v5700_v29  ;;  %v4176_v38 = vcombine.low %v1935_v44, %v1938_v28  ;;  %v5937_v29 = vld [vmem:[#allocation2 + $0x50] sm:$0x1]  ;;  %v288_v41 = vld [vmem:[#allocation2 + $0x5c] sm:$0x1] }
 0x11f   : > { %3074 = vrot.lane.b32.xlu0 %v4175_v17, %s4540_s3  ;;  %v4191_v22 = vcombine.low %v5861_v4, %v5877_v6  ;;  %vm3654_vm10 = vcmask 293888   ;;  %v1990_v62 = vrot.slane %v5850_v55, 5  ;;  %v1769_v8 = vrot.slane %v1768_v37, 4  ;;  %v5947_v4 = vpop.permute.xlu1 %2830  ;;  %v5956_v37 = vld [vmem:[#allocation2 + $0xa8] sm:$0xf] }
 0x120   : > { %v1779_v12 = vrot.slane %v1778_v19, 4  ;;  %v461_v14 = vrot.slane %v457_v26, 4  ;;  %v468_v58 = vor.u32 %v466_v40, %v5924_v46  ;;  %4286 = vmatprep.mubr.msk.bf16.mxu0 %vm3654_vm10, %v3603_v31  ;;  %4283 = vmatpush3.bf16.msra.mxu0 %v4413_v36  ;;  %v5941_v63 = vsel %vm4647_vm9, %v4071_v0, %v1983_v15  ;;  %v5958_v19 = vpop.permute.xlu0 %2912 }
 0x121   : > { %v5945_v10 = vsel %vm4647_vm9, %v1985_v11, %v1986_v47  ;;  %v460_v17 = vor.u32 %v458_v60, %v457_v26  ;;  %v4072_v55 = vrot.slane %v1846_v24, 9  ;;  %4284 = vmatprep.subr.bf16.mxu0 %v4415_v39  ;;  %4322 = vmatpush3.bf16.msra.mxu1 %v4413_v36  ;;  %v2161_v33 = vor.u32 %v2160_v21, %v5912_v42  ;;  %v346_v60 = vld [vmem:[%s4654_s27 + $0x70] sm:$0xf]  ;;  %v347_v26 = vld [vmem:[%s4654_s27 + $0x74] sm:$0xf] }
 0x122   : > { %v1446_v34 = vld [vmem:[#allocation2 + $0xb0] sm:$0x1]  ;;  %v469_v44 = vsel %vm4683_vm14, %v461_v14, %v468_v58  ;;  %v2164_v35 = vshll.u32 %v5877_v6, 16  ;;  %v2170_v15 = vrot.slane %v2168_v2, 4  ;;  %4320 = vmatprep.subr.bf16.mxu1 %v4415_v39  ;;  %v1992_v13 = vrot.slane %v1990_v62, 4 }
 0x123   : > { %3076 = vrot.lane.b32.xlu0 %v4176_v38, %s4540_s3  ;;  %v1781_v28 = vshll.u32 %v1446_v34, 16  ;;  %719 = vst.msk [vmem:[#allocation2 + $0x58] sm:$0xf] %vm207_vm0, %v469_v44  ;;  %v1993_v27 = vrot.slane %v1446_v34, 5  ;;  %v2174_v36 = vshll.u32 %v5937_v29, 16  ;;  %v1774_v42 = vsel %vm4674_vm13, %v1769_v8, %v5875_v20 }
 0x124   : > { %v5966_v2 = vsel %vm3535_vm7, %v5840_v48, %v5695_v54  ;;  %v3586_v0 = vsel %vm3568_vm8, %v5887_v50, %v5729_v30  ;;  %v716_v47 = vld [vmem:[#allocation2 + $0x54] sm:$0xf]  ;;  %v5971_v51 = vrot.slane %v2164_v35, 5  ;;  %4285 = vmatpush3.bf16.msra.mxu0 %v4415_v39  ;;  %v4183_v11 = vcombine.low %v5941_v63, %v5945_v10  ;;  %v6007_v63 = vld [vmem:[#allocation2 + $0x1c] sm:$0xf] }
 0x125   : > { %v1783_v23 = vrot.slane %v1781_v28, 5  ;;  %v717_v20 = vsel %vm4667_vm12, %v460_v17, %v716_v47  ;;  %v5979_v54 = vsel %vm4647_vm9, %v4072_v55, %v1990_v62  ;;  %v262_v48 = vld [vmem:[#allocation2 + $0xb4] sm:$0x1]  ;;  %4323 = vmatpush3.bf16.msra.mxu1 %v4415_v39  ;;  %v5982_v30 = vrot.slane %v2161_v33, 4  ;;  %v5998_v62 = vpop.permute.xlu1 %2832  ;;  %v6011_v55 = vpop.permute.xlu0 %2990 }
 0x126   : > { %718 = vst [vmem:[#allocation2 + $0x54] sm:$0xf] %v717_v20  ;;  %v2171_v50 = vor.u32 %v2170_v15, %v5971_v51  ;;  %v2347_v40 = vshrl.u32 %v5956_v37, 16  ;;  %v2350_v21 = vshll.u32 %v5956_v37, 16  ;;  %v5993_v24 = vsel %vm4647_vm9, %v1992_v13, %v1993_v27 }
 0x127   : > { %v1784_v31 = vsel %vm4674_vm13, %v1779_v12, %v1783_v23  ;;  %3170 = vrot.lane.b32.xlu0 %v4191_v22, %s4542_s5  ;;  %v2176_v39 = vrot.slane %v2174_v36, 5  ;;  %v3605_v38 = vsel %vm3601_vm11, %v5891_v53, %v5776_v7  ;;  %v289_v58 = vsel %vm4628_vm5, 0, %v288_v41  ;;  %v6005_v22 = vld [vmem:[#allocation2 + $0x18] sm:$0xf] }
 0x128   : > { %v4168_v8 = vcombine.low %v1774_v42, %v1784_v31  ;;  %v2172_v14 = vrot.slane %v2171_v50, 4  ;;  %v263_v12 = vsel %vm4620_vm3, 0, %v262_v48  ;;  %4287 = vmatmul.mubr.msk.bf16.vlgmr.msra.gmra.mxu0 %vm3654_vm10, %v3605_v38  ;;  %290 = vst [vmem:[#allocation2 + $0x5c] sm:$0x1] %v289_v58  ;;  %v591_v7 = vshrl.u32 %v346_v60, 16 }
 0x129   : > { %264 = vst [vmem:[#allocation2 + $0xb4] sm:$0x1] %v263_v12  ;;  %v594_v53 = vshll.u32 %v346_v60, 16  ;;  %v599_v17 = vshrl.u32 %v347_v26, 16  ;;  %v470_v34 = vrot.slane %v5924_v46, 4  ;;  %v4184_v33 = vcombine.low %v5979_v54, %v5993_v24  ;;  %v6036_v48 = vpop.permute.xlu1 %2926 }
 0x12a   : > { %3012 = vrot.lane.b32.xlu1 %v4168_v8, %s4541_s4  ;;  %v6015_v44 = vld [vmem:[#allocation2 + $0x58] sm:$0xf]  ;;  %v602_v35 = vshll.u32 %v347_v26, 16  ;;  %v3619_v15 = vsel %vm3601_vm11, %v3586_v0, %v5792_v25  ;;  %v2167_v13 = vsel %vm4674_vm13, %v5982_v30, %v5971_v51  ;;  %v593_v36 = vrot.slane %v591_v7, 7  ;;  %v6030_v42 = vld [vmem:[#allocation2 + $0xac] sm:$0xf] }
 0x12b   : > { %v2192_v28 = vshrl.u32 %v6015_v44, 16  ;;  %v2188_v27 = vshll.u32 %v6015_v44, 16  ;;  %4302 = vmatprep.mubr.msk.bf16.mxu1 %vm3654_vm10, %v3619_v15  ;;  %v2177_v46 = vsel %vm4674_vm13, %v2172_v14, %v2176_v39  ;;  %v2349_v47 = vrot.slane %v2347_v40, 4  ;;  %v6047_v24 = vld [vmem:[#allocation2 + $0x24] sm:$0xf] }
 0x12c   : > { %v2352_v41 = vrot.slane %v2350_v21, 5  ;;  %v6032_v25 = vrot.slane %v599_v17, 7  ;;  %v596_v54 = vor.u32 %v594_v53, %v593_v36  ;;  %v597_v51 = vrot.slane %v593_v36, 4  ;;  %v6049_v39 = vld [vmem:[#allocation2 + $0x28] sm:$0xf] }
 0x12d   : > { %v2020_v0 = vld [vmem:[#allocation2 + $0x54] sm:$0xf]  ;;  %v6034_v23 = vrot.slane %v2188_v27, 5  ;;  %v2194_v20 = vrot.slane %v2192_v28, 4  ;;  %v3588_v40 = vsel %vm3568_vm8, %v5966_v2, %v5766_v32  ;;  %v2360_v21 = vshrl.u32 %v6030_v42, 16 }
 0x12e   : > { %3090 = vrot.lane.b32.xlu1 %v4183_v11, %s4540_s3  ;;  %v2179_v60 = vshrl.u32 %v2020_v0, 16  ;;  %v2182_v30 = vshll.u32 %v2020_v0, 16  ;;  %v4192_v50 = vcombine.low %v2020_v0, %v6015_v44  ;;  %v604_v26 = vor.u32 %v602_v35, %v6032_v25  ;;  %v2446_v38 = vld [vmem:[#allocation2 + $0x48] sm:$0xe]  ;;  %v6053_v8 = vld [vmem:[#allocation2 + $0xb0] sm:$0x1]  ;;  %v6055_v14 = vpop.permute.xlu0 %2992 }
 0x12f   : > { %v4199_v31 = vcombine.low %v5956_v37, %v6030_v42  ;;  %v4207_v32 = vcombine.low %v2167_v13, %v2177_v46  ;;  %v720_v2 = vld [vmem:[#allocation2 + $0x5c] sm:$0x1]  ;;  %v2195_v17 = vor.u32 %v2194_v20, %v6034_v23  ;;  %v2353_v15 = vor.u32 %v2352_v41, %v2349_v47  ;;  %v798_v28 = vld [vmem:[#allocation2 + $0x48] sm:$0xf]  ;;  %v6075_v41 = vpop.permute.xlu1 %2928  ;;  %v2447_v27 = vld [vmem:[#allocation2 + $0x54] sm:$0xe] }
 0x130   : > { %v2181_v58 = vrot.slane %v2179_v60, 4  ;;  %v2184_v12 = vrot.slane %v2182_v30, 5  ;;  %3172 = vrot.lane.b32.xlu0 %v4192_v50, %s4542_s5  ;;  %v605_v37 = vsel %vm4683_vm14, %v597_v51, %v604_v26  ;;  %v772_v7 = vld [vmem:[#allocation2 + $0xb4] sm:$0xf]  ;;  %v721_v53 = vsel %vm4620_vm3, %v470_v34, %v720_v2  ;;  %v6069_v34 = vld [vmem:[#allocation2 + $0x4c] sm:$0xf] }
 0x131   : > { %v773_v35 = vsel %vm4667_vm12, %v596_v54, %v772_v7  ;;  %775 = vst.msk [vmem:[#allocation2 + $0xb8] sm:$0xf] %vm207_vm0, %v605_v37  ;;  %722 = vst [vmem:[#allocation2 + $0x5c] sm:$0x1] %v721_v53  ;;  %v4079_v36 = vrot.slane %v2446_v38, 9  ;;  %v2356_v46 = vshll.u32 %v6030_v42, 16  ;;  %v3621_v47 = vsel %vm3601_vm11, %v3588_v40, %v5871_v57 }
 0x132   : > { %3092 = vrot.lane.b32.xlu1 %v4184_v33, %s4540_s3  ;;  %v2185_v13 = vor.u32 %v2184_v12, %v2181_v58  ;;  %774 = vst [vmem:[#allocation2 + $0xb4] sm:$0xf] %v773_v35  ;;  %v2536_v0 = vrot.slane %v5877_v6, 5  ;;  %v2362_v20 = vrot.slane %v2360_v21, 4  ;;  %v2366_v54 = vshll.u32 %v6053_v8, 16  ;;  %4303 = vmatmul.mubr.msk.bf16.vlgmr.msra.gmra.mxu1 %vm3654_vm10, %v3621_v47  ;;  %v6083_v57 = vpop.permute.xlu0 %3070 }
 0x133   : > { %v2539_v51 = vrot.slane %v5937_v29, 5  ;;  %v2358_v60 = vrot.slane %v2356_v46, 5  ;;  %v6079_v30 = vld [vmem:[#allocation2 + $0x50] sm:$0x1]  ;;  %v982_v50 = vshrl.u32 %v798_v28, 16  ;;  %v2196_v6 = vrot.slane %v2195_v17, 4 }
 0x134   : > { %3250 = vrot.lane.b32.xlu0 %v4207_v32, %s4543_s6  ;;  %v2186_v33 = vrot.slane %v2185_v13, 4  ;;  %v2354_v26 = vrot.slane %v2353_v15, 4  ;;  %v985_v21 = vshll.u32 %v798_v28, 16  ;;  %v991_v38 = vshll.u32 %v6069_v34, 16  ;;  %v312_v58 = vld [vmem:[#allocation2 + $0xbc] sm:$0x1] }
 0x135   : > { %v6088_v40 = vsel %vm4647_vm9, %v4079_v36, %v2536_v0  ;;  %v2363_v29 = vor.u32 %v2362_v20, %v2358_v60  ;;  %v2368_v12 = vrot.slane %v2366_v54, 5  ;;  %v984_v32 = vrot.slane %v982_v50, 4  ;;  %v6104_v50 = vpop.permute.xlu1 %3006 }
 0x136   : > { %3186 = vrot.lane.b32.xlu1 %v4199_v31, %s4542_s5  ;;  %v987_v2 = vrot.slane %v985_v21, 5  ;;  %v993_v37 = vrot.slane %v991_v38, 5  ;;  %v995_v7 = vshrl.u32 %v6069_v34, 16  ;;  %v1001_v53 = vshll.u32 %v6079_v30, 16  ;;  %v6110_v10 = vpop.permute.xlu0 %3072 }
 0x137   : > { %v2191_v17 = vsel %vm4674_vm13, %v2186_v33, %v6034_v23  ;;  %v2538_v31 = vrot.slane %v2536_v0, 4  ;;  %v2364_v15 = vrot.slane %v2363_v29, 4  ;;  %v313_v28 = vsel %vm4628_vm5, 0, %v312_v58 }
 0x138   : > { %v6095_v35 = vld [vmem:[#allocation2 + $0xb8] sm:$0xf]  ;;  %v6099_v13 = vld [vmem:[#allocation2 + $0x5c] sm:$0x1]  ;;  %v2359_v20 = vsel %vm4674_vm13, %v2354_v26, %v2358_v60  ;;  %v988_v54 = vor.u32 %v987_v2, %v984_v32  ;;  %v997_v47 = vrot.slane %v995_v7, 4  ;;  %v1003_v11 = vrot.slane %v1001_v53, 5 }
 0x139   : > { %v2036_v36 = vld [vmem:[#allocation2 + $0xb4] sm:$0xf]  ;;  %v2384_v46 = vshrl.u32 %v6095_v35, 16  ;;  %314 = vst [vmem:[#allocation2 + $0xbc] sm:$0x1] %v313_v28  ;;  %v2198_v23 = vshll.u32 %v6099_v13, 16  ;;  %v2369_v38 = vsel %vm4674_vm13, %v2364_v15, %v2368_v12  ;;  %v2540_v7 = vsel %vm4647_vm9, %v2538_v31, %v2539_v51 }
 0x13a   : > { %v2371_v0 = vshrl.u32 %v2036_v36, 16  ;;  %v2374_v33 = vshll.u32 %v2036_v36, 16  ;;  %v4200_v21 = vcombine.low %v2036_v36, %v6095_v35  ;;  %v989_v58 = vrot.slane %v988_v54, 4  ;;  %v6125_v31 = vld [vmem:[#allocation2 + $0xa8] sm:$0xe] }
 0x13b   : > { %v998_v29 = vor.u32 %v997_v47, %v993_v37  ;;  %v2200_v60 = vrot.slane %v2198_v23, 5  ;;  %v4215_v2 = vcombine.low %v2359_v20, %v2369_v38  ;;  %v2380_v12 = vshll.u32 %v6095_v35, 16 }
 0x13c   : > { %v2373_v26 = vrot.slane %v2371_v0, 4  ;;  %v2376_v32 = vrot.slane %v2374_v33, 5  ;;  %3188 = vrot.lane.b32.xlu1 %v4200_v21, %s4542_s5  ;;  %v994_v28 = vsel %vm4674_vm13, %v989_v58, %v993_v37  ;;  %v2386_v54 = vrot.slane %v2384_v46, 4  ;;  %v6127_v37 = vpop.permute.xlu1 %3008  ;;  %v800_v46 = vld [vmem:[#allocation2 + $0x54] sm:$0xf] }
 0x13d   : > { %v999_v36 = vrot.slane %v998_v29, 4  ;;  %v2201_v53 = vsel %vm4674_vm13, %v2196_v6, %v2200_v60  ;;  %v4080_v47 = vrot.slane %v2447_v27, 9  ;;  %v6122_v20 = vrot.slane %v2380_v12, 5  ;;  %v6143_v21 = vld [vmem:[#allocation2 + $0x7c] sm:$0xf]  ;;  %v6152_v29 = vpop.permute.xlu0 %3166 }
 0x13e   : > { %v2377_v15 = vor.u32 %v2376_v32, %v2373_v26  ;;  %v4208_v23 = vcombine.low %v2191_v17, %v2201_v53  ;;  %v2543_v51 = vrot.slane %v6015_v44, 5  ;;  %v6852_v33 = vcombine.low %v6005_v22, %v6007_v63  ;;  %v6141_v44 = vld [vmem:[#allocation2 + $0x78] sm:$0xf]  ;;  %6854 = vst [vmem:[#allocation6_spill] sm:$0xff] %v6152_v29 }
 0x13f   : > { %v1004_v0 = vsel %vm4674_vm13, %v999_v36, %v1003_v11  ;;  %v2546_v11 = vrot.slane %v6099_v13, 5  ;;  %v6853_v63 = vrot.slane %v6032_v25, 4  ;;  %v6855_v13 = vcombine.low %v6047_v24, %v6049_v39  ;;  %v6163_v25 = vld [vmem:[#allocation2 + $0x58] sm:$0xf] }
 0x140   : > { %v6134_v6 = vsel %vm3354_vm15, %v6852_v33, %v5740_v18  ;;  %3266 = vrot.lane.b32.xlu1 %v4215_v2, %s4543_s6  ;;  %v776_v27 = vld [vmem:[#allocation2 + $0xbc] sm:$0x1]  ;;  %v6137_v17 = vrot.slane %v2377_v15, 4  ;;  %3252 = vrot.lane.b32.xlu0 %v4208_v23, %s4543_s6  ;;  %v4223_v18 = vcombine.low %v6088_v40, %v2540_v7  ;;  %v2545_v58 = vrot.slane %v2543_v51, 4  ;;  %v6186_v33 = vld [vmem:[#allocation2 + $0xb0] sm:$0x1] }
 0x141   : > { %v777_v38 = vsel %vm4620_vm3, %v6853_v63, %v776_v27  ;;  %v6159_v60 = vsel %vm3354_vm15, %v6855_v13, %v5802_v9  ;;  %v4113_v32 = vcombine.low %v994_v28, %v1004_v0  ;;  %v2387_v40 = vor.u32 %v2386_v54, %v6122_v20  ;;  %v6165_v2 = vld [vmem:[#allocation2 + $0x5c] sm:$0x1]  ;;  %v814_v9 = vld [vmem:[#allocation2 + $0xa8] sm:$0xf]  ;;  %v6182_v0 = vld [vmem:[#allocation2 + $0xac] sm:$0xf]  ;;  %v6188_v63 = vpop.permute.xlu0 %3168 }
 0x142   : > { %778 = vst [vmem:[#allocation2 + $0xbc] sm:$0x1] %v777_v38  ;;  %v2544_v7 = vsel %vm4647_vm9, %v4080_v47, %v2543_v51  ;;  %v4087_v36 = vrot.slane %v6125_v31, 9  ;;  %v2592_v24 = vrot.slane %v6030_v42, 5  ;;  %v1006_v39 = vshrl.u32 %v800_v46, 16  ;;  %v6184_v51 = vpop.permute.xlu1 %3086  ;;  %6857 = vst [vmem:[#allocation7_spill] sm:$0xff] %v6188_v63 }
 0x143   : > { %v2383_v28 = vsel %vm4674_vm13, %v6137_v17, %v6122_v20  ;;  %v2547_v12 = vsel %vm4647_vm9, %v2545_v58, %v2546_v11  ;;  %v2595_v53 = vrot.slane %v6053_v8, 5  ;;  %v1009_v15 = vshll.u32 %v800_v46, 16  ;;  %6856 = vst [vmem:[#allocation8_spill] sm:$0xff] %v6184_v51 }
 0x144   : > { %3330 = vrot.lane.b32.xlu0 %v4223_v18, %s4544_s7  ;;  %v1008_v54 = vrot.slane %v1006_v39, 4  ;;  %v1015_v47 = vshll.u32 %v6163_v25, 16  ;;  %v1019_v42 = vshrl.u32 %v6163_v25, 16  ;;  %v1025_v23 = vshll.u32 %v6165_v2, 16 }
 0x145   : > { %v2388_v20 = vrot.slane %v2387_v40, 4  ;;  %v1011_v31 = vrot.slane %v1009_v15, 5  ;;  %v1174_v27 = vshrl.u32 %v814_v9, 16  ;;  %v1177_v8 = vshll.u32 %v814_v9, 16 }
 0x146   : > { %v4224_v17 = vcombine.low %v2544_v7, %v2547_v12  ;;  %v2594_v11 = vrot.slane %v2592_v24, 4  ;;  %v1017_v46 = vrot.slane %v1015_v47, 5  ;;  %v1021_v18 = vrot.slane %v1019_v42, 4 }
 0x147   : > { %v1012_v38 = vor.u32 %v1011_v31, %v1008_v54  ;;  %v1176_v58 = vrot.slane %v1174_v27, 4  ;;  %v1179_v13 = vrot.slane %v1177_v8, 5  ;;  %v1183_v39 = vshll.u32 %v6182_v0, 16  ;;  %v1227_v54 = vld [vmem:[#allocation2 + $0x48] sm:$0xe] }
 0x148   : > { %2742 = vrot.lane.b32.xlu0 %v4113_v32, %s4538_s29  ;;  %v1022_v40 = vor.u32 %v1021_v18, %v1017_v46  ;;  %v1027_v15 = vrot.slane %v1025_v23, 5  ;;  %v1187_v22 = vshrl.u32 %v6182_v0, 16  ;;  %v1193_v7 = vshll.u32 %v6186_v33, 16  ;;  %v6201_v18 = vpop.permute.xlu1 %3088 }
 0x149   : > { %v6192_v26 = vld [vmem:[#allocation2 + $0xbc] sm:$0x1]  ;;  %v1013_v12 = vrot.slane %v1012_v38, 4  ;;  %v1180_v47 = vor.u32 %v1179_v13, %v1176_v58  ;;  %v1185_v42 = vrot.slane %v1183_v39, 5  ;;  %v2593_v31 = vsel %vm4647_vm9, %v4087_v36, %v2592_v24 }
 0x14a   : > { %v2390_v9 = vshll.u32 %v6192_v26, 16  ;;  %v2596_v32 = vsel %vm4647_vm9, %v2594_v11, %v2595_v53  ;;  %v1023_v27 = vrot.slane %v1022_v40, 4  ;;  %v1189_v8 = vrot.slane %v1187_v22, 4  ;;  %v2455_v53 = vld [vmem:[#allocation2 + $0xb4] sm:$0xe]  ;;  %v6209_v11 = vpop.permute.xlu0 %3246 }
 0x14b   : > { %v1018_v63 = vsel %vm4674_vm13, %v1013_v12, %v1017_v46  ;;  %v1181_v51 = vrot.slane %v1180_v47, 4  ;;  %v1195_v29 = vrot.slane %v1193_v7, 5  ;;  %v4049_v36 = vrot.slane %v1227_v54, 9  ;;  %v1228_v40 = vld [vmem:[#allocation2 + $0x54] sm:$0xe] }
 0x14c   : > { %v2392_v23 = vrot.slane %v2390_v9, 5  ;;  %3332 = vrot.lane.b32.xlu0 %v4224_v17, %s4544_s7  ;;  %v1028_v38 = vsel %vm4674_vm13, %v1023_v27, %v1027_v15  ;;  %v1190_v58 = vor.u32 %v1189_v8, %v1185_v42  ;;  %v1332_v24 = vrot.slane %v6069_v34, 5  ;;  %v6235_v54 = vld [vmem:[#allocation2 + $0xb8] sm:$0xf] }
 0x14d   : > { %v6858_v22 = vcombine.low %v6141_v44, %v6143_v21  ;;  %v4114_v13 = vcombine.low %v1018_v63, %v1028_v38  ;;  %v1186_v39 = vsel %vm4674_vm13, %v1181_v51, %v1185_v42  ;;  %v4231_v12 = vcombine.low %v2593_v31, %v2596_v32  ;;  %v816_v21 = vld [vmem:[#allocation2 + $0xb4] sm:$0xf]  ;;  %v4441_v31 = vld [vmem:[#allocation2 + $0x88] sm:$0xf]  ;;  %v6239_v38 = vld [vmem:[#allocation2 + $0xbc] sm:$0x1] }
 0x14e   : > { %v2393_v17 = vsel %vm4674_vm13, %v2388_v20, %v2392_v23  ;;  %v1191_v34 = vrot.slane %v1190_v58, 4  ;;  %v1333_v7 = vsel %vm4647_vm9, %v4049_v36, %v1332_v24  ;;  %v1334_v9 = vrot.slane %v1332_v24, 4 }
 0x14f   : > { %v6216_v46 = vsel %vm3354_vm15, %v6858_v22, %v5836_v56  ;;  %v4216_v15 = vcombine.low %v2383_v28, %v2393_v17  ;;  %v4088_v47 = vrot.slane %v2455_v53, 9  ;;  %v2599_v44 = vrot.slane %v6095_v35, 5  ;;  %v6237_v35 = vpop.permute.xlu1 %3182 }
 0x150   : > { %v2602_v56 = vrot.slane %v6192_v26, 5  ;;  %2744 = vrot.lane.b32.xlu0 %v4114_v13, %s4538_s29  ;;  %v1196_v51 = vsel %vm4674_vm13, %v1191_v34, %v1195_v29  ;;  %v6859_v28 = vrot.slane %v6079_v30, 5  ;;  %v4050_v63 = vrot.slane %v1228_v40, 9  ;;  %v4440_v26 = vld [vmem:[#allocation2 + $0x84] sm:$0xf] }
 0x151   : > { %3268 = vrot.lane.b32.xlu1 %v4216_v15, %s4543_s6  ;;  %v1339_v42 = vrot.slane %v6163_v25, 5  ;;  %v4102_v32 = vcombine.low %v4440_v26, %v4441_v31  ;;  %v4121_v27 = vcombine.low %v1186_v39, %v1196_v51  ;;  %v2601_v23 = vrot.slane %v2599_v44, 4  ;;  %v6244_v25 = vpop.permute.xlu0 %3248  ;;  %v1413_v13 = vld [vmem:[#allocation2 + $0x54] sm:$0xf]  ;;  %v1235_v34 = vld [vmem:[#allocation2 + $0xa8] sm:$0xe] }
 0x152   : > { %v1336_v20 = vsel %vm4647_vm9, %v1334_v9, %v6859_v28  ;;  %v1342_v58 = vrot.slane %v6165_v2, 5  ;;  %v1198_v36 = vshrl.u32 %v816_v21, 16  ;;  %v2600_v24 = vsel %vm4647_vm9, %v4088_v47, %v2599_v44 }
 0x153   : > { %v4129_v8 = vcombine.low %v1333_v7, %v1336_v20  ;;  %v1340_v30 = vsel %vm4647_vm9, %v4050_v63, %v1339_v42  ;;  %v1341_v29 = vrot.slane %v1339_v42, 4  ;;  %v1201_v53 = vshll.u32 %v816_v21, 16  ;;  %v6257_v21 = vld [vmem:[#allocation2 + $0x58] sm:$0xf]  ;;  %v6266_v20 = vpop.permute.xlu1 %3184 }
 0x154   : > { %v1207_v22 = vshll.u32 %v6235_v54, 16  ;;  %v1211_v17 = vshrl.u32 %v6235_v54, 16  ;;  %v2603_v39 = vsel %vm4647_vm9, %v2601_v23, %v2602_v56  ;;  %v1200_v40 = vrot.slane %v1198_v36, 4  ;;  %v6278_v36 = vld [vmem:[#allocation2 + $0x64] sm:$0xf] }
 0x155   : > { %3346 = vrot.lane.b32.xlu1 %v4231_v12, %s4544_s7  ;;  %2822 = vrot.lane.b32.xlu0 %v4129_v8, %s4537_s28  ;;  %v1343_v2 = vsel %vm4647_vm9, %v1341_v29, %v1342_v58  ;;  %v1217_v15 = vshll.u32 %v6239_v38, 16  ;;  %v1203_v9 = vrot.slane %v1201_v53, 5  ;;  %v3409_v12 = vsel %vm3403_vm1, %v6134_v6, %v5848_v43  ;;  %v1415_v8 = vld [vmem:[#allocation2 + $0x60] sm:$0xf] }
 0x156   : > { %v4130_v7 = vcombine.low %v1340_v30, %v1343_v2  ;;  %v1209_v47 = vrot.slane %v1207_v22, 5  ;;  %v1213_v44 = vrot.slane %v1211_v17, 4  ;;  %v3411_v56 = vsel %vm3403_vm1, %v6159_v60, %v5879_v5  ;;  %v6272_v60 = vpop.permute.xlu0 %3326  ;;  %v1236_v17 = vld [vmem:[#allocation2 + $0xb4] sm:$0xe] }
 0x157   : > { %v1391_v51 = vrot.slane %v6186_v33, 5  ;;  %v1594_v28 = vshrl.u32 %v1413_v13, 16  ;;  %v1204_v63 = vor.u32 %v1203_v9, %v1200_v40  ;;  %v1219_v26 = vrot.slane %v1217_v15, 5  ;;  %v6292_v15 = vpop.permute.xlu1 %3262 }
 0x158   : > { %v1214_v42 = vor.u32 %v1213_v44, %v1209_v47  ;;  %v1597_v31 = vshll.u32 %v1413_v13, 16  ;;  %v4232_v23 = vcombine.low %v2600_v24, %v2603_v39  ;;  %v4145_v43 = vcombine.low %v1413_v13, %v6257_v21  ;;  %v6304_v44 = vld [vmem:[#allocation2 + $0x5c] sm:$0x1] }
 0x159   : > { %2758 = vrot.lane.b32.xlu1 %v4121_v27, %s4538_s29  ;;  %2824 = vrot.lane.b32.xlu0 %v4130_v7, %s4537_s28  ;;  %v4057_v6 = vrot.slane %v1235_v34, 9  ;;  %v1388_v5 = vrot.slane %v6182_v0, 5  ;;  %v3390_v33 = vsel %vm3354_vm15, %v4102_v32, %v5914_v49  ;;  %v3442_v30 = vsel %vm3436_vm2, %v3409_v12, %v5922_v61  ;;  %v6306_v12 = vld [vmem:[#allocation2 + $0xb4] sm:$0xf] }
 0x15a   : > { %v1205_v29 = vrot.slane %v1204_v63, 4  ;;  %v1215_v58 = vrot.slane %v1214_v42, 4  ;;  %v1596_v27 = vrot.slane %v1594_v28, 4  ;;  %v1599_v24 = vrot.slane %v1597_v31, 5  ;;  %v6313_v31 = vld [vmem:[#allocation2 + $0xb8] sm:$0xf] }
 0x15b   : > { %v1390_v53 = vrot.slane %v1388_v5, 4  ;;  %v1618_v22 = vshrl.u32 %v1415_v8, 16  ;;  %v1607_v49 = vshrl.u32 %v6257_v21, 16  ;;  %v1389_v61 = vsel %vm4647_vm9, %v4057_v6, %v1388_v5 }
 0x15c   : > { %v1210_v0 = vsel %vm4674_vm13, %v1205_v29, %v1209_v47  ;;  %v1220_v13 = vsel %vm4674_vm13, %v1215_v58, %v1219_v26  ;;  %v1621_v2 = vshll.u32 %v1415_v8, 16  ;;  %v4146_v40 = vcombine.low %v1415_v8, %v6278_v36  ;;  %v6310_v26 = vpop.permute.xlu0 %2738  ;;  %v6327_v58 = vld [vmem:[#allocation2 + $0x68] sm:$0x1] }
 0x15d   : > { %3348 = vrot.lane.b32.xlu1 %v4232_v23, %s4544_s7  ;;  %v4122_v32 = vcombine.low %v1210_v0, %v1220_v13  ;;  %2918 = vrot.lane.b32.xlu0 %v4145_v43, %s4539_s30  ;;  %v1392_v39 = vsel %vm4647_vm9, %v1390_v53, %v1391_v51  ;;  %v6297_v34 = vsel %vm3403_vm1, %v6216_v46, %v5947_v4  ;;  %v4058_v9 = vrot.slane %v1236_v17, 9 }
 0x15e   : > { %v6301_v7 = vsel %vm3436_vm2, %v3411_v56, %v5958_v19  ;;  %v1395_v47 = vrot.slane %v6235_v54, 5  ;;  %v1620_v51 = vrot.slane %v1618_v22, 4  ;;  %v1631_v28 = vshrl.u32 %v6278_v36, 16  ;;  %v348_v22 = vld [vmem:[%s4654_s27 + $0x78] sm:$0xf]  ;;  %v6338_v17 = vpop.permute.xlu1 %3264 }
 0x15f   : > { %v1398_v63 = vrot.slane %v6239_v38, 5  ;;  %v1600_v42 = vor.u32 %v1599_v24, %v1596_v27  ;;  %v4137_v4 = vcombine.low %v1389_v61, %v1392_v39  ;;  %v1603_v19 = vshll.u32 %v6257_v21, 16 }
 0x160   : > { %v1397_v46 = vrot.slane %v1395_v47, 4  ;;  %v1609_v56 = vrot.slane %v1607_v49, 4  ;;  %v1623_v54 = vrot.slane %v1621_v2, 5  ;;  %v1396_v8 = vsel %vm4647_vm9, %v4058_v9, %v1395_v47 }
 0x161   : > { %2760 = vrot.lane.b32.xlu1 %v4122_v32, %s4538_s29  ;;  %2920 = vrot.lane.b32.xlu0 %v4146_v40, %s4539_s30  ;;  %v1613_v38 = vshll.u32 %v6304_v44, 16  ;;  %v1786_v23 = vshrl.u32 %v6306_v12, 16  ;;  %v6323_v43 = vsel %vm3403_vm1, %v3390_v33, %v5998_v62  ;;  %v1601_v5 = vrot.slane %v1600_v42, 4  ;;  %v265_v33 = vld [vmem:[#allocation2 + $0xc0] sm:$0x1]  ;;  %v6346_v40 = vpop.permute.xlu0 %3328  ;;  %s3933_s29 = sshll.u32 %s6688_s26, 4  ;;  %s6776_s29 = int_to_ptr.vmem [resolvable:$true] %s3933_s29 }
 0x162   : > { %v1399_v6 = vsel %vm4647_vm9, %v1397_v46, %v1398_v63  ;;  %v1605_v29 = vrot.slane %v1603_v19, 5  ;;  %v6331_v27 = vsel %vm3469_vm4, %v3442_v30, %v6011_v55  ;;  %v1789_v24 = vshll.u32 %v6306_v12, 16  ;;  %v349_v32 = vld [vmem:[%s4654_s27 + $0x7c] sm:$0xf]  ;;  %v1839_v19 = vld [vmem:[#allocation2 + $0x54] sm:$0xe] }
 0x163   : > { %v1799_v53 = vshrl.u32 %v6313_v31, 16  ;;  %v4153_v62 = vcombine.low %v6306_v12, %v6313_v31  ;;  %v4138_v0 = vcombine.low %v1396_v8, %v1399_v6  ;;  %v1615_v49 = vrot.slane %v1613_v38, 5  ;;  %s4260_s27 = sshll.u32 %s4526_s12, 12  ;;  %s6781_s12 = scalar_lea.sflag [#allocation4], %s183_s24 }
 0x164   : > { %v1610_v13 = vor.u32 %v1609_v56, %v1605_v29  ;;  %v6340_v61 = vrot.slane %v1786_v23, 4  ;;  %v1624_v55 = vor.u32 %v1623_v54, %v1620_v51  ;;  %v1627_v30 = vshll.u32 %v6278_v36, 16 }
 0x165   : > { %2838 = vrot.lane.b32.xlu1 %v4137_v4, %s4537_s28  ;;  %v1633_v39 = vrot.slane %v1631_v28, 4  ;;  %v1637_v2 = vshll.u32 %v6327_v58, 16  ;;  %v1606_v9 = vsel %vm4674_vm13, %v1601_v5, %v1605_v29  ;;  %v266_v12 = vsel %vm4620_vm3, 0, %v265_v33  ;;  %v6357_v29 = vpop.permute.xlu1 %3342 }
 0x166   : > { %v1611_v47 = vrot.slane %v1610_v13, 4  ;;  %v608_v63 = vshrl.u32 %v348_v22, 16  ;;  %v1625_v42 = vrot.slane %v1624_v55, 4  ;;  %v1629_v46 = vrot.slane %v1627_v30, 5  ;;  %267 = vst [vmem:[#allocation2 + $0xc0] sm:$0x1] %v266_v12 }
 0x167   : > { %v611_v4 = vshll.u32 %v348_v22, 16  ;;  %v616_v51 = vshrl.u32 %v349_v32, 16  ;;  %v1791_v56 = vrot.slane %v1789_v24, 5  ;;  %v619_v8 = vshll.u32 %v349_v32, 16  ;;  %v6367_v30 = vld [vmem:[#allocation2 + $0xbc] sm:$0x1] }
 0x168   : > { %v1616_v28 = vsel %vm4674_vm13, %v1611_v47, %v1615_v49  ;;  %v610_v54 = vrot.slane %v608_v63, 7  ;;  %v1634_v23 = vor.u32 %v1633_v39, %v1629_v46  ;;  %v1639_v6 = vrot.slane %v1637_v2, 5  ;;  %v6369_v39 = vpop.permute.xlu0 %2740 }
 0x169   : > { %2840 = vrot.lane.b32.xlu1 %v4138_v0, %s4537_s28  ;;  %v4161_v38 = vcombine.low %v1606_v9, %v1616_v28  ;;  %v6355_v5 = vrot.slane %v616_v51, 7  ;;  %v3458_v33 = vsel %vm3436_vm2, %v6297_v34, %v6036_v48  ;;  %v1630_v22 = vsel %vm4674_vm13, %v1625_v42, %v1629_v46  ;;  %v315_v42 = vld [vmem:[#allocation2 + $0xc8] sm:$0x1] }
 0x16a   : > { %v614_v13 = vrot.slane %v610_v54, 4  ;;  %v4065_v24 = vrot.slane %v1839_v19, 9  ;;  %v1635_v49 = vrot.slane %v1634_v23, 4  ;;  %v613_v0 = vor.u32 %v611_v4, %v610_v54  ;;  %v1840_v4 = vld [vmem:[#allocation2 + $0x60] sm:$0xe] }
 0x16b   : > { %2998 = vrot.lane.b32.xlu0 %v4161_v38, %s4541_s4  ;;  %v621_v32 = vor.u32 %v619_v8, %v6355_v5  ;;  %v1941_v55 = vrot.slane %v6257_v21, 5  ;;  %v1944_v2 = vrot.slane %v6304_v44, 5  ;;  %v1792_v48 = vor.u32 %v1791_v56, %v6340_v61  ;;  %v6401_v54 = vld [vmem:[#allocation2 + $0x60] sm:$0xf] }
 0x16c   : > { %v1795_v34 = vshll.u32 %v6313_v31, 16  ;;  %v1801_v9 = vrot.slane %v1799_v53, 4  ;;  %v1640_v47 = vsel %vm4674_vm13, %v1635_v49, %v1639_v6  ;;  %v3477_v44 = vsel %vm3469_vm4, %v6301_v7, %v6055_v14  ;;  %v6396_v7 = vpop.permute.xlu1 %2754  ;;  %v6407_v38 = vpop.permute.xlu0 %2818 }
 0x16d   : > { %2934 = vrot.lane.b32.xlu1 %v4153_v62, %s4539_s30  ;;  %v622_v12 = vsel %vm4683_vm14, %v614_v13, %v621_v32  ;;  %v1942_v21 = vsel %vm4647_vm9, %v4065_v24, %v1941_v55  ;;  %v1943_v63 = vrot.slane %v1941_v55, 4  ;;  %v4162_v61 = vcombine.low %v1630_v22, %v1640_v47  ;;  %v779_v46 = vld [vmem:[#allocation2 + $0xc0] sm:$0xf]  ;;  %v6860_v22 = vld [vmem:[#allocation6_spill] sm:$0xff]  ;;  %v6861_v24 = vld [vmem:[#allocation8_spill] sm:$0xff] }
 0x16e   : > { %782 = vst.msk [vmem:[#allocation2 + $0xc4] sm:$0xf] %vm207_vm0, %v622_v12  ;;  %v1797_v53 = vrot.slane %v1795_v34, 5  ;;  %v1805_v62 = vshll.u32 %v6367_v30, 16  ;;  %v3460_v59 = vsel %vm3436_vm2, %v6323_v43, %v6075_v41  ;;  %v3508_v51 = vsel %vm3502_vm6, %v6331_v27, %v6083_v57  ;;  %v6426_v55 = vld [vmem:[#allocation2 + $0x64] sm:$0xf] }
 0x16f   : > { %v780_v19 = vsel %vm4667_vm12, %v613_v0, %v779_v46  ;;  %v1945_v14 = vsel %vm4647_vm9, %v1943_v63, %v1944_v2  ;;  %v3491_v28 = vsel %vm3469_vm4, %v3458_v33, %v6104_v50  ;;  %3000 = vrot.lane.b32.xlu0 %v4162_v61, %s4541_s4  ;;  %v1793_v41 = vrot.slane %v1792_v48, 4  ;;  %v6862_v0 = vld [vmem:[#allocation7_spill] sm:$0xff]  ;;  %v1847_v2 = vld [vmem:[#allocation2 + $0xb4] sm:$0xe] }
 0x170   : > { %781 = vst [vmem:[#allocation2 + $0xc0] sm:$0xf] %v780_v19  ;;  %v4177_v56 = vcombine.low %v1942_v21, %v1945_v14  ;;  %v1802_v43 = vor.u32 %v1801_v9, %v1797_v53  ;;  %v4066_v57 = vrot.slane %v1840_v4, 9  ;;  %v1948_v45 = vrot.slane %v6278_v36, 5  ;;  %v6437_v12 = vpop.permute.xlu1 %3344  ;;  %v6447_v4 = vpop.permute.xlu0 %2820 }
 0x171   : > { %v1951_v27 = vrot.slane %v6327_v58, 5  ;;  %v316_v8 = vsel %vm4628_vm5, 0, %v315_v42  ;;  %v3510_v50 = vsel %vm3502_vm6, %v3477_v44, %v6110_v10  ;;  %v3493_v23 = vsel %vm3469_vm4, %v3460_v59, %v6127_v37 }
 0x172   : > { %v1803_v6 = vrot.slane %v1802_v43, 4  ;;  %v1807_v33 = vrot.slane %v1805_v62, 5  ;;  %317 = vst [vmem:[#allocation2 + $0xc8] sm:$0x1] %v316_v8  ;;  %v3541_v13 = vsel %vm3535_vm7, %v3508_v51, %v6860_v22  ;;  %v1949_v36 = vsel %vm4647_vm9, %v4066_v57, %v1948_v45  ;;  %v2024_v62 = vld [vmem:[#allocation2 + $0x6c] sm:$0xf] }
 0x173   : > { %v1950_v58 = vrot.slane %v1948_v45, 4  ;;  %v2203_v3 = vshrl.u32 %v6401_v54, 16  ;;  %v3524_v49 = vsel %vm3502_vm6, %v3491_v28, %v6861_v24  ;;  %v623_v10 = vrot.slane %v6355_v5, 4  ;;  %3078 = vrot.lane.b32.xlu0 %v4177_v56, %s4540_s3  ;;  %v6452_v28 = vld [vmem:[#allocation2 + $0x70] sm:$0xf] }
 0x174   : > { %v3543_v37 = vsel %vm3535_vm7, %v3510_v50, %v6862_v0  ;;  %v3526_v32 = vsel %vm3502_vm6, %v3493_v23, %v6201_v18  ;;  %v1798_v34 = vsel %vm4674_vm13, %v1793_v41, %v1797_v53  ;;  %v3574_v9 = vsel %vm3568_vm8, %v3541_v13, %v6209_v11 }
 0x175   : > { %v6428_v48 = vld [vmem:[#allocation2 + $0xc4] sm:$0xf]  ;;  %v1952_v5 = vsel %vm4647_vm9, %v1950_v58, %v1951_v27  ;;  %v2206_v47 = vshll.u32 %v6401_v54, 16  ;;  %v1808_v21 = vsel %vm4674_vm13, %v1803_v6, %v1807_v33  ;;  %v2205_v61 = vrot.slane %v2203_v3, 4  ;;  %v6465_v33 = vpop.permute.xlu1 %2756  ;;  %v6470_v58 = vld [vmem:[#allocation2 + $0x68] sm:$0x1] }
 0x176   : > { %v1823_v18 = vshrl.u32 %v6428_v48, 16  ;;  %v4178_v63 = vcombine.low %v1949_v36, %v1952_v5  ;;  %v1819_v42 = vshll.u32 %v6428_v48, 16  ;;  %v4193_v11 = vcombine.low %v6401_v54, %v6426_v55 }
 0x177   : > { %v1431_v44 = vld [vmem:[#allocation2 + $0xc0] sm:$0xf]  ;;  %v4073_v46 = vrot.slane %v1847_v2, 9  ;;  %v3607_v53 = vsel %vm3601_vm11, %v3574_v9, %v6272_v60  ;;  %v1997_v14 = vrot.slane %v6313_v31, 5  ;;  %v4169_v56 = vcombine.low %v1798_v34, %v1808_v21 }
 0x178   : > { %v1810_v59 = vshrl.u32 %v1431_v44, 16  ;;  %v1813_v51 = vshll.u32 %v1431_v44, 16  ;;  %v4154_v19 = vcombine.low %v1431_v44, %v6428_v48  ;;  %3080 = vrot.lane.b32.xlu0 %v4178_v63, %s4540_s3  ;;  %4290 = vmatprep.mubr.msk.bf16.mxu0 %vm3654_vm10, %v3607_v53  ;;  %v6455_v43 = vrot.slane %v1819_v42, 5 }
 0x179   : > { %v783_v41 = vld [vmem:[#allocation2 + $0xc8] sm:$0x1]  ;;  %v1825_v60 = vrot.slane %v1823_v18, 4  ;;  %v2208_v54 = vrot.slane %v2206_v47, 5  ;;  %v2227_v8 = vshrl.u32 %v2024_v62, 16  ;;  %v3557_v31 = vsel %vm3535_vm7, %v3524_v49, %v6237_v35  ;;  %v6478_v49 = vpop.permute.xlu0 %2914 }
 0x17a   : > { %v1812_v57 = vrot.slane %v1810_v59, 4  ;;  %v1815_v45 = vrot.slane %v1813_v51, 5  ;;  %2936 = vrot.lane.b32.xlu1 %v4154_v19, %s4539_s30  ;;  %v784_v27 = vsel %vm4620_vm3, %v623_v10, %v783_v41  ;;  %v3576_v50 = vsel %vm3568_vm8, %v3543_v37, %v6244_v25  ;;  %v1848_v37 = vld [vmem:[#allocation2 + $0xc0] sm:$0xe]  ;;  %v6511_v41 = vld [vmem:[#allocation2 + $0xcc] sm:$0xf] }
 0x17b   : > { %785 = vst [vmem:[#allocation2 + $0xc8] sm:$0x1] %v784_v27  ;;  %v2216_v23 = vshrl.u32 %v6426_v55, 16  ;;  %v2230_v6 = vshll.u32 %v2024_v62, 16  ;;  %v1999_v13 = vrot.slane %v1997_v14, 4  ;;  %v2000_v1 = vrot.slane %v6367_v30, 5 }
 0x17c   : > { %v1816_v22 = vor.u32 %v1815_v45, %v1812_v57  ;;  %3174 = vrot.lane.b32.xlu0 %v4193_v11, %s4542_s5  ;;  %v4194_v36 = vcombine.low %v2024_v62, %v6452_v28  ;;  %v1826_v35 = vor.u32 %v1825_v60, %v6455_v43  ;;  %v6475_v25 = vsel %vm3535_vm7, %v3526_v32, %v6266_v20  ;;  %v6499_v11 = vpop.permute.xlu1 %2834  ;;  %v6506_v51 = vld [vmem:[#allocation2 + $0xc0] sm:$0xf] }
 0x17d   : > { %v2004_v3 = vrot.slane %v6428_v48, 5  ;;  %v2209_v24 = vor.u32 %v2208_v54, %v2205_v61  ;;  %v6483_v30 = vsel %vm4647_vm9, %v4073_v46, %v1997_v14  ;;  %v2229_v0 = vrot.slane %v2227_v8, 4  ;;  %v6497_v61 = vld [vmem:[#allocation2 + $0x74] sm:$0x1]  ;;  %v6513_v60 = vpop.permute.xlu0 %2916  ;;  %v6515_v54 = vld [vmem:[#allocation2 + $0xc4] sm:$0xf] }
 0x17e   : > { %3014 = vrot.lane.b32.xlu1 %v4169_v56, %s4541_s4  ;;  %v1817_v10 = vrot.slane %v1816_v22, 4  ;;  %v2212_v2 = vshll.u32 %v6426_v55, 16  ;;  %v2232_v34 = vrot.slane %v2230_v6, 5  ;;  %v2218_v20 = vrot.slane %v2216_v23, 4 }
 0x17f   : > { %v2210_v9 = vrot.slane %v2209_v24, 4  ;;  %v2222_v32 = vshll.u32 %v6470_v58, 16  ;;  %v6489_v48 = vsel %vm4647_vm9, %v1999_v13, %v2000_v1  ;;  %v3590_v5 = vsel %vm3568_vm8, %v3557_v31, %v6292_v15 }
 0x180   : > { %v2240_v47 = vshrl.u32 %v6452_v28, 16  ;;  %3176 = vrot.lane.b32.xlu0 %v4194_v36, %s4542_s5  ;;  %v2214_v18 = vrot.slane %v2212_v2, 5  ;;  %v1827_v21 = vrot.slane %v1826_v35, 4  ;;  %v4074_v63 = vrot.slane %v1848_v37, 9 }
 0x181   : > { %v2006_v42 = vrot.slane %v2004_v3, 4  ;;  %v3609_v44 = vsel %vm3601_vm11, %v3576_v50, %v6346_v40  ;;  %v1822_v15 = vsel %vm4674_vm13, %v1817_v10, %v6455_v43  ;;  %v2224_v59 = vrot.slane %v2222_v32, 5  ;;  %v2448_v10 = vld [vmem:[#allocation2 + $0x60] sm:$0xe] }
 0x182   : > { %v1448_v46 = vld [vmem:[#allocation2 + $0xc8] sm:$0x1]  ;;  %v2215_v53 = vsel %vm4674_vm13, %v2210_v9, %v2214_v18  ;;  %v2219_v62 = vor.u32 %v2218_v20, %v2214_v18  ;;  %4291 = vmatmul.mubr.msk.bf16.gmra.mxu0 %vm3654_vm10, %v3609_v44  ;;  %v3623_v14 = vsel %vm3601_vm11, %v3590_v5, %v6357_v29  ;;  %v2233_v56 = vor.u32 %v2232_v34, %v2229_v0  ;;  %v6532_v0 = vpop.permute.xlu1 %2836 }
 0x183   : > { %v1829_v19 = vshll.u32 %v1448_v46, 16  ;;  %v2007_v40 = vrot.slane %v1448_v46, 5  ;;  %v2236_v57 = vshll.u32 %v6452_v28, 16  ;;  %v2242_v45 = vrot.slane %v2240_v47, 4  ;;  %4306 = vmatprep.mubr.msk.bf16.mxu1 %vm3654_vm10, %v3623_v14  ;;  %v6543_v47 = vld [vmem:[#allocation2 + $0xd0] sm:$0xf] }
 0x184   : > { %v2220_v43 = vrot.slane %v2219_v62, 4  ;;  %v2246_v27 = vshll.u32 %v6497_v61, 16  ;;  %v2395_v31 = vshrl.u32 %v6506_v51, 16  ;;  %v2398_v29 = vshll.u32 %v6506_v51, 16 }
 0x185   : > { %v1831_v8 = vrot.slane %v1829_v19, 5  ;;  %v2234_v50 = vrot.slane %v2233_v56, 4  ;;  %v4185_v23 = vcombine.low %v6483_v30, %v6489_v48  ;;  %v2005_v6 = vsel %vm4647_vm9, %v4074_v63, %v2004_v3  ;;  %v6540_v48 = vpop.permute.xlu0 %2994 }
 0x186   : > { %v2225_v22 = vsel %vm4674_vm13, %v2220_v43, %v2224_v59  ;;  %v2238_v13 = vrot.slane %v2236_v57, 5  ;;  %v2408_v35 = vshrl.u32 %v6515_v54, 16  ;;  %v2419_v24 = vshrl.u32 %v6511_v41, 16 }
 0x187   : > { %v1832_v1 = vsel %vm4674_vm13, %v1827_v21, %v1831_v8  ;;  %v4209_v36 = vcombine.low %v2215_v53, %v2225_v22  ;;  %v2008_v30 = vsel %vm4647_vm9, %v2006_v42, %v2007_v40  ;;  %v2248_v2 = vrot.slane %v2246_v27, 5  ;;  %v2449_v53 = vld [vmem:[#allocation2 + $0x6c] sm:$0xe]  ;;  %v6555_v40 = vld [vmem:[#allocation2 + $0xc8] sm:$0x1] }
 0x188   : > { %v4170_v37 = vcombine.low %v1822_v15, %v1832_v1  ;;  %v2243_v3 = vor.u32 %v2242_v45, %v2238_v13  ;;  %v2397_v34 = vrot.slane %v2395_v31, 4  ;;  %v2400_v9 = vrot.slane %v2398_v29, 5  ;;  %v2057_v22 = vld [vmem:[#allocation2 + $0xd4] sm:$0x1] }
 0x189   : > { %3254 = vrot.lane.b32.xlu0 %v4209_v36, %s4543_s6  ;;  %v2239_v20 = vsel %vm4674_vm13, %v2234_v50, %v2238_v13  ;;  %v2422_v32 = vshll.u32 %v6511_v41, 16  ;;  %v4081_v18 = vrot.slane %v2448_v10, 9  ;;  %v2550_v21 = vrot.slane %v6426_v55, 5 }
 0x18a   : > { %3016 = vrot.lane.b32.xlu1 %v4170_v37, %s4541_s4  ;;  %v2244_v5 = vrot.slane %v2243_v3, 4  ;;  %v2553_v63 = vrot.slane %v6470_v58, 5  ;;  %v4186_v42 = vcombine.low %v2005_v6, %v2008_v30  ;;  %v3592_v44 = vsel %vm3568_vm8, %v6475_v25, %v6338_v17  ;;  %v6558_v17 = vpop.permute.xlu1 %2930  ;;  %s6773_s4 = scalar_lea.hbm %s6829_s2, %s4260_s27 }
 0x18b   : > { %v2421_v46 = vrot.slane %v2419_v24, 4  ;;  %v2404_v15 = vshll.u32 %v6515_v54, 16  ;;  %v2551_v59 = vsel %vm4647_vm9, %v4081_v18, %v2550_v21  ;;  %v2552_v19 = vrot.slane %v2550_v21, 4 }
 0x18c   : > { %v2249_v62 = vsel %vm4674_vm13, %v2244_v5, %v2248_v2  ;;  %v2410_v55 = vrot.slane %v2408_v35, 4  ;;  %v2432_v14 = vshrl.u32 %v6543_v47, 16  ;;  %v2401_v56 = vor.u32 %v2400_v9, %v2397_v34 }
 0x18d   : > { %v4210_v58 = vcombine.low %v2239_v20, %v2249_v62  ;;  %v2406_v43 = vrot.slane %v2404_v15, 5  ;;  %v2424_v25 = vrot.slane %v2422_v32, 5  ;;  %v2554_v57 = vsel %vm4647_vm9, %v2552_v19, %v2553_v63  ;;  %v6568_v50 = vpop.permute.xlu0 %2996 }
 0x18e   : > { %3094 = vrot.lane.b32.xlu1 %v4185_v23, %s4540_s3  ;;  %v3625_v45 = vsel %vm3601_vm11, %v3592_v44, %v6437_v12  ;;  %v4082_v27 = vrot.slane %v2449_v53, 9  ;;  %v4225_v8 = vcombine.low %v2551_v59, %v2554_v57  ;;  %v2414_v29 = vshll.u32 %v6555_v40, 16  ;;  %v6579_v3 = vpop.permute.xlu1 %2932 }
 0x18f   : > { %3256 = vrot.lane.b32.xlu0 %v4210_v58, %s4543_s6  ;;  %v2411_v31 = vor.u32 %v2410_v55, %v2406_v43  ;;  %4307 = vmatmul.mubr.msk.bf16.gmra.mxu1 %vm3654_vm10, %v3625_v45  ;;  %v2557_v23 = vrot.slane %v6452_v28, 5  ;;  %v2560_v6 = vrot.slane %v6497_v61, 5  ;;  %v2428_v13 = vshll.u32 %v6543_v47, 16  ;;  %v2457_v55 = vld [vmem:[#allocation2 + $0xcc] sm:$0xe] }
 0x190   : > { %v4201_v12 = vcombine.low %v6506_v51, %v6515_v54  ;;  %v2402_v1 = vrot.slane %v2401_v56, 4  ;;  %v2434_v36 = vrot.slane %v2432_v14, 4  ;;  %v2425_v10 = vor.u32 %v2424_v25, %v2421_v46 }
 0x191   : > { %v2558_v35 = vsel %vm4647_vm9, %v4082_v27, %v2557_v23  ;;  %v2559_v24 = vrot.slane %v2557_v23, 4  ;;  %v2430_v37 = vrot.slane %v2428_v13, 5  ;;  %v2412_v28 = vrot.slane %v2411_v31, 4  ;;  %v3075_v9 = vpop.permute.xlu0 %3074  ;;  %v4443_v13 = vld [vmem:[#allocation2 + $0x34] sm:$0xf] }
 0x192   : > { %3096 = vrot.lane.b32.xlu1 %v4186_v42, %s4540_s3  ;;  %v2416_v61 = vrot.slane %v2414_v29, 5  ;;  %v2438_v30 = vshll.u32 %v2057_v22, 16  ;;  %v4202_v20 = vcombine.low %v6511_v41, %v6543_v47  ;;  %v2407_v32 = vsel %vm4674_vm13, %v2402_v1, %v2406_v43  ;;  %v2456_v42 = vld [vmem:[#allocation2 + $0xc0] sm:$0xe]  ;;  %v6592_v46 = vpop.permute.xlu1 %3010 }
 0x193   : > { %3334 = vrot.lane.b32.xlu0 %v4225_v8, %s4544_s7  ;;  %v2561_v51 = vsel %vm4647_vm9, %v2559_v24, %v2560_v6  ;;  %v2435_v2 = vor.u32 %v2434_v36, %v2430_v37  ;;  %v2426_v5 = vrot.slane %v2425_v10, 4  ;;  %v2606_v44 = vrot.slane %v6515_v54, 5  ;;  %v4444_v24 = vld [vmem:[#allocation2 + $0x3c] sm:$0xf]  ;;  %v4445_v10 = vld [vmem:[#allocation2 + $0x40] sm:$0xf] }
 0x194   : > { %v4226_v34 = vcombine.low %v2558_v35, %v2561_v51  ;;  %v2417_v18 = vsel %vm4674_vm13, %v2412_v28, %v2416_v61  ;;  %v2440_v63 = vrot.slane %v2438_v30, 5  ;;  %v4089_v53 = vrot.slane %v2456_v42, 9 }
 0x195   : > { %v2436_v21 = vrot.slane %v2435_v2, 4  ;;  %v4217_v15 = vcombine.low %v2407_v32, %v2417_v18  ;;  %v2431_v41 = vsel %vm4674_vm13, %v2426_v5, %v2430_v37  ;;  %v2608_v59 = vrot.slane %v2606_v44, 4  ;;  %v3077_v14 = vpop.permute.xlu0 %3076  ;;  %v4447_v18 = vld [vmem:[#allocation2 + $0x94] sm:$0xf] }
 0x196   : > { %3190 = vrot.lane.b32.xlu1 %v4201_v12, %s4542_s5  ;;  %v2609_v19 = vrot.slane %v6555_v40, 5  ;;  %v2613_v58 = vrot.slane %v6543_v47, 5  ;;  %v4090_v56 = vrot.slane %v2457_v55, 9  ;;  %v2607_v43 = vsel %vm4647_vm9, %v4089_v53, %v2606_v44  ;;  %v4448_v55 = vld [vmem:[#allocation2 + $0x9c] sm:$0xf] }
 0x197   : > { %3336 = vrot.lane.b32.xlu0 %v4226_v34, %s4544_s7  ;;  %v2441_v62 = vsel %vm4674_vm13, %v2436_v21, %v2440_v63  ;;  %v2616_v52 = vrot.slane %v2057_v22, 5  ;;  %v4442_v22 = vld [vmem:[#allocation2 + $0x30] sm:$0xf]  ;;  %v4096_v37 = vcombine.low %v4444_v24, %v4445_v10 }
 0x198   : > { %v4218_v54 = vcombine.low %v2431_v41, %v2441_v62  ;;  %v2610_v25 = vsel %vm4647_vm9, %v2608_v59, %v2609_v19  ;;  %v2615_v57 = vrot.slane %v2613_v58, 4  ;;  %v2614_v47 = vsel %vm4647_vm9, %v4090_v56, %v2613_v58  ;;  %v4449_v58 = vld [vmem:[#allocation2 + $0xa0] sm:$0xf] }
 0x199   : > { %v3171_v27 = vpop.permute.xlu0 %3170  ;;  %v4233_v40 = vcombine.low %v2607_v43, %v2610_v25  ;;  %v4095_v12 = vcombine.low %v4442_v22, %v4443_v13 }
 0x19a   : > { %3192 = vrot.lane.b32.xlu1 %v4202_v20, %s4542_s5  ;;  %v2617_v8 = vsel %vm4647_vm9, %v2615_v57, %v2616_v52  ;;  %s4458_s5 = scalar_lea.vmem %s6776_s29, 4096 }
 0x19b   : > { %v4234_v29 = vcombine.low %v2614_v47, %v2617_v8  ;;  %v3369_v36 = vsel %vm3354_vm15, %v4095_v12, %v6310_v26  ;;  %v3372_v26 = vsel %vm3354_vm15, %v4096_v37, %v6369_v39  ;;  %v4446_v39 = vld [vmem:[#allocation2 + $0x90] sm:$0xf]  ;;  %p4459_p12 = scmp.ne.s32.totalorder %s6776_s29, %s4458_s5 }
 0x19c   : > { %v6606_v45 = vpop.permute.xlu1 %3012  ;;  %v3413_v16 = vsel %vm3403_vm1, %v3369_v36, %v6407_v38  ;;  %v4103_v21 = vcombine.low %v4446_v39, %v4447_v18  ;;  %v4450_v18 = vld [vmem:[#allocation2 + $0x48] sm:$0xf] }
 0x19d   : > { %v3446_v28 = vsel %vm3436_vm2, %v3413_v16, %v6478_v49  ;;  %v3415_v49 = vsel %vm3403_vm1, %v3372_v26, %v6447_v4  ;;  %p4460_p13 = pnand %p4459_p12, %p4602_p4 }
 0x19e   : > { %3270 = vrot.lane.b32.xlu1 %v4217_v15, %s4543_s6  ;;  %v3479_v30 = vsel %vm3469_vm4, %v3446_v28, %v6540_v48  ;;  %v3448_v48 = vsel %vm3436_vm2, %v3415_v49, %v6513_v60  ;;  %v3393_v60 = vsel %vm3354_vm15, %v4103_v21, %v6396_v7  ;;  %v4451_v21 = vld [vmem:[#allocation2 + $0x4c] sm:$0xf] }
 0x19f   : > { %v3512_v51 = vsel %vm3502_vm6, %v3479_v30, %v3075_v9  ;;  %v3481_v5 = vsel %vm3469_vm4, %v3448_v48, %v6568_v50  ;;  %v3429_v50 = vsel %vm3403_vm1, %v3393_v60, %v6499_v11  ;;  %p4461_p0 = pneg %p4460_p13 }
 0x1a0   : > { %v3091_v31 = vpop.permute.xlu1 %3090  ;;  %v3545_v2 = vsel %vm3535_vm7, %v3512_v51, %v3171_v27  ;;  %v3514_v63 = vsel %vm3502_vm6, %v3481_v5, %v3077_v14  ;;  %v3462_v53 = vsel %vm3436_vm2, %v3429_v50, %v6558_v17  ;;  %v4104_v14 = vcombine.low %v4448_v55, %v4449_v58 }
 0x1a1   : > { %v3495_v19 = vsel %vm3469_vm4, %v3462_v53, %v6592_v46 }
 0x1a2   : > { %3272 = vrot.lane.b32.xlu1 %v4218_v54, %s4543_s6  ;;  %v3173_v23 = vpop.permute.xlu0 %3172  ;;  %v3528_v54 = vsel %vm3502_vm6, %v3495_v19, %v3091_v31  ;;  %v3396_v25 = vsel %vm3354_vm15, %v4104_v14, %v6465_v33  ;;  %s4545_s6 = smov [#allocation3]  }
 0x1a3   : > { %v3547_v44 = vsel %vm3535_vm7, %v3514_v63, %v3173_v23  ;;  %v3431_v46 = vsel %vm3403_vm1, %v3396_v25, %v6532_v0  ;;  %v4097_v63 = vcombine.low %v4450_v18, %v4451_v21 }
 0x1a4   : > { %v3093_v6 = vpop.permute.xlu1 %3092  ;;  %v3464_v57 = vsel %vm3436_vm2, %v3431_v46, %v6579_v3 }
 0x1a6   : > { %3350 = vrot.lane.b32.xlu1 %v4233_v40, %s4544_s7  ;;  %v3251_v1 = vpop.permute.xlu0 %3250  ;;  %v3497_v40 = vsel %vm3469_vm4, %v3464_v57, %v6606_v45 }
 0x1a7   : > { %v3578_v34 = vsel %vm3568_vm8, %v3545_v2, %v3251_v1  ;;  %v3530_v47 = vsel %vm3502_vm6, %v3497_v40, %v3093_v6 }
 0x1a8   : > { %v3187_v35 = vpop.permute.xlu1 %3186 }
 0x1a9   : > { %v3561_v7 = vsel %vm3535_vm7, %v3528_v54, %v3187_v35 }
 0x1aa   : > { %3352 = vrot.lane.b32.xlu1 %v4234_v29, %s4544_s7  ;;  %s4462_s7 = sshll.u32 %s4545_s6, 4  ;;  %s4463_s7 = int_to_ptr.vmem [resolvable:$false] %s4462_s7 }
 0x1ab   : > { %s4464_s8 = scalar_lea.vmem %s4463_s7, 8192  ;;  %p4465_p1 = scmp.lt.s32.totalorder %s6776_s29, %s4463_s7 }
 0x1ac   : > { %p4466_p2 = scmp.lt.s32.totalorder %s4464_s8, %s4458_s5 }
 0x1ae   : > { %v3189_v38 = vpop.permute.xlu1 %3188  ;;  %p4467_p3 = por %p4466_p2, %p4465_p1 }
 0x1af   : > { %v3563_v33 = vsel %vm3535_vm7, %v3530_v47, %v3189_v38 }
 0x1b0   : > { %p4468_p5 = pnand %p4467_p3, %p4461_p0 }
 0x1b2   : > { %v3253_v61 = vpop.permute.xlu0 %3252  ;;  %v3267_v42 = vpop.permute.xlu1 %3266 }
 0x1b3   : > { %v3580_v15 = vsel %vm3568_vm8, %v3547_v44, %v3253_v61  ;;  %v3594_v56 = vsel %vm3568_vm8, %v3561_v7, %v3267_v42 }
 0x1b6   : > { %v3331_v20 = vpop.permute.xlu0 %3330 }
 0x1b7   : > { %v3611_v32 = vsel %vm3601_vm11, %v3578_v34, %v3331_v20 }
 0x1b8   : > { %4294 = vmatprep.mubr.msk.bf16.mxu0 %vm3654_vm10, %v3611_v32 }
 0x1ba   : > { %v6634_v9 = vpop.permute.xlu0 %2742 }
 0x1bb   : > { %v3375_v50 = vsel %vm3354_vm15, %v4097_v63, %v6634_v9 }
 0x1be   : > { %v3333_v41 = vpop.permute.xlu0 %3332 }
 0x1bf   : > { %v3613_v4 = vsel %vm3601_vm11, %v3580_v15, %v3333_v41  ;;  %v4452_v41 = vld [vmem:[#allocation2 + $0x54] sm:$0xf] }
 0x1c0   : > { %4295 = vmatmul.mubr.msk.bf16.gmra.mxu0 %vm3654_vm10, %v3613_v4  ;;  %v4453_v4 = vld [vmem:[#allocation2 + $0x58] sm:$0xf] }
 0x1c1   : > { %v4098_v60 = vcombine.low %v4452_v41, %v4453_v4 }
 0x1c2   : > { %v6649_v59 = vpop.permute.xlu0 %2744 }
 0x1c3   : > { %v3269_v62 = vpop.permute.xlu1 %3268  ;;  %v3378_v19 = vsel %vm3354_vm15, %v4098_v60, %v6649_v59 }
 0x1c4   : > { %v3596_v8 = vsel %vm3568_vm8, %v3563_v33, %v3269_v62 }
 0x1c7   : > { %v3347_v43 = vpop.permute.xlu1 %3346  ;;  %v6656_v11 = vpop.permute.xlu0 %2822 }
 0x1c8   : > { %v3627_v17 = vsel %vm3601_vm11, %v3594_v56, %v3347_v43  ;;  %v3417_v53 = vsel %vm3403_vm1, %v3375_v50, %v6656_v11 }
 0x1c9   : > { %4310 = vmatprep.mubr.msk.bf16.mxu1 %vm3654_vm10, %v3627_v17 }
 0x1cb   : > { %v6666_v52 = vpop.permute.xlu1 %2758  ;;  %v6668_v27 = vpop.permute.xlu0 %2824 }
 0x1cc   : > { %v3419_v7 = vsel %vm3403_vm1, %v3378_v19, %v6668_v27 }
 0x1cf   : > { %v3349_v31 = vpop.permute.xlu1 %3348  ;;  %v2919_v3 = vpop.permute.xlu0 %2918 }
 0x1d0   : > { %v3629_v0 = vsel %vm3601_vm11, %v3596_v8, %v3349_v31  ;;  %v3450_v55 = vsel %vm3436_vm2, %v3417_v53, %v2919_v3  ;;  %v4454_v31 = vld [vmem:[#allocation2 + $0xa8] sm:$0xf] }
 0x1d1   : > { %4311 = vmatmul.mubr.msk.bf16.gmra.mxu1 %vm3654_vm10, %v3629_v0  ;;  %v4455_v0 = vld [vmem:[#allocation2 + $0xac] sm:$0xf] }
 0x1d2   : > { %v4105_v3 = vcombine.low %v4454_v31, %v4455_v0 }
 0x1d3   : > { %v6677_v29 = vpop.permute.xlu1 %2760  ;;  %v2921_v23 = vpop.permute.xlu0 %2920 }
 0x1d4   : > { %v3452_v43 = vsel %vm3436_vm2, %v3419_v7, %v2921_v23 }
 0x1d7   : > { %v6679_v22 = vpop.permute.xlu1 %2838 }
 0x1db   : > { %v6682_v45 = vpop.permute.xlu1 %2840 }
 0x1dd   : > { %v2999_v13 = vpop.permute.xlu0 %2998 }
 0x1de   : > { %v3483_v14 = vsel %vm3469_vm4, %v3450_v55, %v2999_v13  ;;  %v3399_v13 = vsel %vm3354_vm15, %v4105_v3, %v6666_v52 }
 0x1df   : > { %v6686_v36 = vpop.permute.xlu1 %2934 }
 0x1e1   : > { %v3001_v12 = vpop.permute.xlu0 %3000 }
 0x1e2   : > { %v3485_v59 = vsel %vm3469_vm4, %v3452_v43, %v3001_v12  ;;  %v4456_v12 = vld [vmem:[#allocation2 + $0xb4] sm:$0xf] }
 0x1e5   : > { %v3079_v6 = vpop.permute.xlu0 %3078 }
 0x1e6   : > { %v3516_v54 = vsel %vm3502_vm6, %v3483_v14, %v3079_v6  ;;  %v4457_v6 = vld [vmem:[#allocation2 + $0xb8] sm:$0xf] }
 0x1e8   : > { %v4288_v1 = vpop.f32.mrf.mxu0 }
 0x1e9   : > { %v3854_v35 = vmax.f32 %v4288_v1, 0.0  ;;  %v4106_v1 = vcombine.low %v4456_v12, %v4457_v6 }
 0x1ea   : > { %v3081_v16 = vpop.permute.xlu0 %3080  ;;  %v3725_v24 = vpop.f32.mrf.mxu0 }
 0x1eb   : > { %3886 = vst [vmem:[%s6688_s26 + $0x10] sm:$0xff] %v3854_v35  ;;  %v3852_v10 = vmax.f32 %v3725_v24, 0.0  ;;  %v3518_v46 = vsel %vm3502_vm6, %v3485_v59, %v3081_v16  ;;  %v3433_v35 = vsel %vm3403_vm1, %v3399_v13, %v6679_v22 }
 0x1ec   : > { %v4289_v37 = vpop.f32.mrf.mxu0  ;;  %v6693_v2 = vpop.permute.xlu1 %2936  ;;  %v3466_v16 = vsel %vm3436_vm2, %v3433_v35, %v6686_v36 }
 0x1ed   : > { %3884 = vst [vmem:[%s6688_s26] sm:$0xff] %v3852_v10  ;;  %v3855_v28 = vmax.f32 %v4289_v37, 0.0  ;;  %v3402_v37 = vsel %vm3354_vm15, %v4106_v1, %v6677_v29 }
 0x1ee   : > { %v3728_v61 = vpop.f32.mrf.mxu0  ;;  %v3175_v30 = vpop.permute.xlu0 %3174  ;;  %v3435_v52 = vsel %vm3403_vm1, %v3402_v37, %v6682_v45 }
 0x1ef   : > { %3887 = vst [vmem:[%s6688_s26 + $0x18] sm:$0xff] %v3855_v28  ;;  %v3853_v51 = vmax.f32 %v3728_v61, 0.0  ;;  %v3549_v56 = vsel %vm3535_vm7, %v3516_v54, %v3175_v30  ;;  %v3468_v22 = vsel %vm3436_vm2, %v3435_v52, %v6693_v2 }
 0x1f0   : > { %v3015_v20 = vpop.permute.xlu1 %3014 }
 0x1f1   : > { %3885 = vst [vmem:[%s6688_s26 + $0x8] sm:$0xff] %v3853_v51  ;;  %v3499_v10 = vsel %vm3469_vm4, %v3466_v16, %v3015_v20 }
 0x1f2   : > { %v4304_v26 = vpop.f32.mrf.mxu1  ;;  %v3177_v34 = vpop.permute.xlu0 %3176 }
 0x1f3   : > { %v3870_v38 = vmax.f32 %v4304_v26, 0.0  ;;  %v3551_v57 = vsel %vm3535_vm7, %v3518_v46, %v3177_v34 }
 0x1f4   : > { %v3789_v32 = vpop.f32.mrf.mxu1 }
 0x1f5   : > { %3902 = vst [vmem:[%s6688_s26 + $0x90] sm:$0xff] %v3870_v38  ;;  %v3868_v49 = vmax.f32 %v3789_v32, 0.0 }
 0x1f6   : > { %v4305_v48 = vpop.f32.mrf.mxu1 }
 0x1f7   : > { %3900 = vst [vmem:[%s6688_s26 + $0x80] sm:$0xff] %v3868_v49  ;;  %v3871_v5 = vmax.f32 %v4305_v48, 0.0 }
 0x1f8   : > { %v3792_v39 = vpop.f32.mrf.mxu1 }
 0x1f9   : > { %3903 = vst [vmem:[%s6688_s26 + $0x98] sm:$0xff] %v3871_v5  ;;  %v3869_v44 = vmax.f32 %v3792_v39, 0.0 }
 0x1fb   : > { %v3255_v42 = vpop.permute.xlu0 %3254  ;;  %3901 = vst [vmem:[%s6688_s26 + $0x88] sm:$0xff] %v3869_v44 }
 0x1fc   : > { %v3017_v15 = vpop.permute.xlu1 %3016  ;;  %v3582_v11 = vsel %vm3568_vm8, %v3549_v56, %v3255_v42 }
 0x1fd   : > { %v3501_v51 = vsel %vm3469_vm4, %v3468_v22, %v3017_v15 }
 0x200   : > { %v3095_v62 = vpop.permute.xlu1 %3094 }
 0x201   : > { %v3257_v58 = vpop.permute.xlu0 %3256  ;;  %v3532_v28 = vsel %vm3502_vm6, %v3499_v10, %v3095_v62 }
 0x202   : > { %v3584_v27 = vsel %vm3568_vm8, %v3551_v57, %v3257_v58 }
 0x204   : > { %v3097_v9 = vpop.permute.xlu1 %3096 }
 0x205   : > { %v3335_v17 = vpop.permute.xlu0 %3334  ;;  %v3534_v29 = vsel %vm3502_vm6, %v3501_v51, %v3097_v9 }
 0x206   : > { %v3615_v25 = vsel %vm3601_vm11, %v3582_v11, %v3335_v17 }
 0x207   : > { %4298 = vmatprep.mubr.msk.bf16.mxu0 %vm3654_vm10, %v3615_v25 }
 0x208   : > { %v3191_v40 = vpop.permute.xlu1 %3190 }
 0x209   : > { %v3337_v47 = vpop.permute.xlu0 %3336  ;;  %v3565_v61 = vsel %vm3535_vm7, %v3532_v28, %v3191_v40 }
 0x20a   : > { %v3617_v33 = vsel %vm3601_vm11, %v3584_v27, %v3337_v47 }
 0x20b   : > { %4299 = vmatmul.mubr.msk.bf16.gmra.mxu0 %vm3654_vm10, %v3617_v33 }
 0x20c   : > { %v3193_v8 = vpop.permute.xlu1 %3192 }
 0x20d   : > { %v3567_v45 = vsel %vm3535_vm7, %v3534_v29, %v3193_v8 }
 0x210   : > { %v3271_v23 = vpop.permute.xlu1 %3270 }
 0x211   : > { %v3598_v30 = vsel %vm3568_vm8, %v3565_v61, %v3271_v23 }
 0x214   : > { %v3273_v24 = vpop.permute.xlu1 %3272 }
 0x215   : > { %v3600_v34 = vsel %vm3568_vm8, %v3567_v45, %v3273_v24 }
 0x218   : > { %v3351_v36 = vpop.permute.xlu1 %3350 }
 0x219   : > { %v3631_v26 = vsel %vm3601_vm11, %v3598_v30, %v3351_v36 }
 0x21a   : > { %4314 = vmatprep.mubr.msk.bf16.mxu1 %vm3654_vm10, %v3631_v26 }
 0x21c   : > { %v3353_v38 = vpop.permute.xlu1 %3352 }
 0x21d   : > { %v3633_v2 = vsel %vm3601_vm11, %v3600_v34, %v3353_v38 }
 0x21e   : > { %4315 = vmatmul.mubr.msk.bf16.gmra.mxu1 %vm3654_vm10, %v3633_v2 }
 0x242   : > { %v4292_v20 = vpop.f32.mrf.mxu0 }
 0x243   : > { %v3858_v32 = vmax.f32 %v4292_v20, 0.0 }
 0x244   : > { %v3741_v49 = vpop.f32.mrf.mxu0 }
 0x245   : > { %3890 = vst [vmem:[%s6688_s26 + $0x30] sm:$0xff] %v3858_v32  ;;  %v3856_v48 = vmax.f32 %v3741_v49, 0.0 }
 0x246   : > { %v4293_v5 = vpop.f32.mrf.mxu0 }
 0x247   : > { %3888 = vst [vmem:[%s6688_s26 + $0x20] sm:$0xff] %v3856_v48  ;;  %v3859_v39 = vmax.f32 %v4293_v5, 0.0 }
 0x248   : > { %v3744_v18 = vpop.f32.mrf.mxu0 }
 0x249   : > { %3891 = vst [vmem:[%s6688_s26 + $0x38] sm:$0xff] %v3859_v39  ;;  %v3857_v21 = vmax.f32 %v3744_v18, 0.0 }
 0x24b   : > { %3889 = vst [vmem:[%s6688_s26 + $0x28] sm:$0xff] %v3857_v21 }
 0x24f   : > { %v4308_v63 = vpop.f32.mrf.mxu1 }
 0x250   : > { %v3874_v42 = vmax.f32 %v4308_v63, 0.0 }
 0x251   : > { %v3805_v44 = vpop.f32.mrf.mxu1 }
 0x252   : > { %3906 = vst [vmem:[%s6688_s26 + $0xb0] sm:$0xff] %v3874_v42  ;;  %v3872_v15 = vmax.f32 %v3805_v44, 0.0 }
 0x253   : > { %v4309_v41 = vpop.f32.mrf.mxu1 }
 0x254   : > { %3904 = vst [vmem:[%s6688_s26 + $0xa0] sm:$0xff] %v3872_v15  ;;  %v3875_v4 = vmax.f32 %v4309_v41, 0.0 }
 0x255   : > { %v3808_v60 = vpop.f32.mrf.mxu1 }
 0x256   : > { %3907 = vst [vmem:[%s6688_s26 + $0xb8] sm:$0xff] %v3875_v4  ;;  %v3873_v50 = vmax.f32 %v3808_v60, 0.0 }
 0x258   : > { %3905 = vst [vmem:[%s6688_s26 + $0xa8] sm:$0xff] %v3873_v50 }
 0x280   : > { %v4296_v53 = vpop.f32.mrf.mxu0 }
 0x281   : > { %v3862_v62 = vmax.f32 %v4296_v53, 0.0 }
 0x282   : > { %v3757_v19 = vpop.f32.mrf.mxu0 }
 0x283   : > { %3894 = vst [vmem:[%s6688_s26 + $0x50] sm:$0xff] %v3862_v62  ;;  %v3860_v55 = vmax.f32 %v3757_v19, 0.0 }
 0x284   : > { %v4297_v58 = vpop.f32.mrf.mxu0 }
 0x285   : > { %3892 = vst [vmem:[%s6688_s26 + $0x40] sm:$0xff] %v3860_v55  ;;  %v3863_v14 = vmax.f32 %v4297_v58, 0.0 }
 0x286   : > { %v3760_v54 = vpop.f32.mrf.mxu0 }
 0x287   : > { %3895 = vst [vmem:[%s6688_s26 + $0x58] sm:$0xff] %v3863_v14  ;;  %v3861_v7 = vmax.f32 %v3760_v54, 0.0 }
 0x289   : > { %3893 = vst [vmem:[%s6688_s26 + $0x48] sm:$0xff] %v3861_v7 }
 0x291   : > { %v4312_v56 = vpop.f32.mrf.mxu1 }
 0x292   : > { %v3878_v9 = vmax.f32 %v4312_v56, 0.0 }
 0x293   : > { %v3821_v43 = vpop.f32.mrf.mxu1 }
 0x294   : > { %3910 = vst [vmem:[%s6688_s26 + $0xd0] sm:$0xff] %v3878_v9  ;;  %v3876_v11 = vmax.f32 %v3821_v43, 0.0 }
 0x295   : > { %v4313_v17 = vpop.f32.mrf.mxu1 }
 0x296   : > { %3908 = vst [vmem:[%s6688_s26 + $0xc0] sm:$0xff] %v3876_v11  ;;  %v3879_v59 = vmax.f32 %v4313_v17, 0.0 }
 0x297   : > { %v3824_v25 = vpop.f32.mrf.mxu1 }
 0x298   : > { %3911 = vst [vmem:[%s6688_s26 + $0xd8] sm:$0xff] %v3879_v59  ;;  %v3877_v46 = vmax.f32 %v3824_v25, 0.0 }
 0x29a   : > { %3909 = vst [vmem:[%s6688_s26 + $0xc8] sm:$0xff] %v3877_v46 }
 0x2cb   : > { %v4300_v57 = vpop.f32.mrf.mxu0 }
 0x2cc   : > { %v3866_v40 = vmax.f32 %v4300_v57, 0.0 }
 0x2cd   : > { %v3773_v27 = vpop.f32.mrf.mxu0 }
 0x2ce   : > { %3898 = vst [vmem:[%s6688_s26 + $0x70] sm:$0xff] %v3866_v40  ;;  %v3864_v47 = vmax.f32 %v3773_v27, 0.0 }
 0x2cf   : > { %v4301_v33 = vpop.f32.mrf.mxu0 }
 0x2d0   : > { %3896 = vst [vmem:[%s6688_s26 + $0x60] sm:$0xff] %v3864_v47  ;;  %v3867_v8 = vmax.f32 %v4301_v33, 0.0 }
 0x2d1   : > { %v3776_v31 = vpop.f32.mrf.mxu0 }
 0x2d2   : > { %3899 = vst [vmem:[%s6688_s26 + $0x78] sm:$0xff] %v3867_v8  ;;  %v3865_v0 = vmax.f32 %v3776_v31, 0.0 }
 0x2d4   : > { %3897 = vst [vmem:[%s6688_s26 + $0x68] sm:$0xff] %v3865_v0 }
 0x2de   : > { %v4316_v3 = vpop.f32.mrf.mxu1 }
 0x2df   : > { %v3882_v23 = vmax.f32 %v4316_v3, 0.0 }
 0x2e0   : > { %v3837_v13 = vpop.f32.mrf.mxu1 }
 0x2e1   : > { %3914 = vst [vmem:[%s6688_s26 + $0xf0] sm:$0xff] %v3882_v23  ;;  %v3880_v12 = vmax.f32 %v3837_v13, 0.0 }
 0x2e2   : > { %v4317_v6 = vpop.f32.mrf.mxu1 }
 0x2e3   : > { %3912 = vst [vmem:[%s6688_s26 + $0xe0] sm:$0xff] %v3880_v12  ;;  %v3883_v1 = vmax.f32 %v4317_v6, 0.0 }
 0x2e4   : > { %v3840_v35 = vpop.f32.mrf.mxu1 }
 0x2e5   : > { %3915 = vst [vmem:[%s6688_s26 + $0xf8] sm:$0xff] %v3883_v1  ;;  %v3881_v16 = vmax.f32 %v3840_v35, 0.0 }
 0x2e7   : > { %3913 = vst [vmem:[%s6688_s26 + $0xe8] sm:$0xff] %v3881_v16 }
 0x2e8   : > { %4471 = shalt.err (!%p4468_p5)
}
 0x2e9   : > { %s4472_s15 = scalar_lea.hbm %s6773_s4, 4096  ;;  %s4476_s20 = scalar_lea.hbm %s6829_s2, 8192 }
 0x2ea   : > { %p4473_p6 = scmp.ne.s32.totalorder %s6773_s4, %s4472_s15  ;;  %p4477_p10 = scmp.lt.s32.totalorder %s6773_s4, %s6829_s2 }
 0x2eb   : > { %p4478_p11 = scmp.lt.s32.totalorder %s4476_s20, %s4472_s15 }
 0x2ec   : > { %p4474_p7 = pnand %p4473_p6, %p4602_p4 }
 0x2ed   : > { %p4479_p12 = por %p4478_p11, %p4477_p10 }
 0x2ee   : > { %p4475_p9 = pneg %p4474_p7 }
 0x2f0   : > { %p4480_p13 = pnand %p4479_p12, %p4475_p9 }
 0x2f2   : > { %4483 = shalt.err (!%p4480_p13)
}
 0x2f3   : > { %s4546_s25 = smov 128  }
 0x2f4   : > { %4326 = dma.vmem_to_hbm [thread:$0]  (%p4602_p4), %s6776_s29, 4096, %s6773_s4, %s6781_s12, %s4546_s25, %s4546_s25, %s4537_s28  }
 0x2f5 PF: > { %p4332_p0 = scmp.ge.s32.totalorder %s4534_s14, 2  ;;  %s3948_s26 = sand.u32 1, %s4514_s9  }
 0x2f6   : > { %s3949_s27 = scalar_lea.sflag [#allocation4], %s3948_s26 }
 0x2f7   : > { %p4329_p1 = pnand %p4332_p0, %p4609_p8 }
 0x2f9   : > { %p4330_p2 = pneg %p4329_p1 }
 0x2fb   : > { %4509 = dma.done.wait (%p4330_p2), %s3949_s27, 4096  }
 0x2fc   : > { %4511 = vsyncadd (%p4330_p2), %s3949_s27, 4294963200  ;;  %s15_s14 = sadd.s32 1, %s4534_s14   ;;  %s6863_s9 = smov %s4518_s10 }
 0x2fd   : > { %p12_p3 = scmp.ge.s32.totalorder %s15_s14, 4   ;;  %s6864_s10 = smov %s4522_s11 }
 0x2fe   : > { %s6865_s11 = smov %s4615_s22  ;;  %s6866_s12 = smov %s4530_s13 }
 0x2ff   : > { %s6867_s13 = smov %s6869_s17  ;;  %14 = sbr.rel (!%p12_p3) target bundleno = 4 (0x4), region = 74 }
 0x304   :  { %3954 = vsyncpa [#allocation4], 1 }
 0x305   :  { %3956 = vsyncpa [#allocation4 + $0x1], 1 }

</bundles_post_ra>
